<compile_context>
chip_gen: v7x
topology: tpu7x:2x2x1
jax: 0.10.0
libtpu: 0.0.40
codegen_flags: <defaults>
</compile_context>

<pallas_src>
import jax
import jax.numpy as jnp
import numpy as np
from jax.experimental import pallas as pl
from jax.experimental.pallas import tpu as pltpu


def _make_downsample_kernel(C, Ho, Wo):
    def kernel(ph_ref, w3_ref, w5_ref, bias_ref, o_ref):
        # ph_ref  : (4, Ho+2, C, Wo+2)  stride-2 phases of reflect-pad-2(gelu(x))
        # w3_ref  : (3, 3, C, C)        [kh, kw, c_out, c_in]
        # w5_ref  : (5, 5, C, C)
        # bias_ref: (1, C, 1)           b3 + b5
        # o_ref   : (Ho, C, Wo)
        acc = jnp.zeros((Ho, C, Wo), dtype=jnp.float32)

        def accumulate(acc, w_ref, ksize, off):
            # off = offset of this conv's tap grid inside the shared pad-2 frame
            #       (1 for the 3x3/pad-1 conv, 0 for the 5x5/pad-2 conv).
            for kh in range(ksize):
                for kw in range(ksize):
                    ah, aw = kh + off, kw + off            # tap coords, pad-2 frame
                    pi = (ah % 2) * 2 + (aw % 2)           # which stride-2 phase plane
                    r0, c0 = ah // 2, aw // 2              # offset inside that plane
                    patch = ph_ref[pi, r0:r0 + Ho, :, c0:c0 + Wo]   # (Ho, Cin, Wo)
                    wk = w_ref[kh, kw, :, :]                        # (Cout, Cin)
                    wk_b = jnp.broadcast_to(wk, (Ho, C, C))
                    # Batched-over-output-rows MXU matmul:
                    #   out[h, o, w] += sum_c W[o, c] * patch[h, c, w]
                    acc = acc + jnp.einsum(
                        'hoc,hcw->how', wk_b, patch,
                        preferred_element_type=jnp.float32)
            return acc

        acc = accumulate(acc, w3_ref, 3, 1)   # Conv2d(3x3, stride 2, padding 1)
        acc = accumulate(acc, w5_ref, 5, 0)   # Conv2d(5x5, stride 2, padding 2)
        acc = acc + bias_ref[...]             # (1, C, 1) broadcasts over (Ho, C, Wo)
        o_ref[...] = acc.astype(o_ref.dtype)

    return kernel


@jax.jit
def downsample_forward(x, target_emb, w3, b3, w5, b5):
    """x: (B, C, H, W) f32 NCHW.  w3:(C,C,3,3) b3:(C,)  w5:(C,C,5,5) b5:(C,)."""
    del target_emb  # unused by DownSample.forward (kept for signature parity)
    B, C, H, W = x.shape
    assert H % 2 == 0 and W % 2 == 0, "stride-2 downsample expects even spatial dims"
    # TODO(synk): odd H/W would need one extra reflect row/col; not needed here.
    Ho, Wo = H // 2, W // 2
    Hh, Wh = Ho + 2, Wo + 2                      # = (H + 4) // 2, (W + 4) // 2

    # ---- fused XLA prologue: exact GELU, shared reflect-pad(2), stride-2 phase split
    a = jax.nn.gelu(x, approximate=False)        # exact erf GELU, matches nn.GELU()
    ap = jnp.pad(a, ((0, 0), (0, 0), (2, 2), (2, 2)), mode='reflect')
    ph = ap.reshape(B, C, Hh, 2, Wh, 2)
    # -> (B, 4, Hh, C, Wh) with phase index pi = 2*p + q, C on sublanes, W on lanes
    ph = jnp.transpose(ph, (0, 3, 5, 2, 1, 4)).reshape(B, 4, Hh, C, Wh)

    w3_t = jnp.transpose(w3, (2, 3, 0, 1))       # (3, 3, Cout, Cin)
    w5_t = jnp.transpose(w5, (2, 3, 0, 1))       # (5, 5, Cout, Cin)
    bias = (b3 + b5).reshape(1, C, 1)

    # Explicit VMEM budget from the actual per-step footprint (review feedback):
    # double-buffered input block + output block, plus resident weights/bias.
    itemsize = 4
    in_block = 4 * Hh * C * Wh * itemsize
    out_block = Ho * C * Wo * itemsize
    w_bytes = (9 + 25) * C * C * itemsize + C * itemsize
    vmem_limit = int(min(96 << 20,
                         max(32 << 20, 2 * (in_block + out_block) + w_bytes + (2 << 20))))

    kernel = _make_downsample_kernel(C, Ho, Wo)

    out = pl.pallas_call(
        kernel,
        out_shape=jax.ShapeDtypeStruct((B, Ho, C, Wo), x.dtype),
        grid_spec=pltpu.PrefetchScalarGridSpec(
            num_scalar_prefetch=0,
            grid=(B,),
            in_specs=[
                pl.BlockSpec((None, 4, Hh, C, Wh), lambda b: (b, 0, 0, 0, 0)),  # phases
                pl.BlockSpec((3, 3, C, C), lambda b: (0, 0, 0, 0)),             # w3
                pl.BlockSpec((5, 5, C, C), lambda b: (0, 0, 0, 0)),             # w5
                pl.BlockSpec((1, C, 1), lambda b: (0, 0, 0)),                   # bias
            ],
            out_specs=pl.BlockSpec((None, Ho, C, Wo), lambda b: (b, 0, 0, 0)),
        ),
        compiler_params=pltpu.CompilerParams(
            dimension_semantics=("parallel",),   # batch across TCs on v7x
            vmem_limit_bytes=vmem_limit,
        ),
    )(ph, w3_t, w5_t, bias)

    return jnp.transpose(out, (0, 2, 1, 3))      # back to NCHW: (B, C, Ho, Wo)


def downsample_reference(x, target_emb, w3, b3, w5, b5):
    """Pure-JAX reference mirroring the PyTorch forward exactly."""
    del target_emb
    a = jax.nn.gelu(x, approximate=False)

    def conv(inp, w, b, pad):
        ip = jnp.pad(inp, ((0, 0), (0, 0), (pad, pad), (pad, pad)), mode='reflect')
        y = jax.lax.conv_general_dilated(
            ip, w, window_strides=(2, 2), padding='VALID',
            dimension_numbers=('NCHW', 'OIHW', 'NCHW'),
            precision=jax.lax.Precision.HIGHEST)
        return y + b.reshape(1, -1, 1, 1)

    return conv(a, w3, b3, 1) + conv(a, w5, b5, 2)


if __name__ == "__main__":
    B, C, H, W = 2, 4, 16, 16
    key = jax.random.PRNGKey(0)
    kx, k3, kb3, k5, kb5, ke = jax.random.split(key, 6)
    x = jax.random.normal(kx, (B, C, H, W), dtype=jnp.float32)
    w3 = 0.15 * jax.random.normal(k3, (C, C, 3, 3), dtype=jnp.float32)
    b3 = 0.10 * jax.random.normal(kb3, (C,), dtype=jnp.float32)
    w5 = 0.08 * jax.random.normal(k5, (C, C, 5, 5), dtype=jnp.float32)
    b5 = 0.10 * jax.random.normal(kb5, (C,), dtype=jnp.float32)
    target_emb = jax.random.normal(ke, (B, 32), dtype=jnp.float32)  # unused by forward

    out = downsample_forward(x, target_emb, w3, b3, w5, b5)
    out = jax.block_until_ready(out)

    ref = downsample_reference(x, target_emb, w3, b3, w5, b5)
    # Tolerance covers MXU default-precision differences between the in-kernel
    # matmul decomposition and XLA's (HIGHEST-precision) reference convolution.
    np.testing.assert_allclose(np.asarray(out), np.asarray(ref), rtol=5e-3, atol=5e-3)
    print("KERNEL_OK")
</pallas_src>

<mosaic_0001>
module attributes {stable_mosaic.version = 11 : i64} {
  func.func @kernel(%arg0: i32, %arg1: memref<1x4x10x4x10xf32, #tpu.memory_space<vmem>>, %arg2: memref<3x3x4x4xf32, #tpu.memory_space<vmem>>, %arg3: memref<5x5x4x4xf32, #tpu.memory_space<vmem>>, %arg4: memref<1x4x1xf32, #tpu.memory_space<vmem>>, %arg5: memref<1x8x4x8xf32, #tpu.memory_space<vmem>>) attributes {dimension_semantics = [#tpu.dimension_semantics<parallel>], iteration_bounds = array<i64: 2>, scalar_prefetch = 0 : i64, scratch_operands = 0 : i64, tpu.core_type = #tpu.core_type<tc>, window_params = [{transform_indices = @transform_0, window_bounds = array<i64: 1, 4, 10, 4, 10>}, {pipeline_mode = #tpu.pipeline_mode<synchronous>, transform_indices = @transform_1, window_bounds = array<i64: 3, 3, 4, 4>}, {pipeline_mode = #tpu.pipeline_mode<synchronous>, transform_indices = @transform_2, window_bounds = array<i64: 5, 5, 4, 4>}, {pipeline_mode = #tpu.pipeline_mode<synchronous>, transform_indices = @transform_3, window_bounds = array<i64: 1, 4, 1>}, {transform_indices = @transform_4, window_bounds = array<i64: 1, 8, 4, 8>}]} {
    %cst = arith.constant 0.000000e+00 : f32
    %0 = vector.broadcast %cst : f32 to vector<8x4x8xf32>
    %c0 = arith.constant 0 : index
    %c3 = arith.constant 3 : index
    %c0_0 = arith.constant 0 : index
    %c0_1 = arith.constant 0 : index
    %c0_2 = arith.constant 0 : index
    %1 = vector.load %arg1[%c0, %c3, %c0_0, %c0_1, %c0_2] : memref<1x4x10x4x10xf32, #tpu.memory_space<vmem>>, vector<1x1x8x4x8xf32>
    %2 = vector.shape_cast %1 : vector<1x1x8x4x8xf32> to vector<8x4x8xf32>
    %c0_3 = arith.constant 0 : index
    %c0_4 = arith.constant 0 : index
    %c0_5 = arith.constant 0 : index
    %c0_6 = arith.constant 0 : index
    %3 = vector.load %arg2[%c0_3, %c0_4, %c0_5, %c0_6] : memref<3x3x4x4xf32, #tpu.memory_space<vmem>>, vector<1x1x4x4xf32>
    %4 = vector.shape_cast %3 : vector<1x1x4x4xf32> to vector<4x4xf32>
    %5 = vector.shape_cast %4 : vector<4x4xf32> to vector<1x4x4xf32>
    %6 = vector.broadcast %5 : vector<1x4x4xf32> to vector<8x4x4xf32>
    "tpu.trace_start"() <{level = 10 : i32, message = "hoc,hcw->how"}> : () -> ()
    %cst_7 = arith.constant dense<0.000000e+00> : vector<8x4x8xf32>
    %7 = tpu.matmul %6, %2, %cst_7 {dimension_numbers = #tpu.dot_dimension_numbers<[2], [1], [1], [2], [0, 0, 0, 1, 1, 2], [0], [0]>} : vector<8x4x4xf32>, vector<8x4x8xf32>, vector<8x4x8xf32> -> vector<8x4x8xf32>
    "tpu.trace_stop"() : () -> ()
    %8 = arith.addf %0, %7 : vector<8x4x8xf32>
    %c0_8 = arith.constant 0 : index
    %c2 = arith.constant 2 : index
    %c0_9 = arith.constant 0 : index
    %c0_10 = arith.constant 0 : index
    %c1 = arith.constant 1 : index
    %9 = vector.load %arg1[%c0_8, %c2, %c0_9, %c0_10, %c1] : memref<1x4x10x4x10xf32, #tpu.memory_space<vmem>>, vector<1x1x8x4x8xf32>
    %10 = vector.shape_cast %9 : vector<1x1x8x4x8xf32> to vector<8x4x8xf32>
    %c0_11 = arith.constant 0 : index
    %c1_12 = arith.constant 1 : index
    %c0_13 = arith.constant 0 : index
    %c0_14 = arith.constant 0 : index
    %11 = vector.load %arg2[%c0_11, %c1_12, %c0_13, %c0_14] : memref<3x3x4x4xf32, #tpu.memory_space<vmem>>, vector<1x1x4x4xf32>
    %12 = vector.shape_cast %11 : vector<1x1x4x4xf32> to vector<4x4xf32>
    %13 = vector.shape_cast %12 : vector<4x4xf32> to vector<1x4x4xf32>
    %14 = vector.broadcast %13 : vector<1x4x4xf32> to vector<8x4x4xf32>
    "tpu.trace_start"() <{level = 10 : i32, message = "hoc,hcw->how"}> : () -> ()
    %cst_15 = arith.constant dense<0.000000e+00> : vector<8x4x8xf32>
    %15 = tpu.matmul %14, %10, %cst_15 {dimension_numbers = #tpu.dot_dimension_numbers<[2], [1], [1], [2], [0, 0, 0, 1, 1, 2], [0], [0]>} : vector<8x4x4xf32>, vector<8x4x8xf32>, vector<8x4x8xf32> -> vector<8x4x8xf32>
    "tpu.trace_stop"() : () -> ()
    %16 = arith.addf %8, %15 : vector<8x4x8xf32>
    %c0_16 = arith.constant 0 : index
    %c3_17 = arith.constant 3 : index
    %c0_18 = arith.constant 0 : index
    %c0_19 = arith.constant 0 : index
    %c1_20 = arith.constant 1 : index
    %17 = vector.load %arg1[%c0_16, %c3_17, %c0_18, %c0_19, %c1_20] : memref<1x4x10x4x10xf32, #tpu.memory_space<vmem>>, vector<1x1x8x4x8xf32>
    %18 = vector.shape_cast %17 : vector<1x1x8x4x8xf32> to vector<8x4x8xf32>
    %c0_21 = arith.constant 0 : index
    %c2_22 = arith.constant 2 : index
    %c0_23 = arith.constant 0 : index
    %c0_24 = arith.constant 0 : index
    %19 = vector.load %arg2[%c0_21, %c2_22, %c0_23, %c0_24] : memref<3x3x4x4xf32, #tpu.memory_space<vmem>>, vector<1x1x4x4xf32>
    %20 = vector.shape_cast %19 : vector<1x1x4x4xf32> to vector<4x4xf32>
    %21 = vector.shape_cast %20 : vector<4x4xf32> to vector<1x4x4xf32>
    %22 = vector.broadcast %21 : vector<1x4x4xf32> to vector<8x4x4xf32>
    "tpu.trace_start"() <{level = 10 : i32, message = "hoc,hcw->how"}> : () -> ()
    %cst_25 = arith.constant dense<0.000000e+00> : vector<8x4x8xf32>
    %23 = tpu.matmul %22, %18, %cst_25 {dimension_numbers = #tpu.dot_dimension_numbers<[2], [1], [1], [2], [0, 0, 0, 1, 1, 2], [0], [0]>} : vector<8x4x4xf32>, vector<8x4x8xf32>, vector<8x4x8xf32> -> vector<8x4x8xf32>
    "tpu.trace_stop"() : () -> ()
    %24 = arith.addf %16, %23 : vector<8x4x8xf32>
    %c0_26 = arith.constant 0 : index
    %c1_27 = arith.constant 1 : index
    %c1_28 = arith.constant 1 : index
    %c0_29 = arith.constant 0 : index
    %c0_30 = arith.constant 0 : index
    %25 = vector.load %arg1[%c0_26, %c1_27, %c1_28, %c0_29, %c0_30] : memref<1x4x10x4x10xf32, #tpu.memory_space<vmem>>, vector<1x1x8x4x8xf32>
    %26 = vector.shape_cast %25 : vector<1x1x8x4x8xf32> to vector<8x4x8xf32>
    %c1_31 = arith.constant 1 : index
    %c0_32 = arith.constant 0 : index
    %c0_33 = arith.constant 0 : index
    %c0_34 = arith.constant 0 : index
    %27 = vector.load %arg2[%c1_31, %c0_32, %c0_33, %c0_34] : memref<3x3x4x4xf32, #tpu.memory_space<vmem>>, vector<1x1x4x4xf32>
    %28 = vector.shape_cast %27 : vector<1x1x4x4xf32> to vector<4x4xf32>
    %29 = vector.shape_cast %28 : vector<4x4xf32> to vector<1x4x4xf32>
    %30 = vector.broadcast %29 : vector<1x4x4xf32> to vector<8x4x4xf32>
    "tpu.trace_start"() <{level = 10 : i32, message = "hoc,hcw->how"}> : () -> ()
    %cst_35 = arith.constant dense<0.000000e+00> : vector<8x4x8xf32>
    %31 = tpu.matmul %30, %26, %cst_35 {dimension_numbers = #tpu.dot_dimension_numbers<[2], [1], [1], [2], [0, 0, 0, 1, 1, 2], [0], [0]>} : vector<8x4x4xf32>, vector<8x4x8xf32>, vector<8x4x8xf32> -> vector<8x4x8xf32>
    "tpu.trace_stop"() : () -> ()
    %32 = arith.addf %24, %31 : vector<8x4x8xf32>
    %c0_36 = arith.constant 0 : index
    %c0_37 = arith.constant 0 : index
    %c1_38 = arith.constant 1 : index
    %c0_39 = arith.constant 0 : index
    %c1_40 = arith.constant 1 : index
    %33 = vector.load %arg1[%c0_36, %c0_37, %c1_38, %c0_39, %c1_40] : memref<1x4x10x4x10xf32, #tpu.memory_space<vmem>>, vector<1x1x8x4x8xf32>
    %34 = vector.shape_cast %33 : vector<1x1x8x4x8xf32> to vector<8x4x8xf32>
    %c1_41 = arith.constant 1 : index
    %c1_42 = arith.constant 1 : index
    %c0_43 = arith.constant 0 : index
    %c0_44 = arith.constant 0 : index
    %35 = vector.load %arg2[%c1_41, %c1_42, %c0_43, %c0_44] : memref<3x3x4x4xf32, #tpu.memory_space<vmem>>, vector<1x1x4x4xf32>
    %36 = vector.shape_cast %35 : vector<1x1x4x4xf32> to vector<4x4xf32>
    %37 = vector.shape_cast %36 : vector<4x4xf32> to vector<1x4x4xf32>
    %38 = vector.broadcast %37 : vector<1x4x4xf32> to vector<8x4x4xf32>
    "tpu.trace_start"() <{level = 10 : i32, message = "hoc,hcw->how"}> : () -> ()
    %cst_45 = arith.constant dense<0.000000e+00> : vector<8x4x8xf32>
    %39 = tpu.matmul %38, %34, %cst_45 {dimension_numbers = #tpu.dot_dimension_numbers<[2], [1], [1], [2], [0, 0, 0, 1, 1, 2], [0], [0]>} : vector<8x4x4xf32>, vector<8x4x8xf32>, vector<8x4x8xf32> -> vector<8x4x8xf32>
    "tpu.trace_stop"() : () -> ()
    %40 = arith.addf %32, %39 : vector<8x4x8xf32>
    %c0_46 = arith.constant 0 : index
    %c1_47 = arith.constant 1 : index
    %c1_48 = arith.constant 1 : index
    %c0_49 = arith.constant 0 : index
    %c1_50 = arith.constant 1 : index
    %41 = vector.load %arg1[%c0_46, %c1_47, %c1_48, %c0_49, %c1_50] : memref<1x4x10x4x10xf32, #tpu.memory_space<vmem>>, vector<1x1x8x4x8xf32>
    %42 = vector.shape_cast %41 : vector<1x1x8x4x8xf32> to vector<8x4x8xf32>
    %c1_51 = arith.constant 1 : index
    %c2_52 = arith.constant 2 : index
    %c0_53 = arith.constant 0 : index
    %c0_54 = arith.constant 0 : index
    %43 = vector.load %arg2[%c1_51, %c2_52, %c0_53, %c0_54] : memref<3x3x4x4xf32, #tpu.memory_space<vmem>>, vector<1x1x4x4xf32>
    %44 = vector.shape_cast %43 : vector<1x1x4x4xf32> to vector<4x4xf32>
    %45 = vector.shape_cast %44 : vector<4x4xf32> to vector<1x4x4xf32>
    %46 = vector.broadcast %45 : vector<1x4x4xf32> to vector<8x4x4xf32>
    "tpu.trace_start"() <{level = 10 : i32, message = "hoc,hcw->how"}> : () -> ()
    %cst_55 = arith.constant dense<0.000000e+00> : vector<8x4x8xf32>
    %47 = tpu.matmul %46, %42, %cst_55 {dimension_numbers = #tpu.dot_dimension_numbers<[2], [1], [1], [2], [0, 0, 0, 1, 1, 2], [0], [0]>} : vector<8x4x4xf32>, vector<8x4x8xf32>, vector<8x4x8xf32> -> vector<8x4x8xf32>
    "tpu.trace_stop"() : () -> ()
    %48 = arith.addf %40, %47 : vector<8x4x8xf32>
    %c0_56 = arith.constant 0 : index
    %c3_57 = arith.constant 3 : index
    %c1_58 = arith.constant 1 : index
    %c0_59 = arith.constant 0 : index
    %c0_60 = arith.constant 0 : index
    %49 = vector.load %arg1[%c0_56, %c3_57, %c1_58, %c0_59, %c0_60] : memref<1x4x10x4x10xf32, #tpu.memory_space<vmem>>, vector<1x1x8x4x8xf32>
    %50 = vector.shape_cast %49 : vector<1x1x8x4x8xf32> to vector<8x4x8xf32>
    %c2_61 = arith.constant 2 : index
    %c0_62 = arith.constant 0 : index
    %c0_63 = arith.constant 0 : index
    %c0_64 = arith.constant 0 : index
    %51 = vector.load %arg2[%c2_61, %c0_62, %c0_63, %c0_64] : memref<3x3x4x4xf32, #tpu.memory_space<vmem>>, vector<1x1x4x4xf32>
    %52 = vector.shape_cast %51 : vector<1x1x4x4xf32> to vector<4x4xf32>
    %53 = vector.shape_cast %52 : vector<4x4xf32> to vector<1x4x4xf32>
    %54 = vector.broadcast %53 : vector<1x4x4xf32> to vector<8x4x4xf32>
    "tpu.trace_start"() <{level = 10 : i32, message = "hoc,hcw->how"}> : () -> ()
    %cst_65 = arith.constant dense<0.000000e+00> : vector<8x4x8xf32>
    %55 = tpu.matmul %54, %50, %cst_65 {dimension_numbers = #tpu.dot_dimension_numbers<[2], [1], [1], [2], [0, 0, 0, 1, 1, 2], [0], [0]>} : vector<8x4x4xf32>, vector<8x4x8xf32>, vector<8x4x8xf32> -> vector<8x4x8xf32>
    "tpu.trace_stop"() : () -> ()
    %56 = arith.addf %48, %55 : vector<8x4x8xf32>
    %c0_66 = arith.constant 0 : index
    %c2_67 = arith.constant 2 : index
    %c1_68 = arith.constant 1 : index
    %c0_69 = arith.constant 0 : index
    %c1_70 = arith.constant 1 : index
    %57 = vector.load %arg1[%c0_66, %c2_67, %c1_68, %c0_69, %c1_70] : memref<1x4x10x4x10xf32, #tpu.memory_space<vmem>>, vector<1x1x8x4x8xf32>
    %58 = vector.shape_cast %57 : vector<1x1x8x4x8xf32> to vector<8x4x8xf32>
    %c2_71 = arith.constant 2 : index
    %c1_72 = arith.constant 1 : index
    %c0_73 = arith.constant 0 : index
    %c0_74 = arith.constant 0 : index
    %59 = vector.load %arg2[%c2_71, %c1_72, %c0_73, %c0_74] : memref<3x3x4x4xf32, #tpu.memory_space<vmem>>, vector<1x1x4x4xf32>
    %60 = vector.shape_cast %59 : vector<1x1x4x4xf32> to vector<4x4xf32>
    %61 = vector.shape_cast %60 : vector<4x4xf32> to vector<1x4x4xf32>
    %62 = vector.broadcast %61 : vector<1x4x4xf32> to vector<8x4x4xf32>
    "tpu.trace_start"() <{level = 10 : i32, message = "hoc,hcw->how"}> : () -> ()
    %cst_75 = arith.constant dense<0.000000e+00> : vector<8x4x8xf32>
    %63 = tpu.matmul %62, %58, %cst_75 {dimension_numbers = #tpu.dot_dimension_numbers<[2], [1], [1], [2], [0, 0, 0, 1, 1, 2], [0], [0]>} : vector<8x4x4xf32>, vector<8x4x8xf32>, vector<8x4x8xf32> -> vector<8x4x8xf32>
    "tpu.trace_stop"() : () -> ()
    %64 = arith.addf %56, %63 : vector<8x4x8xf32>
    %c0_76 = arith.constant 0 : index
    %c3_77 = arith.constant 3 : index
    %c1_78 = arith.constant 1 : index
    %c0_79 = arith.constant 0 : index
    %c1_80 = arith.constant 1 : index
    %65 = vector.load %arg1[%c0_76, %c3_77, %c1_78, %c0_79, %c1_80] : memref<1x4x10x4x10xf32, #tpu.memory_space<vmem>>, vector<1x1x8x4x8xf32>
    %66 = vector.shape_cast %65 : vector<1x1x8x4x8xf32> to vector<8x4x8xf32>
    %c2_81 = arith.constant 2 : index
    %c2_82 = arith.constant 2 : index
    %c0_83 = arith.constant 0 : index
    %c0_84 = arith.constant 0 : index
    %67 = vector.load %arg2[%c2_81, %c2_82, %c0_83, %c0_84] : memref<3x3x4x4xf32, #tpu.memory_space<vmem>>, vector<1x1x4x4xf32>
    %68 = vector.shape_cast %67 : vector<1x1x4x4xf32> to vector<4x4xf32>
    %69 = vector.shape_cast %68 : vector<4x4xf32> to vector<1x4x4xf32>
    %70 = vector.broadcast %69 : vector<1x4x4xf32> to vector<8x4x4xf32>
    "tpu.trace_start"() <{level = 10 : i32, message = "hoc,hcw->how"}> : () -> ()
    %cst_85 = arith.constant dense<0.000000e+00> : vector<8x4x8xf32>
    %71 = tpu.matmul %70, %66, %cst_85 {dimension_numbers = #tpu.dot_dimension_numbers<[2], [1], [1], [2], [0, 0, 0, 1, 1, 2], [0], [0]>} : vector<8x4x4xf32>, vector<8x4x8xf32>, vector<8x4x8xf32> -> vector<8x4x8xf32>
    "tpu.trace_stop"() : () -> ()
    %72 = arith.addf %64, %71 : vector<8x4x8xf32>
    %c0_86 = arith.constant 0 : index
    %c0_87 = arith.constant 0 : index
    %c0_88 = arith.constant 0 : index
    %c0_89 = arith.constant 0 : index
    %c0_90 = arith.constant 0 : index
    %73 = vector.load %arg1[%c0_86, %c0_87, %c0_88, %c0_89, %c0_90] : memref<1x4x10x4x10xf32, #tpu.memory_space<vmem>>, vector<1x1x8x4x8xf32>
    %74 = vector.shape_cast %73 : vector<1x1x8x4x8xf32> to vector<8x4x8xf32>
    %c0_91 = arith.constant 0 : index
    %c0_92 = arith.constant 0 : index
    %c0_93 = arith.constant 0 : index
    %c0_94 = arith.constant 0 : index
    %75 = vector.load %arg3[%c0_91, %c0_92, %c0_93, %c0_94] : memref<5x5x4x4xf32, #tpu.memory_space<vmem>>, vector<1x1x4x4xf32>
    %76 = vector.shape_cast %75 : vector<1x1x4x4xf32> to vector<4x4xf32>
    %77 = vector.shape_cast %76 : vector<4x4xf32> to vector<1x4x4xf32>
    %78 = vector.broadcast %77 : vector<1x4x4xf32> to vector<8x4x4xf32>
    "tpu.trace_start"() <{level = 10 : i32, message = "hoc,hcw->how"}> : () -> ()
    %cst_95 = arith.constant dense<0.000000e+00> : vector<8x4x8xf32>
    %79 = tpu.matmul %78, %74, %cst_95 {dimension_numbers = #tpu.dot_dimension_numbers<[2], [1], [1], [2], [0, 0, 0, 1, 1, 2], [0], [0]>} : vector<8x4x4xf32>, vector<8x4x8xf32>, vector<8x4x8xf32> -> vector<8x4x8xf32>
    "tpu.trace_stop"() : () -> ()
    %80 = arith.addf %72, %79 : vector<8x4x8xf32>
    %c0_96 = arith.constant 0 : index
    %c1_97 = arith.constant 1 : index
    %c0_98 = arith.constant 0 : index
    %c0_99 = arith.constant 0 : index
    %c0_100 = arith.constant 0 : index
    %81 = vector.load %arg1[%c0_96, %c1_97, %c0_98, %c0_99, %c0_100] : memref<1x4x10x4x10xf32, #tpu.memory_space<vmem>>, vector<1x1x8x4x8xf32>
    %82 = vector.shape_cast %81 : vector<1x1x8x4x8xf32> to vector<8x4x8xf32>
    %c0_101 = arith.constant 0 : index
    %c1_102 = arith.constant 1 : index
    %c0_103 = arith.constant 0 : index
    %c0_104 = arith.constant 0 : index
    %83 = vector.load %arg3[%c0_101, %c1_102, %c0_103, %c0_104] : memref<5x5x4x4xf32, #tpu.memory_space<vmem>>, vector<1x1x4x4xf32>
    %84 = vector.shape_cast %83 : vector<1x1x4x4xf32> to vector<4x4xf32>
    %85 = vector.shape_cast %84 : vector<4x4xf32> to vector<1x4x4xf32>
    %86 = vector.broadcast %85 : vector<1x4x4xf32> to vector<8x4x4xf32>
    "tpu.trace_start"() <{level = 10 : i32, message = "hoc,hcw->how"}> : () -> ()
    %cst_105 = arith.constant dense<0.000000e+00> : vector<8x4x8xf32>
    %87 = tpu.matmul %86, %82, %cst_105 {dimension_numbers = #tpu.dot_dimension_numbers<[2], [1], [1], [2], [0, 0, 0, 1, 1, 2], [0], [0]>} : vector<8x4x4xf32>, vector<8x4x8xf32>, vector<8x4x8xf32> -> vector<8x4x8xf32>
    "tpu.trace_stop"() : () -> ()
    %88 = arith.addf %80, %87 : vector<8x4x8xf32>
    %c0_106 = arith.constant 0 : index
    %c0_107 = arith.constant 0 : index
    %c0_108 = arith.constant 0 : index
    %c0_109 = arith.constant 0 : index
    %c1_110 = arith.constant 1 : index
    %89 = vector.load %arg1[%c0_106, %c0_107, %c0_108, %c0_109, %c1_110] : memref<1x4x10x4x10xf32, #tpu.memory_space<vmem>>, vector<1x1x8x4x8xf32>
    %90 = vector.shape_cast %89 : vector<1x1x8x4x8xf32> to vector<8x4x8xf32>
    %c0_111 = arith.constant 0 : index
    %c2_112 = arith.constant 2 : index
    %c0_113 = arith.constant 0 : index
    %c0_114 = arith.constant 0 : index
    %91 = vector.load %arg3[%c0_111, %c2_112, %c0_113, %c0_114] : memref<5x5x4x4xf32, #tpu.memory_space<vmem>>, vector<1x1x4x4xf32>
    %92 = vector.shape_cast %91 : vector<1x1x4x4xf32> to vector<4x4xf32>
    %93 = vector.shape_cast %92 : vector<4x4xf32> to vector<1x4x4xf32>
    %94 = vector.broadcast %93 : vector<1x4x4xf32> to vector<8x4x4xf32>
    "tpu.trace_start"() <{level = 10 : i32, message = "hoc,hcw->how"}> : () -> ()
    %cst_115 = arith.constant dense<0.000000e+00> : vector<8x4x8xf32>
    %95 = tpu.matmul %94, %90, %cst_115 {dimension_numbers = #tpu.dot_dimension_numbers<[2], [1], [1], [2], [0, 0, 0, 1, 1, 2], [0], [0]>} : vector<8x4x4xf32>, vector<8x4x8xf32>, vector<8x4x8xf32> -> vector<8x4x8xf32>
    "tpu.trace_stop"() : () -> ()
    %96 = arith.addf %88, %95 : vector<8x4x8xf32>
    %c0_116 = arith.constant 0 : index
    %c1_117 = arith.constant 1 : index
    %c0_118 = arith.constant 0 : index
    %c0_119 = arith.constant 0 : index
    %c1_120 = arith.constant 1 : index
    %97 = vector.load %arg1[%c0_116, %c1_117, %c0_118, %c0_119, %c1_120] : memref<1x4x10x4x10xf32, #tpu.memory_space<vmem>>, vector<1x1x8x4x8xf32>
    %98 = vector.shape_cast %97 : vector<1x1x8x4x8xf32> to vector<8x4x8xf32>
    %c0_121 = arith.constant 0 : index
    %c3_122 = arith.constant 3 : index
    %c0_123 = arith.constant 0 : index
    %c0_124 = arith.constant 0 : index
    %99 = vector.load %arg3[%c0_121, %c3_122, %c0_123, %c0_124] : memref<5x5x4x4xf32, #tpu.memory_space<vmem>>, vector<1x1x4x4xf32>
    %100 = vector.shape_cast %99 : vector<1x1x4x4xf32> to vector<4x4xf32>
    %101 = vector.shape_cast %100 : vector<4x4xf32> to vector<1x4x4xf32>
    %102 = vector.broadcast %101 : vector<1x4x4xf32> to vector<8x4x4xf32>
    "tpu.trace_start"() <{level = 10 : i32, message = "hoc,hcw->how"}> : () -> ()
    %cst_125 = arith.constant dense<0.000000e+00> : vector<8x4x8xf32>
    %103 = tpu.matmul %102, %98, %cst_125 {dimension_numbers = #tpu.dot_dimension_numbers<[2], [1], [1], [2], [0, 0, 0, 1, 1, 2], [0], [0]>} : vector<8x4x4xf32>, vector<8x4x8xf32>, vector<8x4x8xf32> -> vector<8x4x8xf32>
    "tpu.trace_stop"() : () -> ()
    %104 = arith.addf %96, %103 : vector<8x4x8xf32>
    %c0_126 = arith.constant 0 : index
    %c0_127 = arith.constant 0 : index
    %c0_128 = arith.constant 0 : index
    %c0_129 = arith.constant 0 : index
    %c2_130 = arith.constant 2 : index
    %105 = vector.load %arg1[%c0_126, %c0_127, %c0_128, %c0_129, %c2_130] : memref<1x4x10x4x10xf32, #tpu.memory_space<vmem>>, vector<1x1x8x4x8xf32>
    %106 = vector.shape_cast %105 : vector<1x1x8x4x8xf32> to vector<8x4x8xf32>
    %c0_131 = arith.constant 0 : index
    %c4 = arith.constant 4 : index
    %c0_132 = arith.constant 0 : index
    %c0_133 = arith.constant 0 : index
    %107 = vector.load %arg3[%c0_131, %c4, %c0_132, %c0_133] : memref<5x5x4x4xf32, #tpu.memory_space<vmem>>, vector<1x1x4x4xf32>
    %108 = vector.shape_cast %107 : vector<1x1x4x4xf32> to vector<4x4xf32>
    %109 = vector.shape_cast %108 : vector<4x4xf32> to vector<1x4x4xf32>
    %110 = vector.broadcast %109 : vector<1x4x4xf32> to vector<8x4x4xf32>
    "tpu.trace_start"() <{level = 10 : i32, message = "hoc,hcw->how"}> : () -> ()
    %cst_134 = arith.constant dense<0.000000e+00> : vector<8x4x8xf32>
    %111 = tpu.matmul %110, %106, %cst_134 {dimension_numbers = #tpu.dot_dimension_numbers<[2], [1], [1], [2], [0, 0, 0, 1, 1, 2], [0], [0]>} : vector<8x4x4xf32>, vector<8x4x8xf32>, vector<8x4x8xf32> -> vector<8x4x8xf32>
    "tpu.trace_stop"() : () -> ()
    %112 = arith.addf %104, %111 : vector<8x4x8xf32>
    %c0_135 = arith.constant 0 : index
    %c2_136 = arith.constant 2 : index
    %c0_137 = arith.constant 0 : index
    %c0_138 = arith.constant 0 : index
    %c0_139 = arith.constant 0 : index
    %113 = vector.load %arg1[%c0_135, %c2_136, %c0_137, %c0_138, %c0_139] : memref<1x4x10x4x10xf32, #tpu.memory_space<vmem>>, vector<1x1x8x4x8xf32>
    %114 = vector.shape_cast %113 : vector<1x1x8x4x8xf32> to vector<8x4x8xf32>
    %c1_140 = arith.constant 1 : index
    %c0_141 = arith.constant 0 : index
    %c0_142 = arith.constant 0 : index
    %c0_143 = arith.constant 0 : index
    %115 = vector.load %arg3[%c1_140, %c0_141, %c0_142, %c0_143] : memref<5x5x4x4xf32, #tpu.memory_space<vmem>>, vector<1x1x4x4xf32>
    %116 = vector.shape_cast %115 : vector<1x1x4x4xf32> to vector<4x4xf32>
    %117 = vector.shape_cast %116 : vector<4x4xf32> to vector<1x4x4xf32>
    %118 = vector.broadcast %117 : vector<1x4x4xf32> to vector<8x4x4xf32>
    "tpu.trace_start"() <{level = 10 : i32, message = "hoc,hcw->how"}> : () -> ()
    %cst_144 = arith.constant dense<0.000000e+00> : vector<8x4x8xf32>
    %119 = tpu.matmul %118, %114, %cst_144 {dimension_numbers = #tpu.dot_dimension_numbers<[2], [1], [1], [2], [0, 0, 0, 1, 1, 2], [0], [0]>} : vector<8x4x4xf32>, vector<8x4x8xf32>, vector<8x4x8xf32> -> vector<8x4x8xf32>
    "tpu.trace_stop"() : () -> ()
    %120 = arith.addf %112, %119 : vector<8x4x8xf32>
    %c0_145 = arith.constant 0 : index
    %c3_146 = arith.constant 3 : index
    %c0_147 = arith.constant 0 : index
    %c0_148 = arith.constant 0 : index
    %c0_149 = arith.constant 0 : index
    %121 = vector.load %arg1[%c0_145, %c3_146, %c0_147, %c0_148, %c0_149] : memref<1x4x10x4x10xf32, #tpu.memory_space<vmem>>, vector<1x1x8x4x8xf32>
    %122 = vector.shape_cast %121 : vector<1x1x8x4x8xf32> to vector<8x4x8xf32>
    %c1_150 = arith.constant 1 : index
    %c1_151 = arith.constant 1 : index
    %c0_152 = arith.constant 0 : index
    %c0_153 = arith.constant 0 : index
    %123 = vector.load %arg3[%c1_150, %c1_151, %c0_152, %c0_153] : memref<5x5x4x4xf32, #tpu.memory_space<vmem>>, vector<1x1x4x4xf32>
    %124 = vector.shape_cast %123 : vector<1x1x4x4xf32> to vector<4x4xf32>
    %125 = vector.shape_cast %124 : vector<4x4xf32> to vector<1x4x4xf32>
    %126 = vector.broadcast %125 : vector<1x4x4xf32> to vector<8x4x4xf32>
    "tpu.trace_start"() <{level = 10 : i32, message = "hoc,hcw->how"}> : () -> ()
    %cst_154 = arith.constant dense<0.000000e+00> : vector<8x4x8xf32>
    %127 = tpu.matmul %126, %122, %cst_154 {dimension_numbers = #tpu.dot_dimension_numbers<[2], [1], [1], [2], [0, 0, 0, 1, 1, 2], [0], [0]>} : vector<8x4x4xf32>, vector<8x4x8xf32>, vector<8x4x8xf32> -> vector<8x4x8xf32>
    "tpu.trace_stop"() : () -> ()
    %128 = arith.addf %120, %127 : vector<8x4x8xf32>
    %c0_155 = arith.constant 0 : index
    %c2_156 = arith.constant 2 : index
    %c0_157 = arith.constant 0 : index
    %c0_158 = arith.constant 0 : index
    %c1_159 = arith.constant 1 : index
    %129 = vector.load %arg1[%c0_155, %c2_156, %c0_157, %c0_158, %c1_159] : memref<1x4x10x4x10xf32, #tpu.memory_space<vmem>>, vector<1x1x8x4x8xf32>
    %130 = vector.shape_cast %129 : vector<1x1x8x4x8xf32> to vector<8x4x8xf32>
    %c1_160 = arith.constant 1 : index
    %c2_161 = arith.constant 2 : index
    %c0_162 = arith.constant 0 : index
    %c0_163 = arith.constant 0 : index
    %131 = vector.load %arg3[%c1_160, %c2_161, %c0_162, %c0_163] : memref<5x5x4x4xf32, #tpu.memory_space<vmem>>, vector<1x1x4x4xf32>
    %132 = vector.shape_cast %131 : vector<1x1x4x4xf32> to vector<4x4xf32>
    %133 = vector.shape_cast %132 : vector<4x4xf32> to vector<1x4x4xf32>
    %134 = vector.broadcast %133 : vector<1x4x4xf32> to vector<8x4x4xf32>
    "tpu.trace_start"() <{level = 10 : i32, message = "hoc,hcw->how"}> : () -> ()
    %cst_164 = arith.constant dense<0.000000e+00> : vector<8x4x8xf32>
    %135 = tpu.matmul %134, %130, %cst_164 {dimension_numbers = #tpu.dot_dimension_numbers<[2], [1], [1], [2], [0, 0, 0, 1, 1, 2], [0], [0]>} : vector<8x4x4xf32>, vector<8x4x8xf32>, vector<8x4x8xf32> -> vector<8x4x8xf32>
    "tpu.trace_stop"() : () -> ()
    %136 = arith.addf %128, %135 : vector<8x4x8xf32>
    %c0_165 = arith.constant 0 : index
    %c3_166 = arith.constant 3 : index
    %c0_167 = arith.constant 0 : index
    %c0_168 = arith.constant 0 : index
    %c1_169 = arith.constant 1 : index
    %137 = vector.load %arg1[%c0_165, %c3_166, %c0_167, %c0_168, %c1_169] : memref<1x4x10x4x10xf32, #tpu.memory_space<vmem>>, vector<1x1x8x4x8xf32>
    %138 = vector.shape_cast %137 : vector<1x1x8x4x8xf32> to vector<8x4x8xf32>
    %c1_170 = arith.constant 1 : index
    %c3_171 = arith.constant 3 : index
    %c0_172 = arith.constant 0 : index
    %c0_173 = arith.constant 0 : index
    %139 = vector.load %arg3[%c1_170, %c3_171, %c0_172, %c0_173] : memref<5x5x4x4xf32, #tpu.memory_space<vmem>>, vector<1x1x4x4xf32>
    %140 = vector.shape_cast %139 : vector<1x1x4x4xf32> to vector<4x4xf32>
    %141 = vector.shape_cast %140 : vector<4x4xf32> to vector<1x4x4xf32>
    %142 = vector.broadcast %141 : vector<1x4x4xf32> to vector<8x4x4xf32>
    "tpu.trace_start"() <{level = 10 : i32, message = "hoc,hcw->how"}> : () -> ()
    %cst_174 = arith.constant dense<0.000000e+00> : vector<8x4x8xf32>
    %143 = tpu.matmul %142, %138, %cst_174 {dimension_numbers = #tpu.dot_dimension_numbers<[2], [1], [1], [2], [0, 0, 0, 1, 1, 2], [0], [0]>} : vector<8x4x4xf32>, vector<8x4x8xf32>, vector<8x4x8xf32> -> vector<8x4x8xf32>
    "tpu.trace_stop"() : () -> ()
    %144 = arith.addf %136, %143 : vector<8x4x8xf32>
    %c0_175 = arith.constant 0 : index
    %c2_176 = arith.constant 2 : index
    %c0_177 = arith.constant 0 : index
    %c0_178 = arith.constant 0 : index
    %c2_179 = arith.constant 2 : index
    %145 = vector.load %arg1[%c0_175, %c2_176, %c0_177, %c0_178, %c2_179] : memref<1x4x10x4x10xf32, #tpu.memory_space<vmem>>, vector<1x1x8x4x8xf32>
    %146 = vector.shape_cast %145 : vector<1x1x8x4x8xf32> to vector<8x4x8xf32>
    %c1_180 = arith.constant 1 : index
    %c4_181 = arith.constant 4 : index
    %c0_182 = arith.constant 0 : index
    %c0_183 = arith.constant 0 : index
    %147 = vector.load %arg3[%c1_180, %c4_181, %c0_182, %c0_183] : memref<5x5x4x4xf32, #tpu.memory_space<vmem>>, vector<1x1x4x4xf32>
    %148 = vector.shape_cast %147 : vector<1x1x4x4xf32> to vector<4x4xf32>
    %149 = vector.shape_cast %148 : vector<4x4xf32> to vector<1x4x4xf32>
    %150 = vector.broadcast %149 : vector<1x4x4xf32> to vector<8x4x4xf32>
    "tpu.trace_start"() <{level = 10 : i32, message = "hoc,hcw->how"}> : () -> ()
    %cst_184 = arith.constant dense<0.000000e+00> : vector<8x4x8xf32>
    %151 = tpu.matmul %150, %146, %cst_184 {dimension_numbers = #tpu.dot_dimension_numbers<[2], [1], [1], [2], [0, 0, 0, 1, 1, 2], [0], [0]>} : vector<8x4x4xf32>, vector<8x4x8xf32>, vector<8x4x8xf32> -> vector<8x4x8xf32>
    "tpu.trace_stop"() : () -> ()
    %152 = arith.addf %144, %151 : vector<8x4x8xf32>
    %c0_185 = arith.constant 0 : index
    %c0_186 = arith.constant 0 : index
    %c1_187 = arith.constant 1 : index
    %c0_188 = arith.constant 0 : index
    %c0_189 = arith.constant 0 : index
    %153 = vector.load %arg1[%c0_185, %c0_186, %c1_187, %c0_188, %c0_189] : memref<1x4x10x4x10xf32, #tpu.memory_space<vmem>>, vector<1x1x8x4x8xf32>
    %154 = vector.shape_cast %153 : vector<1x1x8x4x8xf32> to vector<8x4x8xf32>
    %c2_190 = arith.constant 2 : index
    %c0_191 = arith.constant 0 : index
    %c0_192 = arith.constant 0 : index
    %c0_193 = arith.constant 0 : index
    %155 = vector.load %arg3[%c2_190, %c0_191, %c0_192, %c0_193] : memref<5x5x4x4xf32, #tpu.memory_space<vmem>>, vector<1x1x4x4xf32>
    %156 = vector.shape_cast %155 : vector<1x1x4x4xf32> to vector<4x4xf32>
    %157 = vector.shape_cast %156 : vector<4x4xf32> to vector<1x4x4xf32>
    %158 = vector.broadcast %157 : vector<1x4x4xf32> to vector<8x4x4xf32>
    "tpu.trace_start"() <{level = 10 : i32, message = "hoc,hcw->how"}> : () -> ()
    %cst_194 = arith.constant dense<0.000000e+00> : vector<8x4x8xf32>
    %159 = tpu.matmul %158, %154, %cst_194 {dimension_numbers = #tpu.dot_dimension_numbers<[2], [1], [1], [2], [0, 0, 0, 1, 1, 2], [0], [0]>} : vector<8x4x4xf32>, vector<8x4x8xf32>, vector<8x4x8xf32> -> vector<8x4x8xf32>
    "tpu.trace_stop"() : () -> ()
    %160 = arith.addf %152, %159 : vector<8x4x8xf32>
    %c0_195 = arith.constant 0 : index
    %c1_196 = arith.constant 1 : index
    %c1_197 = arith.constant 1 : index
    %c0_198 = arith.constant 0 : index
    %c0_199 = arith.constant 0 : index
    %161 = vector.load %arg1[%c0_195, %c1_196, %c1_197, %c0_198, %c0_199] : memref<1x4x10x4x10xf32, #tpu.memory_space<vmem>>, vector<1x1x8x4x8xf32>
    %162 = vector.shape_cast %161 : vector<1x1x8x4x8xf32> to vector<8x4x8xf32>
    %c2_200 = arith.constant 2 : index
    %c1_201 = arith.constant 1 : index
    %c0_202 = arith.constant 0 : index
    %c0_203 = arith.constant 0 : index
    %163 = vector.load %arg3[%c2_200, %c1_201, %c0_202, %c0_203] : memref<5x5x4x4xf32, #tpu.memory_space<vmem>>, vector<1x1x4x4xf32>
    %164 = vector.shape_cast %163 : vector<1x1x4x4xf32> to vector<4x4xf32>
    %165 = vector.shape_cast %164 : vector<4x4xf32> to vector<1x4x4xf32>
    %166 = vector.broadcast %165 : vector<1x4x4xf32> to vector<8x4x4xf32>
    "tpu.trace_start"() <{level = 10 : i32, message = "hoc,hcw->how"}> : () -> ()
    %cst_204 = arith.constant dense<0.000000e+00> : vector<8x4x8xf32>
    %167 = tpu.matmul %166, %162, %cst_204 {dimension_numbers = #tpu.dot_dimension_numbers<[2], [1], [1], [2], [0, 0, 0, 1, 1, 2], [0], [0]>} : vector<8x4x4xf32>, vector<8x4x8xf32>, vector<8x4x8xf32> -> vector<8x4x8xf32>
    "tpu.trace_stop"() : () -> ()
    %168 = arith.addf %160, %167 : vector<8x4x8xf32>
    %c0_205 = arith.constant 0 : index
    %c0_206 = arith.constant 0 : index
    %c1_207 = arith.constant 1 : index
    %c0_208 = arith.constant 0 : index
    %c1_209 = arith.constant 1 : index
    %169 = vector.load %arg1[%c0_205, %c0_206, %c1_207, %c0_208, %c1_209] : memref<1x4x10x4x10xf32, #tpu.memory_space<vmem>>, vector<1x1x8x4x8xf32>
    %170 = vector.shape_cast %169 : vector<1x1x8x4x8xf32> to vector<8x4x8xf32>
    %c2_210 = arith.constant 2 : index
    %c2_211 = arith.constant 2 : index
    %c0_212 = arith.constant 0 : index
    %c0_213 = arith.constant 0 : index
    %171 = vector.load %arg3[%c2_210, %c2_211, %c0_212, %c0_213] : memref<5x5x4x4xf32, #tpu.memory_space<vmem>>, vector<1x1x4x4xf32>
    %172 = vector.shape_cast %171 : vector<1x1x4x4xf32> to vector<4x4xf32>
    %173 = vector.shape_cast %172 : vector<4x4xf32> to vector<1x4x4xf32>
    %174 = vector.broadcast %173 : vector<1x4x4xf32> to vector<8x4x4xf32>
    "tpu.trace_start"() <{level = 10 : i32, message = "hoc,hcw->how"}> : () -> ()
    %cst_214 = arith.constant dense<0.000000e+00> : vector<8x4x8xf32>
    %175 = tpu.matmul %174, %170, %cst_214 {dimension_numbers = #tpu.dot_dimension_numbers<[2], [1], [1], [2], [0, 0, 0, 1, 1, 2], [0], [0]>} : vector<8x4x4xf32>, vector<8x4x8xf32>, vector<8x4x8xf32> -> vector<8x4x8xf32>
    "tpu.trace_stop"() : () -> ()
    %176 = arith.addf %168, %175 : vector<8x4x8xf32>
    %c0_215 = arith.constant 0 : index
    %c1_216 = arith.constant 1 : index
    %c1_217 = arith.constant 1 : index
    %c0_218 = arith.constant 0 : index
    %c1_219 = arith.constant 1 : index
    %177 = vector.load %arg1[%c0_215, %c1_216, %c1_217, %c0_218, %c1_219] : memref<1x4x10x4x10xf32, #tpu.memory_space<vmem>>, vector<1x1x8x4x8xf32>
    %178 = vector.shape_cast %177 : vector<1x1x8x4x8xf32> to vector<8x4x8xf32>
    %c2_220 = arith.constant 2 : index
    %c3_221 = arith.constant 3 : index
    %c0_222 = arith.constant 0 : index
    %c0_223 = arith.constant 0 : index
    %179 = vector.load %arg3[%c2_220, %c3_221, %c0_222, %c0_223] : memref<5x5x4x4xf32, #tpu.memory_space<vmem>>, vector<1x1x4x4xf32>
    %180 = vector.shape_cast %179 : vector<1x1x4x4xf32> to vector<4x4xf32>
    %181 = vector.shape_cast %180 : vector<4x4xf32> to vector<1x4x4xf32>
    %182 = vector.broadcast %181 : vector<1x4x4xf32> to vector<8x4x4xf32>
    "tpu.trace_start"() <{level = 10 : i32, message = "hoc,hcw->how"}> : () -> ()
    %cst_224 = arith.constant dense<0.000000e+00> : vector<8x4x8xf32>
    %183 = tpu.matmul %182, %178, %cst_224 {dimension_numbers = #tpu.dot_dimension_numbers<[2], [1], [1], [2], [0, 0, 0, 1, 1, 2], [0], [0]>} : vector<8x4x4xf32>, vector<8x4x8xf32>, vector<8x4x8xf32> -> vector<8x4x8xf32>
    "tpu.trace_stop"() : () -> ()
    %184 = arith.addf %176, %183 : vector<8x4x8xf32>
    %c0_225 = arith.constant 0 : index
    %c0_226 = arith.constant 0 : index
    %c1_227 = arith.constant 1 : index
    %c0_228 = arith.constant 0 : index
    %c2_229 = arith.constant 2 : index
    %185 = vector.load %arg1[%c0_225, %c0_226, %c1_227, %c0_228, %c2_229] : memref<1x4x10x4x10xf32, #tpu.memory_space<vmem>>, vector<1x1x8x4x8xf32>
    %186 = vector.shape_cast %185 : vector<1x1x8x4x8xf32> to vector<8x4x8xf32>
    %c2_230 = arith.constant 2 : index
    %c4_231 = arith.constant 4 : index
    %c0_232 = arith.constant 0 : index
    %c0_233 = arith.constant 0 : index
    %187 = vector.load %arg3[%c2_230, %c4_231, %c0_232, %c0_233] : memref<5x5x4x4xf32, #tpu.memory_space<vmem>>, vector<1x1x4x4xf32>
    %188 = vector.shape_cast %187 : vector<1x1x4x4xf32> to vector<4x4xf32>
    %189 = vector.shape_cast %188 : vector<4x4xf32> to vector<1x4x4xf32>
    %190 = vector.broadcast %189 : vector<1x4x4xf32> to vector<8x4x4xf32>
    "tpu.trace_start"() <{level = 10 : i32, message = "hoc,hcw->how"}> : () -> ()
    %cst_234 = arith.constant dense<0.000000e+00> : vector<8x4x8xf32>
    %191 = tpu.matmul %190, %186, %cst_234 {dimension_numbers = #tpu.dot_dimension_numbers<[2], [1], [1], [2], [0, 0, 0, 1, 1, 2], [0], [0]>} : vector<8x4x4xf32>, vector<8x4x8xf32>, vector<8x4x8xf32> -> vector<8x4x8xf32>
    "tpu.trace_stop"() : () -> ()
    %192 = arith.addf %184, %191 : vector<8x4x8xf32>
    %c0_235 = arith.constant 0 : index
    %c2_236 = arith.constant 2 : index
    %c1_237 = arith.constant 1 : index
    %c0_238 = arith.constant 0 : index
    %c0_239 = arith.constant 0 : index
    %193 = vector.load %arg1[%c0_235, %c2_236, %c1_237, %c0_238, %c0_239] : memref<1x4x10x4x10xf32, #tpu.memory_space<vmem>>, vector<1x1x8x4x8xf32>
    %194 = vector.shape_cast %193 : vector<1x1x8x4x8xf32> to vector<8x4x8xf32>
    %c3_240 = arith.constant 3 : index
    %c0_241 = arith.constant 0 : index
    %c0_242 = arith.constant 0 : index
    %c0_243 = arith.constant 0 : index
    %195 = vector.load %arg3[%c3_240, %c0_241, %c0_242, %c0_243] : memref<5x5x4x4xf32, #tpu.memory_space<vmem>>, vector<1x1x4x4xf32>
    %196 = vector.shape_cast %195 : vector<1x1x4x4xf32> to vector<4x4xf32>
    %197 = vector.shape_cast %196 : vector<4x4xf32> to vector<1x4x4xf32>
    %198 = vector.broadcast %197 : vector<1x4x4xf32> to vector<8x4x4xf32>
    "tpu.trace_start"() <{level = 10 : i32, message = "hoc,hcw->how"}> : () -> ()
    %cst_244 = arith.constant dense<0.000000e+00> : vector<8x4x8xf32>
    %199 = tpu.matmul %198, %194, %cst_244 {dimension_numbers = #tpu.dot_dimension_numbers<[2], [1], [1], [2], [0, 0, 0, 1, 1, 2], [0], [0]>} : vector<8x4x4xf32>, vector<8x4x8xf32>, vector<8x4x8xf32> -> vector<8x4x8xf32>
    "tpu.trace_stop"() : () -> ()
    %200 = arith.addf %192, %199 : vector<8x4x8xf32>
    %c0_245 = arith.constant 0 : index
    %c3_246 = arith.constant 3 : index
    %c1_247 = arith.constant 1 : index
    %c0_248 = arith.constant 0 : index
    %c0_249 = arith.constant 0 : index
    %201 = vector.load %arg1[%c0_245, %c3_246, %c1_247, %c0_248, %c0_249] : memref<1x4x10x4x10xf32, #tpu.memory_space<vmem>>, vector<1x1x8x4x8xf32>
    %202 = vector.shape_cast %201 : vector<1x1x8x4x8xf32> to vector<8x4x8xf32>
    %c3_250 = arith.constant 3 : index
    %c1_251 = arith.constant 1 : index
    %c0_252 = arith.constant 0 : index
    %c0_253 = arith.constant 0 : index
    %203 = vector.load %arg3[%c3_250, %c1_251, %c0_252, %c0_253] : memref<5x5x4x4xf32, #tpu.memory_space<vmem>>, vector<1x1x4x4xf32>
    %204 = vector.shape_cast %203 : vector<1x1x4x4xf32> to vector<4x4xf32>
    %205 = vector.shape_cast %204 : vector<4x4xf32> to vector<1x4x4xf32>
    %206 = vector.broadcast %205 : vector<1x4x4xf32> to vector<8x4x4xf32>
    "tpu.trace_start"() <{level = 10 : i32, message = "hoc,hcw->how"}> : () -> ()
    %cst_254 = arith.constant dense<0.000000e+00> : vector<8x4x8xf32>
    %207 = tpu.matmul %206, %202, %cst_254 {dimension_numbers = #tpu.dot_dimension_numbers<[2], [1], [1], [2], [0, 0, 0, 1, 1, 2], [0], [0]>} : vector<8x4x4xf32>, vector<8x4x8xf32>, vector<8x4x8xf32> -> vector<8x4x8xf32>
    "tpu.trace_stop"() : () -> ()
    %208 = arith.addf %200, %207 : vector<8x4x8xf32>
    %c0_255 = arith.constant 0 : index
    %c2_256 = arith.constant 2 : index
    %c1_257 = arith.constant 1 : index
    %c0_258 = arith.constant 0 : index
    %c1_259 = arith.constant 1 : index
    %209 = vector.load %arg1[%c0_255, %c2_256, %c1_257, %c0_258, %c1_259] : memref<1x4x10x4x10xf32, #tpu.memory_space<vmem>>, vector<1x1x8x4x8xf32>
    %210 = vector.shape_cast %209 : vector<1x1x8x4x8xf32> to vector<8x4x8xf32>
    %c3_260 = arith.constant 3 : index
    %c2_261 = arith.constant 2 : index
    %c0_262 = arith.constant 0 : index
    %c0_263 = arith.constant 0 : index
    %211 = vector.load %arg3[%c3_260, %c2_261, %c0_262, %c0_263] : memref<5x5x4x4xf32, #tpu.memory_space<vmem>>, vector<1x1x4x4xf32>
    %212 = vector.shape_cast %211 : vector<1x1x4x4xf32> to vector<4x4xf32>
    %213 = vector.shape_cast %212 : vector<4x4xf32> to vector<1x4x4xf32>
    %214 = vector.broadcast %213 : vector<1x4x4xf32> to vector<8x4x4xf32>
    "tpu.trace_start"() <{level = 10 : i32, message = "hoc,hcw->how"}> : () -> ()
    %cst_264 = arith.constant dense<0.000000e+00> : vector<8x4x8xf32>
    %215 = tpu.matmul %214, %210, %cst_264 {dimension_numbers = #tpu.dot_dimension_numbers<[2], [1], [1], [2], [0, 0, 0, 1, 1, 2], [0], [0]>} : vector<8x4x4xf32>, vector<8x4x8xf32>, vector<8x4x8xf32> -> vector<8x4x8xf32>
    "tpu.trace_stop"() : () -> ()
    %216 = arith.addf %208, %215 : vector<8x4x8xf32>
    %c0_265 = arith.constant 0 : index
    %c3_266 = arith.constant 3 : index
    %c1_267 = arith.constant 1 : index
    %c0_268 = arith.constant 0 : index
    %c1_269 = arith.constant 1 : index
    %217 = vector.load %arg1[%c0_265, %c3_266, %c1_267, %c0_268, %c1_269] : memref<1x4x10x4x10xf32, #tpu.memory_space<vmem>>, vector<1x1x8x4x8xf32>
    %218 = vector.shape_cast %217 : vector<1x1x8x4x8xf32> to vector<8x4x8xf32>
    %c3_270 = arith.constant 3 : index
    %c3_271 = arith.constant 3 : index
    %c0_272 = arith.constant 0 : index
    %c0_273 = arith.constant 0 : index
    %219 = vector.load %arg3[%c3_270, %c3_271, %c0_272, %c0_273] : memref<5x5x4x4xf32, #tpu.memory_space<vmem>>, vector<1x1x4x4xf32>
    %220 = vector.shape_cast %219 : vector<1x1x4x4xf32> to vector<4x4xf32>
    %221 = vector.shape_cast %220 : vector<4x4xf32> to vector<1x4x4xf32>
    %222 = vector.broadcast %221 : vector<1x4x4xf32> to vector<8x4x4xf32>
    "tpu.trace_start"() <{level = 10 : i32, message = "hoc,hcw->how"}> : () -> ()
    %cst_274 = arith.constant dense<0.000000e+00> : vector<8x4x8xf32>
    %223 = tpu.matmul %222, %218, %cst_274 {dimension_numbers = #tpu.dot_dimension_numbers<[2], [1], [1], [2], [0, 0, 0, 1, 1, 2], [0], [0]>} : vector<8x4x4xf32>, vector<8x4x8xf32>, vector<8x4x8xf32> -> vector<8x4x8xf32>
    "tpu.trace_stop"() : () -> ()
    %224 = arith.addf %216, %223 : vector<8x4x8xf32>
    %c0_275 = arith.constant 0 : index
    %c2_276 = arith.constant 2 : index
    %c1_277 = arith.constant 1 : index
    %c0_278 = arith.constant 0 : index
    %c2_279 = arith.constant 2 : index
    %225 = vector.load %arg1[%c0_275, %c2_276, %c1_277, %c0_278, %c2_279] : memref<1x4x10x4x10xf32, #tpu.memory_space<vmem>>, vector<1x1x8x4x8xf32>
    %226 = vector.shape_cast %225 : vector<1x1x8x4x8xf32> to vector<8x4x8xf32>
    %c3_280 = arith.constant 3 : index
    %c4_281 = arith.constant 4 : index
    %c0_282 = arith.constant 0 : index
    %c0_283 = arith.constant 0 : index
    %227 = vector.load %arg3[%c3_280, %c4_281, %c0_282, %c0_283] : memref<5x5x4x4xf32, #tpu.memory_space<vmem>>, vector<1x1x4x4xf32>
    %228 = vector.shape_cast %227 : vector<1x1x4x4xf32> to vector<4x4xf32>
    %229 = vector.shape_cast %228 : vector<4x4xf32> to vector<1x4x4xf32>
    %230 = vector.broadcast %229 : vector<1x4x4xf32> to vector<8x4x4xf32>
    "tpu.trace_start"() <{level = 10 : i32, message = "hoc,hcw->how"}> : () -> ()
    %cst_284 = arith.constant dense<0.000000e+00> : vector<8x4x8xf32>
    %231 = tpu.matmul %230, %226, %cst_284 {dimension_numbers = #tpu.dot_dimension_numbers<[2], [1], [1], [2], [0, 0, 0, 1, 1, 2], [0], [0]>} : vector<8x4x4xf32>, vector<8x4x8xf32>, vector<8x4x8xf32> -> vector<8x4x8xf32>
    "tpu.trace_stop"() : () -> ()
    %232 = arith.addf %224, %231 : vector<8x4x8xf32>
    %c0_285 = arith.constant 0 : index
    %c0_286 = arith.constant 0 : index
    %c2_287 = arith.constant 2 : index
    %c0_288 = arith.constant 0 : index
    %c0_289 = arith.constant 0 : index
    %233 = vector.load %arg1[%c0_285, %c0_286, %c2_287, %c0_288, %c0_289] : memref<1x4x10x4x10xf32, #tpu.memory_space<vmem>>, vector<1x1x8x4x8xf32>
    %234 = vector.shape_cast %233 : vector<1x1x8x4x8xf32> to vector<8x4x8xf32>
    %c4_290 = arith.constant 4 : index
    %c0_291 = arith.constant 0 : index
    %c0_292 = arith.constant 0 : index
    %c0_293 = arith.constant 0 : index
    %235 = vector.load %arg3[%c4_290, %c0_291, %c0_292, %c0_293] : memref<5x5x4x4xf32, #tpu.memory_space<vmem>>, vector<1x1x4x4xf32>
    %236 = vector.shape_cast %235 : vector<1x1x4x4xf32> to vector<4x4xf32>
    %237 = vector.shape_cast %236 : vector<4x4xf32> to vector<1x4x4xf32>
    %238 = vector.broadcast %237 : vector<1x4x4xf32> to vector<8x4x4xf32>
    "tpu.trace_start"() <{level = 10 : i32, message = "hoc,hcw->how"}> : () -> ()
    %cst_294 = arith.constant dense<0.000000e+00> : vector<8x4x8xf32>
    %239 = tpu.matmul %238, %234, %cst_294 {dimension_numbers = #tpu.dot_dimension_numbers<[2], [1], [1], [2], [0, 0, 0, 1, 1, 2], [0], [0]>} : vector<8x4x4xf32>, vector<8x4x8xf32>, vector<8x4x8xf32> -> vector<8x4x8xf32>
    "tpu.trace_stop"() : () -> ()
    %240 = arith.addf %232, %239 : vector<8x4x8xf32>
    %c0_295 = arith.constant 0 : index
    %c1_296 = arith.constant 1 : index
    %c2_297 = arith.constant 2 : index
    %c0_298 = arith.constant 0 : index
    %c0_299 = arith.constant 0 : index
    %241 = vector.load %arg1[%c0_295, %c1_296, %c2_297, %c0_298, %c0_299] : memref<1x4x10x4x10xf32, #tpu.memory_space<vmem>>, vector<1x1x8x4x8xf32>
    %242 = vector.shape_cast %241 : vector<1x1x8x4x8xf32> to vector<8x4x8xf32>
    %c4_300 = arith.constant 4 : index
    %c1_301 = arith.constant 1 : index
    %c0_302 = arith.constant 0 : index
    %c0_303 = arith.constant 0 : index
    %243 = vector.load %arg3[%c4_300, %c1_301, %c0_302, %c0_303] : memref<5x5x4x4xf32, #tpu.memory_space<vmem>>, vector<1x1x4x4xf32>
    %244 = vector.shape_cast %243 : vector<1x1x4x4xf32> to vector<4x4xf32>
    %245 = vector.shape_cast %244 : vector<4x4xf32> to vector<1x4x4xf32>
    %246 = vector.broadcast %245 : vector<1x4x4xf32> to vector<8x4x4xf32>
    "tpu.trace_start"() <{level = 10 : i32, message = "hoc,hcw->how"}> : () -> ()
    %cst_304 = arith.constant dense<0.000000e+00> : vector<8x4x8xf32>
    %247 = tpu.matmul %246, %242, %cst_304 {dimension_numbers = #tpu.dot_dimension_numbers<[2], [1], [1], [2], [0, 0, 0, 1, 1, 2], [0], [0]>} : vector<8x4x4xf32>, vector<8x4x8xf32>, vector<8x4x8xf32> -> vector<8x4x8xf32>
    "tpu.trace_stop"() : () -> ()
    %248 = arith.addf %240, %247 : vector<8x4x8xf32>
    %c0_305 = arith.constant 0 : index
    %c0_306 = arith.constant 0 : index
    %c2_307 = arith.constant 2 : index
    %c0_308 = arith.constant 0 : index
    %c1_309 = arith.constant 1 : index
    %249 = vector.load %arg1[%c0_305, %c0_306, %c2_307, %c0_308, %c1_309] : memref<1x4x10x4x10xf32, #tpu.memory_space<vmem>>, vector<1x1x8x4x8xf32>
    %250 = vector.shape_cast %249 : vector<1x1x8x4x8xf32> to vector<8x4x8xf32>
    %c4_310 = arith.constant 4 : index
    %c2_311 = arith.constant 2 : index
    %c0_312 = arith.constant 0 : index
    %c0_313 = arith.constant 0 : index
    %251 = vector.load %arg3[%c4_310, %c2_311, %c0_312, %c0_313] : memref<5x5x4x4xf32, #tpu.memory_space<vmem>>, vector<1x1x4x4xf32>
    %252 = vector.shape_cast %251 : vector<1x1x4x4xf32> to vector<4x4xf32>
    %253 = vector.shape_cast %252 : vector<4x4xf32> to vector<1x4x4xf32>
    %254 = vector.broadcast %253 : vector<1x4x4xf32> to vector<8x4x4xf32>
    "tpu.trace_start"() <{level = 10 : i32, message = "hoc,hcw->how"}> : () -> ()
    %cst_314 = arith.constant dense<0.000000e+00> : vector<8x4x8xf32>
    %255 = tpu.matmul %254, %250, %cst_314 {dimension_numbers = #tpu.dot_dimension_numbers<[2], [1], [1], [2], [0, 0, 0, 1, 1, 2], [0], [0]>} : vector<8x4x4xf32>, vector<8x4x8xf32>, vector<8x4x8xf32> -> vector<8x4x8xf32>
    "tpu.trace_stop"() : () -> ()
    %256 = arith.addf %248, %255 : vector<8x4x8xf32>
    %c0_315 = arith.constant 0 : index
    %c1_316 = arith.constant 1 : index
    %c2_317 = arith.constant 2 : index
    %c0_318 = arith.constant 0 : index
    %c1_319 = arith.constant 1 : index
    %257 = vector.load %arg1[%c0_315, %c1_316, %c2_317, %c0_318, %c1_319] : memref<1x4x10x4x10xf32, #tpu.memory_space<vmem>>, vector<1x1x8x4x8xf32>
    %258 = vector.shape_cast %257 : vector<1x1x8x4x8xf32> to vector<8x4x8xf32>
    %c4_320 = arith.constant 4 : index
    %c3_321 = arith.constant 3 : index
    %c0_322 = arith.constant 0 : index
    %c0_323 = arith.constant 0 : index
    %259 = vector.load %arg3[%c4_320, %c3_321, %c0_322, %c0_323] : memref<5x5x4x4xf32, #tpu.memory_space<vmem>>, vector<1x1x4x4xf32>
    %260 = vector.shape_cast %259 : vector<1x1x4x4xf32> to vector<4x4xf32>
    %261 = vector.shape_cast %260 : vector<4x4xf32> to vector<1x4x4xf32>
    %262 = vector.broadcast %261 : vector<1x4x4xf32> to vector<8x4x4xf32>
    "tpu.trace_start"() <{level = 10 : i32, message = "hoc,hcw->how"}> : () -> ()
    %cst_324 = arith.constant dense<0.000000e+00> : vector<8x4x8xf32>
    %263 = tpu.matmul %262, %258, %cst_324 {dimension_numbers = #tpu.dot_dimension_numbers<[2], [1], [1], [2], [0, 0, 0, 1, 1, 2], [0], [0]>} : vector<8x4x4xf32>, vector<8x4x8xf32>, vector<8x4x8xf32> -> vector<8x4x8xf32>
    "tpu.trace_stop"() : () -> ()
    %264 = arith.addf %256, %263 : vector<8x4x8xf32>
    %c0_325 = arith.constant 0 : index
    %c0_326 = arith.constant 0 : index
    %c2_327 = arith.constant 2 : index
    %c0_328 = arith.constant 0 : index
    %c2_329 = arith.constant 2 : index
    %265 = vector.load %arg1[%c0_325, %c0_326, %c2_327, %c0_328, %c2_329] : memref<1x4x10x4x10xf32, #tpu.memory_space<vmem>>, vector<1x1x8x4x8xf32>
    %266 = vector.shape_cast %265 : vector<1x1x8x4x8xf32> to vector<8x4x8xf32>
    %c4_330 = arith.constant 4 : index
    %c4_331 = arith.constant 4 : index
    %c0_332 = arith.constant 0 : index
    %c0_333 = arith.constant 0 : index
    %267 = vector.load %arg3[%c4_330, %c4_331, %c0_332, %c0_333] : memref<5x5x4x4xf32, #tpu.memory_space<vmem>>, vector<1x1x4x4xf32>
    %268 = vector.shape_cast %267 : vector<1x1x4x4xf32> to vector<4x4xf32>
    %269 = vector.shape_cast %268 : vector<4x4xf32> to vector<1x4x4xf32>
    %270 = vector.broadcast %269 : vector<1x4x4xf32> to vector<8x4x4xf32>
    "tpu.trace_start"() <{level = 10 : i32, message = "hoc,hcw->how"}> : () -> ()
    %cst_334 = arith.constant dense<0.000000e+00> : vector<8x4x8xf32>
    %271 = tpu.matmul %270, %266, %cst_334 {dimension_numbers = #tpu.dot_dimension_numbers<[2], [1], [1], [2], [0, 0, 0, 1, 1, 2], [0], [0]>} : vector<8x4x4xf32>, vector<8x4x8xf32>, vector<8x4x8xf32> -> vector<8x4x8xf32>
    "tpu.trace_stop"() : () -> ()
    %272 = arith.addf %264, %271 : vector<8x4x8xf32>
    %c0_335 = arith.constant 0 : index
    %c0_336 = arith.constant 0 : index
    %c0_337 = arith.constant 0 : index
    %273 = vector.load %arg4[%c0_335, %c0_336, %c0_337] : memref<1x4x1xf32, #tpu.memory_space<vmem>>, vector<1x4x1xf32>
    %274 = vector.broadcast %273 : vector<1x4x1xf32> to vector<8x4x8xf32>
    %275 = arith.addf %272, %274 : vector<8x4x8xf32>
    %c0_338 = arith.constant 0 : index
    %c0_339 = arith.constant 0 : index
    %c0_340 = arith.constant 0 : index
    %c0_341 = arith.constant 0 : index
    %276 = vector.load %arg5[%c0_338, %c0_339, %c0_340, %c0_341] : memref<1x8x4x8xf32, #tpu.memory_space<vmem>>, vector<1x8x4x8xf32>
    %277 = vector.shape_cast %276 : vector<1x8x4x8xf32> to vector<8x4x8xf32>
    %278 = vector.shape_cast %275 : vector<8x4x8xf32> to vector<1x8x4x8xf32>
    tpu.vector_store %arg5[%c0_338, %c0_339, %c0_340, %c0_341], %278 {strides = array<i32>} : memref<1x8x4x8xf32, #tpu.memory_space<vmem>>, vector<1x8x4x8xf32>,
    return
  }
  func.func @transform_0(%arg0: i32) -> (i32, i32, i32, i32, i32) {
    %c0_i32 = arith.constant 0 : i32
    %c0_i32_0 = arith.constant 0 : i32
    %c0_i32_1 = arith.constant 0 : i32
    %c0_i32_2 = arith.constant 0 : i32
    %c0_i32_3 = arith.constant 0 : i32
    return %arg0, %c0_i32, %c0_i32_0, %c0_i32_1, %c0_i32_2 : i32, i32, i32, i32, i32
  }
  func.func @transform_1(%arg0: i32) -> (i32, i32, i32, i32) {
    %c0_i32 = arith.constant 0 : i32
    %c0_i32_0 = arith.constant 0 : i32
    %c0_i32_1 = arith.constant 0 : i32
    %c0_i32_2 = arith.constant 0 : i32
    %c0_i32_3 = arith.constant 0 : i32
    return %c0_i32, %c0_i32_0, %c0_i32_1, %c0_i32_2 : i32, i32, i32, i32
  }
  func.func @transform_2(%arg0: i32) -> (i32, i32, i32, i32) {
    %c0_i32 = arith.constant 0 : i32
    %c0_i32_0 = arith.constant 0 : i32
    %c0_i32_1 = arith.constant 0 : i32
    %c0_i32_2 = arith.constant 0 : i32
    %c0_i32_3 = arith.constant 0 : i32
    return %c0_i32, %c0_i32_0, %c0_i32_1, %c0_i32_2 : i32, i32, i32, i32
  }
  func.func @transform_3(%arg0: i32) -> (i32, i32, i32) {
    %c0_i32 = arith.constant 0 : i32
    %c0_i32_0 = arith.constant 0 : i32
    %c0_i32_1 = arith.constant 0 : i32
    %c0_i32_2 = arith.constant 0 : i32
    return %c0_i32, %c0_i32_0, %c0_i32_1 : i32, i32, i32
  }
  func.func @transform_4(%arg0: i32) -> (i32, i32, i32, i32) {
    %c0_i32 = arith.constant 0 : i32
    %c0_i32_0 = arith.constant 0 : i32
    %c0_i32_1 = arith.constant 0 : i32
    %c0_i32_2 = arith.constant 0 : i32
    return %arg0, %c0_i32, %c0_i32_0, %c0_i32_1 : i32, i32, i32, i32
  }
}

</mosaic_0001>

<bundles_post_ra>
// kernel: downsample_forward.1
= control target key start
LH: loop header
LB: loop body
LE: loop exit
PB: predicated region body
PF: predicated region fallthrough
CT: control target
= control target key end

     0   :  { %s23967_s15 = smov 0   ;;  %s26715_s0 = inlined_call_operand.vmem [shape: f32[2,4,10,4,10], index: 0, kind: input, shape index: {}]   ;;  %s26716_s1 = inlined_call_operand.vmem [shape: f32[3,3,4,4], index: 1, kind: input, shape index: {}]   ;;  %s26717_s2 = inlined_call_operand.vmem [shape: f32[5,5,4,4], index: 2, kind: input, shape index: {}]   ;;  %s26718_s3 = inlined_call_operand.vmem [shape: f32[1,4,1], index: 3, kind: input, shape index: {}]   ;;  %s26719_s4 = inlined_call_operand.vmem [shape: f32[2,8,4,8], index: 4, kind: output, shape index: {}]  }
   0x1 LB: > { %s21175_s16 = sadd.s32 4294967295, %s23935_s15   ;;  %p21179_p0 = scmp.ge.s32.totalorder %s23935_s15, 1  ;;  %s23935_s15 = sphi %s23967_s15, %s14_s15  }
   0x2   : > { %p162_p1 = scmp.lt.s32.totalorder %s23935_s15, 3 }
   0x4   : > { %p163_p2 = pnand %p21179_p0, %p162_p1 }
   0x5   : > { %p188_p3 = scmp.lt.s32.totalorder (!%p163_p2), %s21175_s16, 1  ;;  %v23937_v0 = vmov (!%p163_p2), 0.0   ;;  %vm23938_vm0 = vmmov (!%p163_p2), 0   ;;  %s23939_s21 = smov (!%p163_p2), 127   ;;  %vm226_vm1 = vcmask (!%p163_p2), 1043456   ;;  %vm222_vm2 = vcmask (!%p163_p2), 31744  }
   0x6   : > { %166 = sbr.rel (%p163_p2) target bundleno = 948 (0x3b4), region = 36  ;;  %22554 = vmatprep.subr.mxu0 (!%p163_p2), %v23937_v0  ;;  %22556 = vmatprep.mubr.msk.f32.mxu0 (!%p163_p2), %vm23938_vm0, %v23937_v0  ;;  %v21199_v59 = vld [vmem:[%s26716_s1 + $0x4] sm:$0xf] (!%p163_p2)  ;;  %s23940_s8 = smov (!%p163_p2), 126   ;;  %vm21111_vm3 = vcmask (!%p163_p2), 60416  }
   0x7   : > { %22559 = vmatprep.subr.mxu1 (!%p163_p2), %v23937_v0  ;;  %22561 = vmatprep.mubr.msk.f32.mxu1 (!%p163_p2), %vm23938_vm0, %v23937_v0 }
   0xd   : > { %s26721_s16 = smov (!%p188_p3, %s21175_s16), 1 }
   0xe   : > { %s23914_s17 = smul.u32 160, %s26721_s16  ;;  %s22009_s26 = sshll.u32 %s26721_s16, 5 }
   0xf   : > { %s26694_s29 = scalar_lea.vmem %s26719_s4, %s22009_s26 }
  0x10   : > { %s23987_s20 = scalar_lea.vmem %s26715_s0, %s23914_s17 }
  0x11   : > { %v21191_v1 = vld [vmem:[%s23987_s20 + $0x50] sm:$0xf]  ;;  %v21193_v2 = vld [vmem:[%s23987_s20 + $0x58] sm:$0xf]  ;;  %v21192_v3 = vld [vmem:[%s23987_s20 + $0x54] sm:$0xf] }
  0x12   : > { %220 = vrot.lane.b32.xlu0 %v21191_v1, %s23939_s21  ;;  %375 = vrot.lane.b32.xlu1 %v21193_v2, %s23939_s21  ;;  %v21194_v4 = vld [vmem:[%s23987_s20 + $0x5c] sm:$0xf]  ;;  %v21195_v5 = vld [vmem:[%s23987_s20 + $0x60] sm:$0xf] }
  0x13   : > { %v21196_v6 = vld [vmem:[%s23987_s20 + $0x64] sm:$0xf]  ;;  %v21197_v7 = vld [vmem:[%s23987_s20 + $0x68] sm:$0xf]  ;;  %v21198_v8 = vld [vmem:[%s23987_s20 + $0x6c] sm:$0xf] }
  0x14   : > { %v21232_v9 = vld [vmem:[%s23987_s20 + $0x78] sm:$0xf]  ;;  %v21233_v10 = vld [vmem:[%s23987_s20 + $0x7c] sm:$0xf]  ;;  %v21234_v11 = vld [vmem:[%s23987_s20 + $0x80] sm:$0xf] }
  0x15   : > { %v21235_v12 = vld [vmem:[%s23987_s20 + $0x84] sm:$0xf]  ;;  %v21236_v13 = vld [vmem:[%s23987_s20 + $0x88] sm:$0xf]  ;;  %v21237_v14 = vld [vmem:[%s23987_s20 + $0x8c] sm:$0xf] }
  0x16   : > { %300 = vrot.lane.b32.xlu0 %v21192_v3, %s23939_s21  ;;  %450 = vrot.lane.b32.xlu1 %v21194_v4, %s23939_s21  ;;  %v21238_v15 = vld [vmem:[%s23987_s20 + $0x90] sm:$0xf]  ;;  %v21239_v16 = vld [vmem:[%s23987_s20 + $0x94] sm:$0xf] }
  0x17   : > { %v21282_v17 = vld [vmem:[%s23987_s20 + $0x4] sm:$0xf]  ;;  %v21283_v18 = vld [vmem:[%s23987_s20 + $0x8] sm:$0xf]  ;;  %v21284_v19 = vld [vmem:[%s23987_s20 + $0xc] sm:$0xf] }
  0x18   : > { %v21285_v20 = vld [vmem:[%s23987_s20 + $0x10] sm:$0xf]  ;;  %v21286_v21 = vld [vmem:[%s23987_s20 + $0x14] sm:$0xf]  ;;  %v21287_v22 = vld [vmem:[%s23987_s20 + $0x18] sm:$0xf] }
  0x19   : > { %v21288_v23 = vld [vmem:[%s23987_s20 + $0x1c] sm:$0xf]  ;;  %v21289_v24 = vld [vmem:[%s23987_s20 + $0x20] sm:$0xf]  ;;  %v21307_v25 = vld [vmem:[%s23987_s20 + $0x2c] sm:$0xf] }
  0x1a   : > { %525 = vrot.lane.b32.xlu0 %v21195_v5, %s23939_s21  ;;  %600 = vrot.lane.b32.xlu1 %v21196_v6, %s23939_s21  ;;  %v21308_v26 = vld [vmem:[%s23987_s20 + $0x30] sm:$0xf]  ;;  %v21309_v27 = vld [vmem:[%s23987_s20 + $0x34] sm:$0xf] }
  0x1b   : > { %v21310_v28 = vld [vmem:[%s23987_s20 + $0x38] sm:$0xf]  ;;  %v21311_v29 = vld [vmem:[%s23987_s20 + $0x3c] sm:$0xf]  ;;  %v21312_v30 = vld [vmem:[%s23987_s20 + $0x40] sm:$0xf] }
  0x1c   : > { %v21313_v31 = vld [vmem:[%s23987_s20 + $0x44] sm:$0xf]  ;;  %v21314_v32 = vld [vmem:[%s23987_s20 + $0x48] sm:$0xf]  ;;  %v21357_v33 = vld [vmem:[%s23987_s20 + $0x54] sm:$0xf] }
  0x1d   : > { %v21358_v34 = vld [vmem:[%s23987_s20 + $0x58] sm:$0xf]  ;;  %v21359_v35 = vld [vmem:[%s23987_s20 + $0x5c] sm:$0xf]  ;;  %v21360_v36 = vld [vmem:[%s23987_s20 + $0x60] sm:$0xf] }
  0x1e   : > { %675 = vrot.lane.b32.xlu0 %v21197_v7, %s23939_s21  ;;  %750 = vrot.lane.b32.xlu1 %v21198_v8, %s23939_s21  ;;  %v21361_v37 = vld [vmem:[%s23987_s20 + $0x64] sm:$0xf]  ;;  %v21362_v38 = vld [vmem:[%s23987_s20 + $0x68] sm:$0xf] }
  0x1f   : > { %v21363_v39 = vld [vmem:[%s23987_s20 + $0x6c] sm:$0xf]  ;;  %v21364_v40 = vld [vmem:[%s23987_s20 + $0x70] sm:$0xf]  ;;  %v21382_v41 = vld [vmem:[%s23987_s20 + $0x7c] sm:$0xf] }
  0x20   : > { %v21383_v42 = vld [vmem:[%s23987_s20 + $0x80] sm:$0xf]  ;;  %v21384_v43 = vld [vmem:[%s23987_s20 + $0x84] sm:$0xf]  ;;  %v21385_v44 = vld [vmem:[%s23987_s20 + $0x88] sm:$0xf] }
  0x21   : > { %v21386_v45 = vld [vmem:[%s23987_s20 + $0x8c] sm:$0xf]  ;;  %v21387_v46 = vld [vmem:[%s23987_s20 + $0x90] sm:$0xf]  ;;  %v21388_v47 = vld [vmem:[%s23987_s20 + $0x94] sm:$0xf] }
  0x22   : > { %1422 = vrot.lane.b32.xlu0 %v21232_v9, %s23939_s21  ;;  %1500 = vrot.lane.b32.xlu1 %v21233_v10, %s23939_s21  ;;  %v21389_v48 = vld [vmem:[%s23987_s20 + $0x98] sm:$0xf]  ;;  %v6940_v49 = vld [vmem:[%s23987_s20] sm:$0xf] }
  0x23   : > { %v6941_v50 = vld [vmem:[%s23987_s20 + $0x4] sm:$0xf]  ;;  %v6942_v51 = vld [vmem:[%s23987_s20 + $0x8] sm:$0xf]  ;;  %v6943_v52 = vld [vmem:[%s23987_s20 + $0xc] sm:$0xf] }
  0x24   : > { %v6944_v53 = vld [vmem:[%s23987_s20 + $0x10] sm:$0xf]  ;;  %v6945_v54 = vld [vmem:[%s23987_s20 + $0x14] sm:$0xf]  ;;  %v6946_v55 = vld [vmem:[%s23987_s20 + $0x18] sm:$0xf] }
  0x25   : > { %v6947_v56 = vld [vmem:[%s23987_s20 + $0x1c] sm:$0xf]  ;;  %v21465_v57 = vld [vmem:[%s23987_s20 + $0x28] sm:$0xf]  ;;  %v21466_v58 = vld [vmem:[%s23987_s20 + $0x2c] sm:$0xf] }
  0x26   : > { %1575 = vrot.lane.b32.xlu0 %v21234_v11, %s23939_s21  ;;  %1650 = vrot.lane.b32.xlu1 %v21235_v12, %s23939_s21  ;;  %v21467_v62 = vld [vmem:[%s23987_s20 + $0x30] sm:$0xf]  ;;  %v21468_v63 = vld [vmem:[%s23987_s20 + $0x34] sm:$0xf] }
  0x27   : > { %v21183_v7 = vld [vmem:[%s23987_s20 + $0x78] sm:$0xf]  ;;  %v207_v8 = vld [vmem:[%s26716_s1] sm:$0xf]  ;;  %v21184_v9 = vld [vmem:[%s23987_s20 + $0x7c] sm:$0xf] }
  0x28   : > { %v21185_v10 = vld [vmem:[%s23987_s20 + $0x80] sm:$0xf]  ;;  %v21186_v11 = vld [vmem:[%s23987_s20 + $0x84] sm:$0xf]  ;;  %v21187_v12 = vld [vmem:[%s23987_s20 + $0x88] sm:$0xf] }
  0x2a   : > { %1725 = vrot.lane.b32.xlu0 %v21236_v13, %s23939_s21  ;;  %1800 = vrot.lane.b32.xlu1 %v21237_v14, %s23939_s21  ;;  %v21188_v14 = vld [vmem:[%s23987_s20 + $0x8c] sm:$0xf] }
  0x2e   : > { %1875 = vrot.lane.b32.xlu0 %v21238_v15, %s23939_s21  ;;  %1950 = vrot.lane.b32.xlu1 %v21239_v16, %s23939_s21  ;;  %v21189_v15 = vld [vmem:[%s23987_s20 + $0x90] sm:$0xf] }
  0x32   : > { %2650 = vrot.lane.b32.xlu0 %v21282_v17, %s23939_s21  ;;  %2728 = vrot.lane.b32.xlu1 %v21283_v18, %s23939_s21  ;;  %v21190_v17 = vld [vmem:[%s23987_s20 + $0x94] sm:$0xf] }
  0x36   : > { %2803 = vrot.lane.b32.xlu0 %v21284_v19, %s23939_s21  ;;  %2878 = vrot.lane.b32.xlu1 %v21285_v20, %s23939_s21  ;;  %v21240_v19 = vld [vmem:[%s26716_s1 + $0x8] sm:$0xf] }
  0x3a   : > { %2953 = vrot.lane.b32.xlu0 %v21286_v21, %s23939_s21  ;;  %3028 = vrot.lane.b32.xlu1 %v21287_v22, %s23939_s21 }
  0x3e   : > { %3103 = vrot.lane.b32.xlu0 %v21288_v23, %s23939_s21  ;;  %3178 = vrot.lane.b32.xlu1 %v21289_v24, %s23939_s21 }
  0x42   : > { %3271 = vrot.lane.b32.xlu0 %v21307_v25, %s23939_s21  ;;  %3349 = vrot.lane.b32.xlu1 %v21308_v26, %s23939_s21  ;;  %v21257_v25 = vld [vmem:[%s23987_s20 + $0x2c] sm:$0xf] }
  0x43   : > { %v21265_v26 = vld [vmem:[%s26716_s1 + $0xc] sm:$0xf] }
  0x46   : > { %3424 = vrot.lane.b32.xlu0 %v21309_v27, %s23939_s21  ;;  %3499 = vrot.lane.b32.xlu1 %v21310_v28, %s23939_s21  ;;  %v21258_v27 = vld [vmem:[%s23987_s20 + $0x30] sm:$0xf]  ;;  %v21259_v28 = vld [vmem:[%s23987_s20 + $0x34] sm:$0xf] }
  0x4a   : > { %3574 = vrot.lane.b32.xlu0 %v21311_v29, %s23939_s21  ;;  %3649 = vrot.lane.b32.xlu1 %v21312_v30, %s23939_s21  ;;  %v21260_v30 = vld [vmem:[%s23987_s20 + $0x38] sm:$0xf] }
  0x4e   : > { %3724 = vrot.lane.b32.xlu0 %v21313_v31, %s23939_s21  ;;  %3799 = vrot.lane.b32.xlu1 %v21314_v32, %s23939_s21  ;;  %v21261_v31 = vld [vmem:[%s23987_s20 + $0x3c] sm:$0xf] }
  0x52   : > { %4499 = vrot.lane.b32.xlu0 %v21357_v33, %s23939_s21  ;;  %4577 = vrot.lane.b32.xlu1 %v21358_v34, %s23939_s21  ;;  %v21262_v34 = vld [vmem:[%s23987_s20 + $0x40] sm:$0xf] }
  0x56   : > { %4652 = vrot.lane.b32.xlu0 %v21359_v35, %s23939_s21  ;;  %4727 = vrot.lane.b32.xlu1 %v21360_v36, %s23939_s21  ;;  %v21263_v35 = vld [vmem:[%s23987_s20 + $0x44] sm:$0xf] }
  0x5a   : > { %4802 = vrot.lane.b32.xlu0 %v21361_v37, %s23939_s21  ;;  %4877 = vrot.lane.b32.xlu1 %v21362_v38, %s23939_s21  ;;  %v21264_v37 = vld [vmem:[%s23987_s20 + $0x48] sm:$0xf] }
  0x5e   : > { %4952 = vrot.lane.b32.xlu0 %v21363_v39, %s23939_s21  ;;  %5027 = vrot.lane.b32.xlu1 %v21364_v40, %s23939_s21  ;;  %v21290_v39 = vld [vmem:[%s26716_s1 + $0x10] sm:$0xf] }
  0x62   : > { %5120 = vrot.lane.b32.xlu0 %v21382_v41, %s23939_s21  ;;  %5198 = vrot.lane.b32.xlu1 %v21383_v42, %s23939_s21 }
  0x66   : > { %5273 = vrot.lane.b32.xlu0 %v21384_v43, %s23939_s21  ;;  %5348 = vrot.lane.b32.xlu1 %v21385_v44, %s23939_s21 }
  0x6a   : > { %5423 = vrot.lane.b32.xlu0 %v21386_v45, %s23939_s21  ;;  %5498 = vrot.lane.b32.xlu1 %v21387_v46, %s23939_s21  ;;  %v21315_v45 = vld [vmem:[%s26716_s1 + $0x14] sm:$0xf] }
  0x6e   : > { %5573 = vrot.lane.b32.xlu0 %v21388_v47, %s23939_s21  ;;  %5648 = vrot.lane.b32.xlu1 %v21389_v48, %s23939_s21  ;;  %v21469_v47 = vld [vmem:[%s23987_s20 + $0x38] sm:$0xf] }
  0x72   : > { %6951 = vrot.lane.b32.xlu0 %v6940_v49, %s23939_s21  ;;  %7029 = vrot.lane.b32.xlu1 %v6941_v50, %s23939_s21  ;;  %v21470_v49 = vld [vmem:[%s23987_s20 + $0x3c] sm:$0xf] }
  0x76   : > { %7104 = vrot.lane.b32.xlu0 %v6942_v51, %s23939_s21  ;;  %7179 = vrot.lane.b32.xlu1 %v6943_v52, %s23939_s21  ;;  %v21471_v51 = vld [vmem:[%s23987_s20 + $0x40] sm:$0xf] }
  0x7a   : > { %7254 = vrot.lane.b32.xlu0 %v6944_v53, %s23939_s21  ;;  %7329 = vrot.lane.b32.xlu1 %v6945_v54, %s23939_s21  ;;  %v21472_v53 = vld [vmem:[%s23987_s20 + $0x44] sm:$0xf] }
  0x7e   : > { %7404 = vrot.lane.b32.xlu0 %v6946_v55, %s23939_s21  ;;  %7479 = vrot.lane.b32.xlu1 %v6947_v56, %s23939_s21  ;;  %v8182_v55 = vld [vmem:[%s23987_s20] sm:$0xf]  ;;  %v8183_v56 = vld [vmem:[%s23987_s20 + $0x4] sm:$0xf] }
  0x82   : > { %7572 = vrot.lane.b32.xlu0 %v21465_v57, %s23939_s21  ;;  %7650 = vrot.lane.b32.xlu1 %v21466_v58, %s23939_s21  ;;  %v21332_v58 = vld [vmem:[%s23987_s20 + $0x7c] sm:$0xf] }
  0x84   : > { %v221_v60 = vpop.permute.xlu0 %220  ;;  %v376_v61 = vpop.permute.xlu1 %375 }
  0x85   : > { %22555 = vmatpush3.msk.msra.mxu0 %vm226_vm1, %v221_v60  ;;  %v21340_v60 = vld [vmem:[%s26716_s1 + $0x18] sm:$0xf] }
  0x86   : > { %22557 = vmatmul.mubr.msk.f32.vlgmr.msra.gmra.mrb[0].mxu0 %vm222_vm2, %v21199_v59  ;;  %22564 = vmatprep.subr.mxu0 %v23937_v0 }
  0x87   : > { %22565 = vmatpush3.msk.msra.mxu0 %vm226_vm1, %v376_v61  ;;  %22566 = vmatprep.mubr.msk.f32.mxu0 %vm23938_vm0, %v23937_v0  ;;  %v8185_v61 = vld [vmem:[%s23987_s20 + $0xc] sm:$0xf] }
  0x88   : > { %v301_v1 = vpop.permute.xlu0 %300  ;;  %v451_v2 = vpop.permute.xlu1 %450  ;;  %22574 = vmatprep.subr.mxu0 %v23937_v0  ;;  %7725 = vrot.lane.b32.xlu0 %v21467_v62, %s23939_s21  ;;  %v21333_v62 = vld [vmem:[%s23987_s20 + $0x80] sm:$0xf] }
  0x89   : > { %22560 = vmatpush3.msk.msra.mxu1 %vm226_vm1, %v301_v1  ;;  %7800 = vrot.lane.b32.xlu1 %v21468_v63, %s23939_s21  ;;  %v21334_v63 = vld [vmem:[%s23987_s20 + $0x84] sm:$0xf] }
  0x8a   : > { %22562 = vmatmul.mubr.msk.f32.vlgmr.msra.gmra.mrb[0].mxu1 %vm222_vm2, %v21199_v59  ;;  %22567 = vmatmul.mubr.msk.f32.vlgmr.msra.gmra.mrb[2].mxu0 %vm222_vm2, %v21199_v59 }
  0x8b   : > { %22569 = vmatprep.subr.mxu1 %v23937_v0  ;;  %22571 = vmatprep.mubr.msk.f32.mxu1 %vm23938_vm0, %v23937_v0 }
  0x8c   : > { %22570 = vmatpush3.msk.msra.mxu1 %vm226_vm1, %v451_v2  ;;  %v526_v3 = vpop.permute.xlu0 %525  ;;  %22576 = vmatprep.mubr.msk.f32.mxu0 %vm23938_vm0, %v23937_v0  ;;  %v601_v4 = vpop.permute.xlu1 %600  ;;  %v8186_v2 = vld [vmem:[%s23987_s20 + $0x10] sm:$0xf] }
  0x8d   : > { %22575 = vmatpush3.msk.msra.mxu0 %vm226_vm1, %v526_v3  ;;  %22579 = vmatprep.subr.mxu1 %v23937_v0  ;;  %v8187_v3 = vld [vmem:[%s23987_s20 + $0x14] sm:$0xf] }
  0x8e   : > { %22572 = vmatmul.mubr.msk.f32.vlgmr.msra.gmra.mrb[2].mxu1 %vm222_vm2, %v21199_v59  ;;  %22577 = vmatmul.mubr.msk.f32.vlgmr.msra.gmra.mrb[4].mxu0 %vm222_vm2, %v21199_v59 }
  0x8f   : > { %22580 = vmatpush3.msk.msra.mxu1 %vm226_vm1, %v601_v4  ;;  %22584 = vmatprep.subr.mxu0 %v23937_v0  ;;  %v21335_v4 = vld [vmem:[%s23987_s20 + $0x88] sm:$0xf] }
  0x90   : > { %v676_v5 = vpop.permute.xlu0 %675  ;;  %22581 = vmatprep.mubr.msk.f32.mxu1 %vm23938_vm0, %v23937_v0  ;;  %22586 = vmatprep.mubr.msk.f32.mxu0 %vm23938_vm0, %v23937_v0  ;;  %v751_v6 = vpop.permute.xlu1 %750 }
  0x91   : > { %22585 = vmatpush3.msk.msra.mxu0 %vm226_vm1, %v676_v5  ;;  %22589 = vmatprep.subr.mxu1 %v23937_v0 }
  0x92   : > { %22582 = vmatmul.mubr.msk.f32.vlgmr.msra.gmra.mrb[4].mxu1 %vm222_vm2, %v21199_v59  ;;  %22587 = vmatmul.mubr.msk.f32.vlgmr.msra.gmra.mrb[6].mxu0 %vm222_vm2, %v21199_v59 }
  0x93   : > { %22590 = vmatpush3.msk.msra.mxu1 %vm226_vm1, %v751_v6  ;;  %22594 = vmatprep.subr.mxu0 %v23937_v0  ;;  %v21336_v6 = vld [vmem:[%s23987_s20 + $0x8c] sm:$0xf] }
  0x94   : > { %22591 = vmatprep.mubr.msk.f32.mxu1 %vm23938_vm0, %v23937_v0  ;;  %22595 = vmatpush3.msk.msra.mxu0 %vm226_vm1, %v21183_v7  ;;  %v1423_v13 = vpop.permute.xlu0 %1422  ;;  %v1501_v16 = vpop.permute.xlu1 %1500  ;;  %v8188_v7 = vld [vmem:[%s23987_s20 + $0x18] sm:$0xf] }
  0x95   : > { %22596 = vmatprep.mubr.msk.f32.mxu0 %vm23938_vm0, %v23937_v0  ;;  %22599 = vmatprep.subr.mxu1 %v23937_v0 }
  0x96   : > { %22592 = vmatmul.mubr.msk.f32.vlgmr.msra.gmra.mrb[6].mxu1 %vm222_vm2, %v21199_v59  ;;  %22597 = vmatmul.mubr.msk.f32.vlgmr.msra.gmra.mrb[8].mxu0 %vm222_vm2, %v207_v8  ;;  %v8184_v59 = vld [vmem:[%s23987_s20 + $0x8] sm:$0xf] }
  0x97   : > { %22600 = vmatpush3.msk.msra.mxu1 %vm226_vm1, %v21184_v9  ;;  %22604 = vmatprep.subr.mxu0 %v23937_v0  ;;  %v8189_v9 = vld [vmem:[%s23987_s20 + $0x1c] sm:$0xf] }
  0x98   : > { %22601 = vmatprep.mubr.msk.f32.mxu1 %vm23938_vm0, %v23937_v0  ;;  %22605 = vmatpush3.msk.msra.mxu0 %vm226_vm1, %v21185_v10  ;;  %v1576_v18 = vpop.permute.xlu0 %1575  ;;  %v1651_v20 = vpop.permute.xlu1 %1650  ;;  %v21337_v10 = vld [vmem:[%s23987_s20 + $0x90] sm:$0xf] }
  0x99   : > { %22606 = vmatprep.mubr.msk.f32.mxu0 %vm23938_vm0, %v23937_v0  ;;  %22609 = vmatprep.subr.mxu1 %v23937_v0 }
  0x9a   : > { %22602 = vmatmul.mubr.msk.f32.vlgmr.msra.gmra.mrb[8].mxu1 %vm222_vm2, %v207_v8  ;;  %22607 = vmatmul.mubr.msk.f32.vlgmr.msra.gmra.mrb[10].mxu0 %vm222_vm2, %v207_v8 }
  0x9b   : > { %22610 = vmatpush3.msk.msra.mxu1 %vm226_vm1, %v21186_v11  ;;  %22614 = vmatprep.subr.mxu0 %v23937_v0  ;;  %v21338_v11 = vld [vmem:[%s23987_s20 + $0x94] sm:$0xf] }
  0x9c   : > { %22611 = vmatprep.mubr.msk.f32.mxu1 %vm23938_vm0, %v23937_v0  ;;  %22615 = vmatpush3.msk.msra.mxu0 %vm226_vm1, %v21187_v12  ;;  %v1726_v21 = vpop.permute.xlu0 %1725  ;;  %v1801_v22 = vpop.permute.xlu1 %1800 }
  0x9d   : > { %22616 = vmatprep.mubr.msk.f32.mxu0 %vm23938_vm0, %v23937_v0  ;;  %22619 = vmatprep.subr.mxu1 %v23937_v0 }
  0x9e   : > { %22612 = vmatmul.mubr.msk.f32.vlgmr.msra.gmra.mrb[10].mxu1 %vm222_vm2, %v207_v8  ;;  %22617 = vmatmul.mubr.msk.f32.vlgmr.msra.gmra.mrb[12].mxu0 %vm222_vm2, %v207_v8 }
  0x9f   : > { %22620 = vmatpush3.msk.msra.mxu1 %vm226_vm1, %v21188_v14  ;;  %22624 = vmatprep.subr.mxu0 %v23937_v0  ;;  %v21339_v14 = vld [vmem:[%s23987_s20 + $0x98] sm:$0xf] }
  0xa0   : > { %22621 = vmatprep.mubr.msk.f32.mxu1 %vm23938_vm0, %v23937_v0  ;;  %22625 = vmatpush3.msk.msra.mxu0 %vm226_vm1, %v21189_v15  ;;  %v1876_v23 = vpop.permute.xlu0 %1875  ;;  %v1951_v24 = vpop.permute.xlu1 %1950  ;;  %v21365_v15 = vld [vmem:[%s26716_s1 + $0x1c] sm:$0xf] }
  0xa1   : > { %22626 = vmatprep.mubr.msk.f32.mxu0 %vm23938_vm0, %v23937_v0  ;;  %22629 = vmatprep.subr.mxu1 %v23937_v0 }
  0xa2   : > { %22622 = vmatmul.mubr.msk.f32.vlgmr.msra.gmra.mrb[12].mxu1 %vm222_vm2, %v207_v8  ;;  %22627 = vmatmul.mubr.msk.f32.vlgmr.msra.gmra.mrb[14].mxu0 %vm222_vm2, %v207_v8 }
  0xa3   : > { %22630 = vmatpush3.msk.msra.mxu1 %vm226_vm1, %v21190_v17  ;;  %22634 = vmatprep.subr.mxu0 %v23937_v0 }
  0xa4   : > { %22631 = vmatprep.mubr.msk.f32.mxu1 %vm23938_vm0, %v23937_v0  ;;  %22635 = vmatpush3.msk.msra.mxu0 %vm226_vm1, %v1423_v13  ;;  %v2651_v29 = vpop.permute.xlu0 %2650  ;;  %v2729_v32 = vpop.permute.xlu1 %2728 }
  0xa5   : > { %22636 = vmatprep.mubr.msk.f32.mxu0 %vm23938_vm0, %v23937_v0  ;;  %22639 = vmatprep.subr.mxu1 %v23937_v0 }
  0xa6   : > { %22632 = vmatmul.mubr.msk.f32.vlgmr.msra.gmra.mrb[14].mxu1 %vm222_vm2, %v207_v8  ;;  %22637 = vmatmul.mubr.msk.f32.vlgmr.msra.gmra.mrb[16].mxu0 %vm222_vm2, %v21240_v19 }
  0xa7   : > { %22640 = vmatpush3.msk.msra.mxu1 %vm226_vm1, %v1501_v16  ;;  %22644 = vmatprep.subr.mxu0 %v23937_v0 }
  0xa8   : > { %22641 = vmatprep.mubr.msk.f32.mxu1 %vm23938_vm0, %v23937_v0  ;;  %22645 = vmatpush3.msk.msra.mxu0 %vm226_vm1, %v1576_v18  ;;  %v2804_v33 = vpop.permute.xlu0 %2803  ;;  %v2879_v36 = vpop.permute.xlu1 %2878 }
  0xa9   : > { %22646 = vmatprep.mubr.msk.f32.mxu0 %vm23938_vm0, %v23937_v0  ;;  %22649 = vmatprep.subr.mxu1 %v23937_v0 }
  0xaa   : > { %22642 = vmatmul.mubr.msk.f32.vlgmr.msra.gmra.mrb[16].mxu1 %vm222_vm2, %v21240_v19  ;;  %22647 = vmatmul.mubr.msk.f32.vlgmr.msra.gmra.mrb[18].mxu0 %vm222_vm2, %v21240_v19 }
  0xab   : > { %22650 = vmatpush3.msk.msra.mxu1 %vm226_vm1, %v1651_v20  ;;  %22654 = vmatprep.subr.mxu0 %v23937_v0 }
  0xac   : > { %22651 = vmatprep.mubr.msk.f32.mxu1 %vm23938_vm0, %v23937_v0  ;;  %22655 = vmatpush3.msk.msra.mxu0 %vm226_vm1, %v1726_v21  ;;  %v2954_v38 = vpop.permute.xlu0 %2953  ;;  %v3029_v40 = vpop.permute.xlu1 %3028 }
  0xad   : > { %22656 = vmatprep.mubr.msk.f32.mxu0 %vm23938_vm0, %v23937_v0  ;;  %22659 = vmatprep.subr.mxu1 %v23937_v0 }
  0xae   : > { %22652 = vmatmul.mubr.msk.f32.vlgmr.msra.gmra.mrb[18].mxu1 %vm222_vm2, %v21240_v19  ;;  %22657 = vmatmul.mubr.msk.f32.vlgmr.msra.gmra.mrb[20].mxu0 %vm222_vm2, %v21240_v19 }
  0xaf   : > { %22660 = vmatpush3.msk.msra.mxu1 %vm226_vm1, %v1801_v22  ;;  %22664 = vmatprep.subr.mxu0 %v23937_v0  ;;  %v21390_v22 = vld [vmem:[%s26716_s1 + $0x20] sm:$0xf] }
  0xb0   : > { %22661 = vmatprep.mubr.msk.f32.mxu1 %vm23938_vm0, %v23937_v0  ;;  %22665 = vmatpush3.msk.msra.mxu0 %vm226_vm1, %v1876_v23  ;;  %v3104_v41 = vpop.permute.xlu0 %3103  ;;  %v3179_v42 = vpop.permute.xlu1 %3178 }
  0xb1   : > { %22666 = vmatprep.mubr.msk.f32.mxu0 %vm23938_vm0, %v23937_v0  ;;  %22669 = vmatprep.subr.mxu1 %v23937_v0 }
  0xb2   : > { %22662 = vmatmul.mubr.msk.f32.vlgmr.msra.gmra.mrb[20].mxu1 %vm222_vm2, %v21240_v19  ;;  %22667 = vmatmul.mubr.msk.f32.vlgmr.msra.gmra.mrb[22].mxu0 %vm222_vm2, %v21240_v19 }
  0xb3   : > { %22670 = vmatpush3.msk.msra.mxu1 %vm226_vm1, %v1951_v24  ;;  %22674 = vmatprep.subr.mxu0 %v23937_v0 }
  0xb4   : > { %22671 = vmatprep.mubr.msk.f32.mxu1 %vm23938_vm0, %v23937_v0  ;;  %22675 = vmatpush3.msk.msra.mxu0 %vm226_vm1, %v21257_v25  ;;  %v3272_v43 = vpop.permute.xlu0 %3271  ;;  %v3350_v44 = vpop.permute.xlu1 %3349 }
  0xb5   : > { %22676 = vmatprep.mubr.msk.f32.mxu0 %vm23938_vm0, %v23937_v0  ;;  %22679 = vmatprep.subr.mxu1 %v23937_v0 }
  0xb6   : > { %22672 = vmatmul.mubr.msk.f32.vlgmr.msra.gmra.mrb[22].mxu1 %vm222_vm2, %v21240_v19  ;;  %22677 = vmatmul.mubr.msk.f32.vlgmr.msra.gmra.mrb[24].mxu0 %vm222_vm2, %v21265_v26 }
  0xb7   : > { %22680 = vmatpush3.msk.msra.mxu1 %vm226_vm1, %v21258_v27  ;;  %22684 = vmatprep.subr.mxu0 %v23937_v0  ;;  %v21557_v27 = vld [vmem:[%s23987_s20 + $0x50] sm:$0xf] }
  0xb8   : > { %22681 = vmatprep.mubr.msk.f32.mxu1 %vm23938_vm0, %v23937_v0  ;;  %22685 = vmatpush3.msk.msra.mxu0 %vm226_vm1, %v21259_v28  ;;  %v3425_v46 = vpop.permute.xlu0 %3424  ;;  %v3500_v48 = vpop.permute.xlu1 %3499  ;;  %v21558_v28 = vld [vmem:[%s23987_s20 + $0x54] sm:$0xf] }
  0xb9   : > { %22686 = vmatprep.mubr.msk.f32.mxu0 %vm23938_vm0, %v23937_v0  ;;  %22689 = vmatprep.subr.mxu1 %v23937_v0 }
  0xba   : > { %22682 = vmatmul.mubr.msk.f32.vlgmr.msra.gmra.mrb[24].mxu1 %vm222_vm2, %v21265_v26  ;;  %22687 = vmatmul.mubr.msk.f32.vlgmr.msra.gmra.mrb[26].mxu0 %vm222_vm2, %v21265_v26 }
  0xbb   : > { %22690 = vmatpush3.msk.msra.mxu1 %vm226_vm1, %v21260_v30  ;;  %22694 = vmatprep.subr.mxu0 %v23937_v0  ;;  %v5730_v30 = vld [vmem:[%s23987_s20] sm:$0xf] }
  0xbc   : > { %22691 = vmatprep.mubr.msk.f32.mxu1 %vm23938_vm0, %v23937_v0  ;;  %22695 = vmatpush3.msk.msra.mxu0 %vm226_vm1, %v21261_v31  ;;  %v3575_v50 = vpop.permute.xlu0 %3574  ;;  %v3650_v52 = vpop.permute.xlu1 %3649  ;;  %v21559_v31 = vld [vmem:[%s23987_s20 + $0x58] sm:$0xf] }
  0xbd   : > { %22696 = vmatprep.mubr.msk.f32.mxu0 %vm23938_vm0, %v23937_v0  ;;  %22699 = vmatprep.subr.mxu1 %v23937_v0 }
  0xbe   : > { %22692 = vmatmul.mubr.msk.f32.vlgmr.msra.gmra.mrb[26].mxu1 %vm222_vm2, %v21265_v26  ;;  %22697 = vmatmul.mubr.msk.f32.vlgmr.msra.gmra.mrb[28].mxu0 %vm222_vm2, %v21265_v26 }
  0xbf   : > { %22700 = vmatpush3.msk.msra.mxu1 %vm226_vm1, %v21262_v34  ;;  %22704 = vmatprep.subr.mxu0 %v23937_v0  ;;  %v5731_v34 = vld [vmem:[%s23987_s20 + $0x4] sm:$0xf] }
  0xc0   : > { %22701 = vmatprep.mubr.msk.f32.mxu1 %vm23938_vm0, %v23937_v0  ;;  %22705 = vmatpush3.msk.msra.mxu0 %vm226_vm1, %v21263_v35  ;;  %v3725_v54 = vpop.permute.xlu0 %3724  ;;  %v3800_v57 = vpop.permute.xlu1 %3799  ;;  %v5732_v35 = vld [vmem:[%s23987_s20 + $0x8] sm:$0xf] }
  0xc1   : > { %22706 = vmatprep.mubr.msk.f32.mxu0 %vm23938_vm0, %v23937_v0  ;;  %22709 = vmatprep.subr.mxu1 %v23937_v0 }
  0xc2   : > { %22702 = vmatmul.mubr.msk.f32.vlgmr.msra.gmra.mrb[28].mxu1 %vm222_vm2, %v21265_v26  ;;  %22707 = vmatmul.mubr.msk.f32.vlgmr.msra.gmra.mrb[30].mxu0 %vm222_vm2, %v21265_v26 }
  0xc3   : > { %22710 = vmatpush3.msk.msra.mxu1 %vm226_vm1, %v21264_v37  ;;  %22714 = vmatprep.subr.mxu0 %v23937_v0  ;;  %v21562_v37 = vld [vmem:[%s23987_s20 + $0x64] sm:$0xf] }
  0xc4   : > { %22711 = vmatprep.mubr.msk.f32.mxu1 %vm23938_vm0, %v23937_v0  ;;  %22715 = vmatpush3.msk.msra.mxu0 %vm226_vm1, %v2651_v29  ;;  %v4500_v1 = vpop.permute.xlu0 %4499  ;;  %v4578_v5 = vpop.permute.xlu1 %4577 }
  0xc5   : > { %22716 = vmatprep.mubr.msk.f32.mxu0 %vm23938_vm0, %v23937_v0  ;;  %22719 = vmatprep.subr.mxu1 %v23937_v0 }
  0xc6   : > { %22712 = vmatmul.mubr.msk.f32.vlgmr.msra.gmra.mrb[30].mxu1 %vm222_vm2, %v21265_v26  ;;  %22717 = vmatmul.mubr.msk.f32.vlgmr.msra.gmra.mrb[32].mxu0 %vm222_vm2, %v21290_v39 }
  0xc7   : > { %22720 = vmatpush3.msk.msra.mxu1 %vm226_vm1, %v2729_v32  ;;  %22724 = vmatprep.subr.mxu0 %v23937_v0  ;;  %v24545_v32 = vld [vmem:[%s26717_s2] sm:$0xf] }
  0xc8   : > { %22721 = vmatprep.mubr.msk.f32.mxu1 %vm23938_vm0, %v23937_v0  ;;  %22725 = vmatpush3.msk.msra.mxu0 %vm226_vm1, %v2804_v33  ;;  %v4653_v8 = vpop.permute.xlu0 %4652  ;;  %v4728_v12 = vpop.permute.xlu1 %4727  ;;  %v21560_v33 = vld [vmem:[%s23987_s20 + $0x5c] sm:$0xf] }
  0xc9   : > { %22726 = vmatprep.mubr.msk.f32.mxu0 %vm23938_vm0, %v23937_v0  ;;  %22729 = vmatprep.subr.mxu1 %v23937_v0 }
  0xca   : > { %22722 = vmatmul.mubr.msk.f32.vlgmr.msra.gmra.mrb[32].mxu1 %vm222_vm2, %v21290_v39  ;;  %22727 = vmatmul.mubr.msk.f32.vlgmr.msra.gmra.mrb[34].mxu0 %vm222_vm2, %v21290_v39 }
  0xcb   : > { %22730 = vmatpush3.msk.msra.mxu1 %vm226_vm1, %v2879_v36  ;;  %22734 = vmatprep.subr.mxu0 %v23937_v0  ;;  %v21561_v36 = vld [vmem:[%s23987_s20 + $0x60] sm:$0xf] }
  0xcc   : > { %22731 = vmatprep.mubr.msk.f32.mxu1 %vm23938_vm0, %v23937_v0  ;;  %22735 = vmatpush3.msk.msra.mxu0 %vm226_vm1, %v2954_v38  ;;  %v4803_v13 = vpop.permute.xlu0 %4802  ;;  %v4878_v16 = vpop.permute.xlu1 %4877  ;;  %v5733_v38 = vld [vmem:[%s23987_s20 + $0xc] sm:$0xf] }
  0xcd   : > { %22736 = vmatprep.mubr.msk.f32.mxu0 %vm23938_vm0, %v23937_v0  ;;  %22739 = vmatprep.subr.mxu1 %v23937_v0 }
  0xce   : > { %22732 = vmatmul.mubr.msk.f32.vlgmr.msra.gmra.mrb[34].mxu1 %vm222_vm2, %v21290_v39  ;;  %22737 = vmatmul.mubr.msk.f32.vlgmr.msra.gmra.mrb[36].mxu0 %vm222_vm2, %v21290_v39 }
  0xcf   : > { %22740 = vmatpush3.msk.msra.mxu1 %vm226_vm1, %v3029_v40  ;;  %22744 = vmatprep.subr.mxu0 %v23937_v0  ;;  %v21563_v40 = vld [vmem:[%s23987_s20 + $0x68] sm:$0xf] }
  0xd0   : > { %22741 = vmatprep.mubr.msk.f32.mxu1 %vm23938_vm0, %v23937_v0  ;;  %22745 = vmatpush3.msk.msra.mxu0 %vm226_vm1, %v3104_v41  ;;  %v4953_v17 = vpop.permute.xlu0 %4952  ;;  %v5028_v18 = vpop.permute.xlu1 %5027  ;;  %v21564_v41 = vld [vmem:[%s23987_s20 + $0x6c] sm:$0xf] }
  0xd1   : > { %22746 = vmatprep.mubr.msk.f32.mxu0 %vm23938_vm0, %v23937_v0  ;;  %22749 = vmatprep.subr.mxu1 %v23937_v0 }
  0xd2   : > { %22742 = vmatmul.mubr.msk.f32.vlgmr.msra.gmra.mrb[36].mxu1 %vm222_vm2, %v21290_v39  ;;  %22747 = vmatmul.mubr.msk.f32.vlgmr.msra.gmra.mrb[38].mxu0 %vm222_vm2, %v21290_v39 }
  0xd3   : > { %22750 = vmatpush3.msk.msra.mxu1 %vm226_vm1, %v3179_v42  ;;  %22754 = vmatprep.subr.mxu0 %v23937_v0  ;;  %v5735_v42 = vld [vmem:[%s23987_s20 + $0x14] sm:$0xf] }
  0xd4   : > { %22751 = vmatprep.mubr.msk.f32.mxu1 %vm23938_vm0, %v23937_v0  ;;  %22755 = vmatpush3.msk.msra.mxu0 %vm226_vm1, %v3272_v43  ;;  %v5121_v19 = vpop.permute.xlu0 %5120  ;;  %v5199_v20 = vpop.permute.xlu1 %5198  ;;  %v5736_v43 = vld [vmem:[%s23987_s20 + $0x18] sm:$0xf] }
  0xd5   : > { %22756 = vmatprep.mubr.msk.f32.mxu0 %vm23938_vm0, %v23937_v0  ;;  %22759 = vmatprep.subr.mxu1 %v23937_v0 }
  0xd6   : > { %22752 = vmatmul.mubr.msk.f32.vlgmr.msra.gmra.mrb[38].mxu1 %vm222_vm2, %v21290_v39  ;;  %22757 = vmatmul.mubr.msk.f32.vlgmr.msra.gmra.mrb[40].mxu0 %vm222_vm2, %v21315_v45  ;;  %v5734_v39 = vld [vmem:[%s23987_s20 + $0x10] sm:$0xf] }
  0xd7   : > { %22760 = vmatpush3.msk.msra.mxu1 %vm226_vm1, %v3350_v44  ;;  %22764 = vmatprep.subr.mxu0 %v23937_v0  ;;  %v21582_v44 = vld [vmem:[%s23987_s20 + $0x78] sm:$0xf] }
  0xd8   : > { %22761 = vmatprep.mubr.msk.f32.mxu1 %vm23938_vm0, %v23937_v0  ;;  %22765 = vmatpush3.msk.msra.mxu0 %vm226_vm1, %v3425_v46  ;;  %v5274_v21 = vpop.permute.xlu0 %5273  ;;  %v5349_v23 = vpop.permute.xlu1 %5348  ;;  %v5737_v46 = vld [vmem:[%s23987_s20 + $0x1c] sm:$0xf] }
  0xd9   : > { %22766 = vmatprep.mubr.msk.f32.mxu0 %vm23938_vm0, %v23937_v0  ;;  %7875 = vrot.lane.b32.xlu0 %v21469_v47, %s23939_s21 }
  0xda   : > { %22762 = vmatmul.mubr.msk.f32.vlgmr.msra.gmra.mrb[40].mxu1 %vm222_vm2, %v21315_v45  ;;  %22767 = vmatmul.mubr.msk.f32.vlgmr.msra.gmra.mrb[42].mxu0 %vm222_vm2, %v21315_v45 }
  0xdb   : > { %22769 = vmatprep.subr.mxu1 %v23937_v0  ;;  %7950 = vrot.lane.b32.xlu1 %v21470_v49, %s23939_s21  ;;  %v21584_v49 = vld [vmem:[%s23987_s20 + $0x80] sm:$0xf] }
  0xdc   : > { %22770 = vmatpush3.msk.msra.mxu1 %vm226_vm1, %v3500_v48  ;;  %22774 = vmatprep.subr.mxu0 %v23937_v0  ;;  %v5424_v24 = vpop.permute.xlu0 %5423  ;;  %v5499_v25 = vpop.permute.xlu1 %5498  ;;  %v21423_v48 = vld [vmem:[%s23987_s20 + $0x28] sm:$0xf] }
  0xdd   : > { %22771 = vmatprep.mubr.msk.f32.mxu1 %vm23938_vm0, %v23937_v0  ;;  %22775 = vmatpush3.msk.msra.mxu0 %vm226_vm1, %v3575_v50  ;;  %v24623_v50 = vld [vmem:[%s26717_s2 + $0x4] sm:$0xf] }
  0xde   : > { %22776 = vmatprep.mubr.msk.f32.mxu0 %vm23938_vm0, %v23937_v0  ;;  %8025 = vrot.lane.b32.xlu0 %v21471_v51, %s23939_s21  ;;  %v21585_v51 = vld [vmem:[%s23987_s20 + $0x84] sm:$0xf] }
  0xdf   : > { %22772 = vmatmul.mubr.msk.f32.vlgmr.msra.gmra.mrb[42].mxu1 %vm222_vm2, %v21315_v45  ;;  %22777 = vmatmul.mubr.msk.f32.vlgmr.msra.gmra.mrb[44].mxu0 %vm222_vm2, %v21315_v45 }
  0xe0   : > { %22779 = vmatprep.subr.mxu1 %v23937_v0  ;;  %8100 = vrot.lane.b32.xlu1 %v21472_v53, %s23939_s21  ;;  %v5574_v26 = vpop.permute.xlu0 %5573  ;;  %v5649_v29 = vpop.permute.xlu1 %5648 }
  0xe1   : > { %22780 = vmatpush3.msk.msra.mxu1 %vm226_vm1, %v3650_v52  ;;  %22784 = vmatprep.subr.mxu0 %v23937_v0  ;;  %v21424_v52 = vld [vmem:[%s23987_s20 + $0x2c] sm:$0xf] }
  0xe2   : > { %22781 = vmatprep.mubr.msk.f32.mxu1 %vm23938_vm0, %v23937_v0  ;;  %22785 = vmatpush3.msk.msra.mxu0 %vm226_vm1, %v3725_v54  ;;  %v21425_v54 = vld [vmem:[%s23987_s20 + $0x30] sm:$0xf] }
  0xe3   : > { %22786 = vmatprep.mubr.msk.f32.mxu0 %vm23938_vm0, %v23937_v0  ;;  %8193 = vrot.lane.b32.xlu0 %v8182_v55, %s23940_s8 }
  0xe4   : > { %22782 = vmatmul.mubr.msk.f32.vlgmr.msra.gmra.mrb[44].mxu1 %vm222_vm2, %v21315_v45  ;;  %22787 = vmatmul.mubr.msk.f32.vlgmr.msra.gmra.mrb[46].mxu0 %vm222_vm2, %v21315_v45  ;;  %v24608_v47 = vpop.permute.xlu0 %6951  ;;  %v24633_v53 = vpop.permute.xlu1 %7029 }
  0xe5   : > { %22789 = vmatprep.subr.mxu1 %v23937_v0  ;;  %8271 = vrot.lane.b32.xlu1 %v8183_v56, %s23940_s8  ;;  %v21586_v56 = vld [vmem:[%s23987_s20 + $0x88] sm:$0xf] }
  0xe6   : > { %22790 = vmatpush3.msk.msra.mxu1 %vm226_vm1, %v3800_v57  ;;  %22794 = vmatprep.subr.mxu0 %v23937_v0  ;;  %v21587_v57 = vld [vmem:[%s23987_s20 + $0x8c] sm:$0xf] }
  0xe7   : > { %22791 = vmatprep.mubr.msk.f32.mxu1 %vm23938_vm0, %v23937_v0  ;;  %22795 = vmatpush3.msk.msra.mxu0 %vm226_vm1, %v21332_v58  ;;  %v21426_v58 = vld [vmem:[%s23987_s20 + $0x34] sm:$0xf] }
  0xe8   : > { %22796 = vmatprep.mubr.msk.f32.mxu0 %vm23938_vm0, %v23937_v0  ;;  %8346 = vrot.lane.b32.xlu0 %v8184_v59, %s23940_s8  ;;  %v24640_v55 = vpop.permute.xlu0 %7104  ;;  %v21427_v59 = vld [vmem:[%s23987_s20 + $0x38] sm:$0xf] }
  0xe9   : > { %22792 = vmatmul.mubr.msk.f32.vlgmr.msra.gmra.mrb[46].mxu1 %vm222_vm2, %v21315_v45  ;;  %22797 = vmatmul.mubr.msk.f32.vlgmr.msra.gmra.mrb[48].mxu0 %vm222_vm2, %v21340_v60  ;;  %v21583_v45 = vld [vmem:[%s23987_s20 + $0x7c] sm:$0xf] }
  0xea   : > { %22799 = vmatprep.subr.mxu1 %v23937_v0  ;;  %8421 = vrot.lane.b32.xlu1 %v8185_v61, %s23940_s8  ;;  %v21588_v61 = vld [vmem:[%s23987_s20 + $0x90] sm:$0xf] }
  0xeb   : > { %22800 = vmatpush3.msk.msra.mxu1 %vm226_vm1, %v21333_v62  ;;  %22804 = vmatprep.subr.mxu0 %v23937_v0 }
  0xec   : > { %22801 = vmatprep.mubr.msk.f32.mxu1 %vm23938_vm0, %v23937_v0  ;;  %22805 = vmatpush3.msk.msra.mxu0 %vm226_vm1, %v21334_v63  ;;  %v7255_v62 = vpop.permute.xlu0 %7254  ;;  %v21589_v63 = vld [vmem:[%s23987_s20 + $0x94] sm:$0xf] }
  0xed   : > { %22806 = vmatprep.mubr.msk.f32.mxu0 %vm23938_vm0, %v23937_v0  ;;  %8496 = vrot.lane.b32.xlu0 %v8186_v2, %s23940_s8  ;;  %v21429_v2 = vld [vmem:[%s23987_s20 + $0x40] sm:$0xf] }
  0xee   : > { %22802 = vmatmul.mubr.msk.f32.vlgmr.msra.gmra.mrb[48].mxu1 %vm222_vm2, %v21340_v60  ;;  %22807 = vmatmul.mubr.msk.f32.vlgmr.msra.gmra.mrb[50].mxu0 %vm222_vm2, %v21340_v60 }
  0xef   : > { %22809 = vmatprep.subr.mxu1 %v23937_v0  ;;  %8571 = vrot.lane.b32.xlu1 %v8187_v3, %s23940_s8  ;;  %v21607_v3 = vld [vmem:[%s23987_s20 + $0x50] sm:$0xf] }
  0xf0   : > { %22810 = vmatpush3.msk.msra.mxu1 %vm226_vm1, %v21335_v4  ;;  %22814 = vmatprep.subr.mxu0 %v23937_v0 }
  0xf1   : > { %22811 = vmatprep.mubr.msk.f32.mxu1 %vm23938_vm0, %v23937_v0  ;;  %22815 = vmatpush3.msk.msra.mxu0 %vm226_vm1, %v21336_v6  ;;  %v21608_v6 = vld [vmem:[%s23987_s20 + $0x54] sm:$0xf] }
  0xf2   : > { %22816 = vmatprep.mubr.msk.f32.mxu0 %vm23938_vm0, %v23937_v0  ;;  %8646 = vrot.lane.b32.xlu0 %v8188_v7, %s23940_s8  ;;  %v21430_v7 = vld [vmem:[%s23987_s20 + $0x44] sm:$0xf] }
  0xf3   : > { %22812 = vmatmul.mubr.msk.f32.vlgmr.msra.gmra.mrb[50].mxu1 %vm222_vm2, %v21340_v60  ;;  %22817 = vmatmul.mubr.msk.f32.vlgmr.msra.gmra.mrb[52].mxu0 %vm222_vm2, %v21340_v60 }
  0xf4   : > { %22819 = vmatprep.subr.mxu1 %v23937_v0  ;;  %8721 = vrot.lane.b32.xlu1 %v8189_v9, %s23940_s8  ;;  %v21448_v9 = vld [vmem:[%s26717_s2 + $0x8] sm:$0xf] }
  0xf5   : > { %22820 = vmatpush3.msk.msra.mxu1 %vm226_vm1, %v21337_v10  ;;  %22824 = vmatprep.subr.mxu0 %v23937_v0 }
  0xf6   : > { %22821 = vmatprep.mubr.msk.f32.mxu1 %vm23938_vm0, %v23937_v0  ;;  %22825 = vmatpush3.msk.msra.mxu0 %vm226_vm1, %v21338_v11  ;;  %v21610_v11 = vld [vmem:[%s23987_s20 + $0x5c] sm:$0xf] }
  0xf7   : > { %22826 = vmatprep.mubr.msk.f32.mxu0 %vm23938_vm0, %v23937_v0  ;;  %22822 = vmatmul.mubr.msk.f32.vlgmr.msra.gmra.mrb[52].mxu1 %vm222_vm2, %v21340_v60 }
  0xf8   : > { %22827 = vmatmul.mubr.msk.f32.vlgmr.msra.gmra.mrb[54].mxu0 %vm222_vm2, %v21340_v60  ;;  %22829 = vmatprep.subr.mxu1 %v23937_v0 }
  0xf9   : > { %22830 = vmatpush3.msk.msra.mxu1 %vm226_vm1, %v21339_v14  ;;  %22834 = vmatprep.subr.mxu0 %v23937_v0  ;;  %v21612_v14 = vld [vmem:[%s23987_s20 + $0x64] sm:$0xf] }
  0xfa   : > { %22831 = vmatprep.mubr.msk.f32.mxu1 %vm23938_vm0, %v23937_v0  ;;  %22835 = vmatpush3.msk.msra.mxu0 %vm226_vm1, %v4500_v1  ;;  %v21428_v1 = vld [vmem:[%s23987_s20 + $0x3c] sm:$0xf] }
  0xfb   : > { %22836 = vmatprep.mubr.msk.f32.mxu0 %vm23938_vm0, %v23937_v0  ;;  %22832 = vmatmul.mubr.msk.f32.vlgmr.msra.gmra.mrb[54].mxu1 %vm222_vm2, %v21340_v60  ;;  %v24660_v60 = vpop.permute.xlu1 %7179 }
  0xfc   : > { %22837 = vmatmul.mubr.msk.f32.vlgmr.msra.gmra.mrb[56].mxu0 %vm222_vm2, %v21365_v15  ;;  %22839 = vmatprep.subr.mxu1 %v23937_v0 }
  0xfd   : > { %22840 = vmatpush3.msk.msra.mxu1 %vm226_vm1, %v4578_v5  ;;  %22844 = vmatprep.subr.mxu0 %v23937_v0  ;;  %v7405_v5 = vpop.permute.xlu0 %7404 }
  0xfe   : > { %22841 = vmatprep.mubr.msk.f32.mxu1 %vm23938_vm0, %v23937_v0  ;;  %22845 = vmatpush3.msk.msra.mxu0 %vm226_vm1, %v4653_v8  ;;  %v21609_v8 = vld [vmem:[%s23987_s20 + $0x58] sm:$0xf] }
  0xff   : > { %22846 = vmatprep.mubr.msk.f32.mxu0 %vm23938_vm0, %v23937_v0  ;;  %22842 = vmatmul.mubr.msk.f32.vlgmr.msra.gmra.mrb[56].mxu1 %vm222_vm2, %v21365_v15  ;;  %v7330_v4 = vpop.permute.xlu1 %7329 }
 0x100   : > { %22847 = vmatmul.mubr.msk.f32.vlgmr.msra.gmra.mrb[58].mxu0 %vm222_vm2, %v21365_v15  ;;  %22849 = vmatprep.subr.mxu1 %v23937_v0 }
 0x101   : > { %22850 = vmatpush3.msk.msra.mxu1 %vm226_vm1, %v4728_v12  ;;  %22854 = vmatprep.subr.mxu0 %v23937_v0  ;;  %v7573_v12 = vpop.permute.xlu0 %7572 }
 0x102   : > { %22851 = vmatprep.mubr.msk.f32.mxu1 %vm23938_vm0, %v23937_v0  ;;  %22855 = vmatpush3.msk.msra.mxu0 %vm226_vm1, %v4803_v13  ;;  %v21611_v13 = vld [vmem:[%s23987_s20 + $0x60] sm:$0xf] }
 0x103   : > { %22856 = vmatprep.mubr.msk.f32.mxu0 %vm23938_vm0, %v23937_v0  ;;  %22852 = vmatmul.mubr.msk.f32.vlgmr.msra.gmra.mrb[58].mxu1 %vm222_vm2, %v21365_v15  ;;  %v7480_v10 = vpop.permute.xlu1 %7479 }
 0x104   : > { %22857 = vmatmul.mubr.msk.f32.vlgmr.msra.gmra.mrb[60].mxu0 %vm222_vm2, %v21365_v15  ;;  %22859 = vmatprep.subr.mxu1 %v23937_v0 }
 0x105   : > { %22860 = vmatpush3.msk.msra.mxu1 %vm226_vm1, %v4878_v16  ;;  %22864 = vmatprep.subr.mxu0 %v23937_v0  ;;  %v7726_v16 = vpop.permute.xlu0 %7725 }
 0x106   : > { %22861 = vmatprep.mubr.msk.f32.mxu1 %vm23938_vm0, %v23937_v0  ;;  %22865 = vmatpush3.msk.msra.mxu0 %vm226_vm1, %v4953_v17  ;;  %v21613_v17 = vld [vmem:[%s23987_s20 + $0x68] sm:$0xf] }
 0x107   : > { %22866 = vmatprep.mubr.msk.f32.mxu0 %vm23938_vm0, %v23937_v0  ;;  %22862 = vmatmul.mubr.msk.f32.vlgmr.msra.gmra.mrb[60].mxu1 %vm222_vm2, %v21365_v15 }
 0x108   : > { %22867 = vmatmul.mubr.msk.f32.vlgmr.msra.gmra.mrb[62].mxu0 %vm222_vm2, %v21365_v15  ;;  %22869 = vmatprep.subr.mxu1 %v23937_v0 }
 0x109   : > { %22870 = vmatpush3.msk.msra.mxu1 %vm226_vm1, %v5028_v18  ;;  %22874 = vmatprep.subr.mxu0 %v23937_v0  ;;  %v21614_v18 = vld [vmem:[%s23987_s20 + $0x6c] sm:$0xf] }
 0x10a   : > { %22871 = vmatprep.mubr.msk.f32.mxu1 %vm23938_vm0, %v23937_v0  ;;  %22875 = vmatpush3.msk.msra.mxu0 %vm226_vm1, %v5121_v19 }
 0x10b   : > { %22876 = vmatprep.mubr.msk.f32.mxu0 %vm23938_vm0, %v23937_v0  ;;  %22872 = vmatmul.mubr.msk.f32.vlgmr.msra.gmra.mrb[62].mxu1 %vm222_vm2, %v21365_v15  ;;  %v7651_v15 = vpop.permute.xlu1 %7650 }
 0x10c   : > { %22877 = vmatmul.mubr.msk.f32.vlgmr.msra.gmra.mrb[64].mxu0 %vm222_vm2, %v21390_v22  ;;  %22879 = vmatprep.subr.mxu1 %v23937_v0 }
 0x10d   : > { %22880 = vmatpush3.msk.msra.mxu1 %vm226_vm1, %v5199_v20  ;;  %22884 = vmatprep.subr.mxu0 %v23937_v0 }
 0x10e   : > { %22881 = vmatprep.mubr.msk.f32.mxu1 %vm23938_vm0, %v23937_v0  ;;  %22885 = vmatpush3.msk.msra.mxu0 %vm226_vm1, %v5274_v21 }
 0x10f   : > { %22886 = vmatprep.mubr.msk.f32.mxu0 %vm23938_vm0, %v23937_v0  ;;  %22882 = vmatmul.mubr.msk.f32.vlgmr.msra.gmra.mrb[64].mxu1 %vm222_vm2, %v21390_v22  ;;  %v7801_v19 = vpop.permute.xlu1 %7800 }
 0x110   : > { %22887 = vmatmul.mubr.msk.f32.vlgmr.msra.gmra.mrb[66].mxu0 %vm222_vm2, %v21390_v22  ;;  %22889 = vmatprep.subr.mxu1 %v23937_v0 }
 0x111   : > { %22890 = vmatpush3.msk.msra.mxu1 %vm226_vm1, %v5349_v23  ;;  %22894 = vmatprep.subr.mxu0 %v23937_v0 }
 0x112   : > { %22891 = vmatprep.mubr.msk.f32.mxu1 %vm23938_vm0, %v23937_v0  ;;  %22895 = vmatpush3.msk.msra.mxu0 %vm226_vm1, %v5424_v24 }
 0x113   : > { %22896 = vmatprep.mubr.msk.f32.mxu0 %vm23938_vm0, %v23937_v0  ;;  %22892 = vmatmul.mubr.msk.f32.vlgmr.msra.gmra.mrb[66].mxu1 %vm222_vm2, %v21390_v22 }
 0x114   : > { %22897 = vmatmul.mubr.msk.f32.vlgmr.msra.gmra.mrb[68].mxu0 %vm222_vm2, %v21390_v22  ;;  %22899 = vmatprep.subr.mxu1 %v23937_v0 }
 0x115   : > { %22900 = vmatpush3.msk.msra.mxu1 %vm226_vm1, %v5499_v25  ;;  %22904 = vmatprep.subr.mxu0 %v23937_v0 }
 0x116   : > { %22901 = vmatprep.mubr.msk.f32.mxu1 %vm23938_vm0, %v23937_v0  ;;  %22905 = vmatpush3.msk.msra.mxu0 %vm226_vm1, %v5574_v26 }
 0x117   : > { %22906 = vmatprep.mubr.msk.f32.mxu0 %vm23938_vm0, %v23937_v0  ;;  %10024 = vrot.lane.b32.xlu0 %v21557_v27, %s23939_s21 }
 0x118   : > { %22902 = vmatmul.mubr.msk.f32.vlgmr.msra.gmra.mrb[68].mxu1 %vm222_vm2, %v21390_v22  ;;  %22907 = vmatmul.mubr.msk.f32.vlgmr.msra.gmra.mrb[70].mxu0 %vm222_vm2, %v21390_v22 }
 0x119   : > { %22909 = vmatprep.subr.mxu1 %v23937_v0  ;;  %10102 = vrot.lane.b32.xlu1 %v21558_v28, %s23939_s21 }
 0x11a   : > { %22910 = vmatpush3.msk.msra.mxu1 %vm226_vm1, %v5649_v29  ;;  %22914 = vmatprep.subr.mxu0 %v23937_v0 }
 0x11b   : > { %22911 = vmatprep.mubr.msk.f32.mxu1 %vm23938_vm0, %v23937_v0  ;;  %22915 = vmatpush3.msk.msra.mxu0 %vm226_vm1, %v5730_v30 }
 0x11c   : > { %22916 = vmatprep.mubr.msk.f32.mxu0 %vm23938_vm0, %v23937_v0  ;;  %10177 = vrot.lane.b32.xlu0 %v21559_v31, %s23939_s21 }
 0x11d   : > { %22912 = vmatmul.mubr.msk.f32.vlgmr.msra.gmra.mrb[70].mxu1 %vm222_vm2, %v21390_v22  ;;  %22917 = vmatmul.mubr.msk.f32.vlgmr.msra.gmra.mrb[72].mxu0 %vm222_vm2, %v24545_v32  ;;  %v21473_v22 = vld [vmem:[%s26717_s2 + $0xc] sm:$0xf] }
 0x11e   : > { %22919 = vmatprep.subr.mxu1 %v23937_v0  ;;  %10252 = vrot.lane.b32.xlu1 %v21560_v33, %s23939_s21 }
 0x11f   : > { %22920 = vmatpush3.msk.msra.mxu1 %vm226_vm1, %v5731_v34  ;;  %22924 = vmatprep.subr.mxu0 %v23937_v0 }
 0x120   : > { %22921 = vmatprep.mubr.msk.f32.mxu1 %vm23938_vm0, %v23937_v0  ;;  %22925 = vmatpush3.msk.msra.mxu0 %vm226_vm1, %v5732_v35 }
 0x121   : > { %22926 = vmatprep.mubr.msk.f32.mxu0 %vm23938_vm0, %v23937_v0  ;;  %10327 = vrot.lane.b32.xlu0 %v21561_v36, %s23939_s21 }
 0x122   : > { %22922 = vmatmul.mubr.msk.f32.vlgmr.msra.gmra.mrb[72].mxu1 %vm222_vm2, %v24545_v32  ;;  %22927 = vmatmul.mubr.msk.f32.vlgmr.msra.gmra.mrb[74].mxu0 %vm222_vm2, %v24545_v32 }
 0x123   : > { %22929 = vmatprep.subr.mxu1 %v23937_v0  ;;  %10402 = vrot.lane.b32.xlu1 %v21562_v37, %s23939_s21 }
 0x124   : > { %22930 = vmatpush3.msk.msra.mxu1 %vm226_vm1, %v5733_v38  ;;  %22934 = vmatprep.subr.mxu0 %v23937_v0  ;;  %v24807_v38 = vld [vmem:[%s26717_s2 + $0x10] sm:$0xf] }
 0x125   : > { %22931 = vmatprep.mubr.msk.f32.mxu1 %vm23938_vm0, %v23937_v0  ;;  %22935 = vmatpush3.msk.msra.mxu0 %vm226_vm1, %v5734_v39 }
 0x126   : > { %22936 = vmatprep.mubr.msk.f32.mxu0 %vm23938_vm0, %v23937_v0  ;;  %10477 = vrot.lane.b32.xlu0 %v21563_v40, %s23939_s21 }
 0x127   : > { %22932 = vmatmul.mubr.msk.f32.vlgmr.msra.gmra.mrb[74].mxu1 %vm222_vm2, %v24545_v32  ;;  %22937 = vmatmul.mubr.msk.f32.vlgmr.msra.gmra.mrb[76].mxu0 %vm222_vm2, %v24545_v32 }
 0x128   : > { %22939 = vmatprep.subr.mxu1 %v23937_v0  ;;  %10552 = vrot.lane.b32.xlu1 %v21564_v41, %s23939_s21 }
 0x129   : > { %22940 = vmatpush3.msk.msra.mxu1 %vm226_vm1, %v5735_v42  ;;  %22944 = vmatprep.subr.mxu0 %v23937_v0 }
 0x12a   : > { %22941 = vmatprep.mubr.msk.f32.mxu1 %vm23938_vm0, %v23937_v0  ;;  %22945 = vmatpush3.msk.msra.mxu0 %vm226_vm1, %v5736_v43 }
 0x12b   : > { %22946 = vmatprep.mubr.msk.f32.mxu0 %vm23938_vm0, %v23937_v0  ;;  %10645 = vrot.lane.b32.xlu0 %v21582_v44, %s23939_s21 }
 0x12c   : > { %22942 = vmatmul.mubr.msk.f32.vlgmr.msra.gmra.mrb[76].mxu1 %vm222_vm2, %v24545_v32  ;;  %22947 = vmatmul.mubr.msk.f32.vlgmr.msra.gmra.mrb[78].mxu0 %vm222_vm2, %v24545_v32 }
 0x12d   : > { %22949 = vmatprep.subr.mxu1 %v23937_v0  ;;  %10723 = vrot.lane.b32.xlu1 %v21583_v45, %s23939_s21 }
 0x12e   : > { %22950 = vmatpush3.msk.msra.mxu1 %vm226_vm1, %v5737_v46  ;;  %22954 = vmatprep.subr.mxu0 %v23937_v0 }
 0x12f   : > { %22951 = vmatprep.mubr.msk.f32.mxu1 %vm23938_vm0, %v23937_v0  ;;  %22955 = vmatpush3.msk.msra.mxu0 %vm226_vm1, %v21423_v48 }
 0x130   : > { %22956 = vmatprep.mubr.msk.f32.mxu0 %vm23938_vm0, %v23937_v0  ;;  %10798 = vrot.lane.b32.xlu0 %v21584_v49, %s23939_s21 }
 0x131   : > { %22952 = vmatmul.mubr.msk.f32.vlgmr.msra.gmra.mrb[78].mxu1 %vm222_vm2, %v24545_v32  ;;  %22957 = vmatmul.mubr.msk.f32.vlgmr.msra.gmra.mrb[80].mxu0 %vm222_vm2, %v24623_v50 }
 0x132   : > { %22959 = vmatprep.subr.mxu1 %v23937_v0  ;;  %10873 = vrot.lane.b32.xlu1 %v21585_v51, %s23939_s21 }
 0x133   : > { %22960 = vmatpush3.msk.msra.mxu1 %vm226_vm1, %v21424_v52  ;;  %22964 = vmatprep.subr.mxu0 %v23937_v0 }
 0x134   : > { %22961 = vmatprep.mubr.msk.f32.mxu1 %vm23938_vm0, %v23937_v0  ;;  %22965 = vmatpush3.msk.msra.mxu0 %vm226_vm1, %v21425_v54 }
 0x135   : > { %22966 = vmatprep.mubr.msk.f32.mxu0 %vm23938_vm0, %v23937_v0  ;;  %10948 = vrot.lane.b32.xlu0 %v21586_v56, %s23939_s21 }
 0x136   : > { %22962 = vmatmul.mubr.msk.f32.vlgmr.msra.gmra.mrb[80].mxu1 %vm222_vm2, %v24623_v50  ;;  %22967 = vmatmul.mubr.msk.f32.vlgmr.msra.gmra.mrb[82].mxu0 %vm222_vm2, %v24623_v50 }
 0x137   : > { %22969 = vmatprep.subr.mxu1 %v23937_v0  ;;  %11023 = vrot.lane.b32.xlu1 %v21587_v57, %s23939_s21 }
 0x138   : > { %22970 = vmatpush3.msk.msra.mxu1 %vm226_vm1, %v21426_v58  ;;  %22974 = vmatprep.subr.mxu0 %v23937_v0  ;;  %v21682_v58 = vld [vmem:[%s23987_s20 + $0x4] sm:$0xf] }
 0x139   : > { %22971 = vmatprep.mubr.msk.f32.mxu1 %vm23938_vm0, %v23937_v0  ;;  %22975 = vmatpush3.msk.msra.mxu0 %vm226_vm1, %v21427_v59 }
 0x13a   : > { %22976 = vmatprep.mubr.msk.f32.mxu0 %vm23938_vm0, %v23937_v0  ;;  %11098 = vrot.lane.b32.xlu0 %v21588_v61, %s23939_s21  ;;  %v21683_v61 = vld [vmem:[%s23987_s20 + $0x8] sm:$0xf] }
 0x13b   : > { %22972 = vmatmul.mubr.msk.f32.vlgmr.msra.gmra.mrb[82].mxu1 %vm222_vm2, %v24623_v50  ;;  %22977 = vmatmul.mubr.msk.f32.vlgmr.msra.gmra.mrb[84].mxu0 %vm222_vm2, %v24623_v50 }
 0x13c   : > { %22979 = vmatprep.subr.mxu1 %v23937_v0  ;;  %11173 = vrot.lane.b32.xlu1 %v21589_v63, %s23939_s21 }
 0x13d   : > { %22980 = vmatpush3.msk.msra.mxu1 %vm226_vm1, %v21428_v1  ;;  %22984 = vmatprep.subr.mxu0 %v23937_v0 }
 0x13e   : > { %22981 = vmatprep.mubr.msk.f32.mxu1 %vm23938_vm0, %v23937_v0  ;;  %22985 = vmatpush3.msk.msra.mxu0 %vm226_vm1, %v21429_v2 }
 0x13f   : > { %22986 = vmatprep.mubr.msk.f32.mxu0 %vm23938_vm0, %v23937_v0  ;;  %11266 = vrot.lane.b32.xlu0 %v21607_v3, %s23940_s8 }
 0x140   : > { %22982 = vmatmul.mubr.msk.f32.vlgmr.msra.gmra.mrb[84].mxu1 %vm222_vm2, %v24623_v50  ;;  %22987 = vmatmul.mubr.msk.f32.vlgmr.msra.gmra.mrb[86].mxu0 %vm222_vm2, %v24623_v50 }
 0x141   : > { %22989 = vmatprep.subr.mxu1 %v23937_v0  ;;  %11344 = vrot.lane.b32.xlu1 %v21608_v6, %s23940_s8 }
 0x142   : > { %22990 = vmatpush3.msk.msra.mxu1 %vm226_vm1, %v21430_v7  ;;  %22994 = vmatprep.subr.mxu0 %v23937_v0 }
 0x143   : > { %22991 = vmatprep.mubr.msk.f32.mxu1 %vm23938_vm0, %v23937_v0  ;;  %22995 = vmatpush3.msk.msra.mxu0 %vm226_vm1, %v24608_v47 }
 0x144   : > { %22996 = vmatprep.mubr.msk.f32.mxu0 %vm23938_vm0, %v23937_v0  ;;  %11419 = vrot.lane.b32.xlu0 %v21609_v8, %s23940_s8  ;;  %v24881_v8 = vld [vmem:[%s26717_s2 + $0x14] sm:$0xf] }
 0x145   : > { %22992 = vmatmul.mubr.msk.f32.vlgmr.msra.gmra.mrb[86].mxu1 %vm222_vm2, %v24623_v50  ;;  %22997 = vmatmul.mubr.msk.f32.vlgmr.msra.gmra.mrb[88].mxu0 %vm222_vm2, %v21448_v9 }
 0x146   : > { %22999 = vmatprep.subr.mxu1 %v23937_v0  ;;  %11494 = vrot.lane.b32.xlu1 %v21610_v11, %s23940_s8 }
 0x147   : > { %23000 = vmatpush3.msk.msra.mxu1 %vm226_vm1, %v24633_v53  ;;  %23004 = vmatprep.subr.mxu0 %v23937_v0 }
 0x148   : > { %23001 = vmatprep.mubr.msk.f32.mxu1 %vm23938_vm0, %v23937_v0  ;;  %23005 = vmatpush3.msk.msra.mxu0 %vm226_vm1, %v24640_v55 }
 0x149   : > { %23006 = vmatprep.mubr.msk.f32.mxu0 %vm23938_vm0, %v23937_v0  ;;  %11569 = vrot.lane.b32.xlu0 %v21611_v13, %s23940_s8  ;;  %v21685_v13 = vld [vmem:[%s23987_s20 + $0x10] sm:$0xf] }
 0x14a   : > { %23002 = vmatmul.mubr.msk.f32.vlgmr.msra.gmra.mrb[88].mxu1 %vm222_vm2, %v21448_v9  ;;  %23007 = vmatmul.mubr.msk.f32.vlgmr.msra.gmra.mrb[90].mxu0 %vm222_vm2, %v21448_v9 }
 0x14b   : > { %23009 = vmatprep.subr.mxu1 %v23937_v0  ;;  %11644 = vrot.lane.b32.xlu1 %v21612_v14, %s23940_s8  ;;  %v7876_v20 = vpop.permute.xlu0 %7875  ;;  %v21508_v14 = vld [vmem:[%s23987_s20 + $0x54] sm:$0xf] }
 0x14c   : > { %23010 = vmatpush3.msk.msra.mxu1 %vm226_vm1, %v24660_v60  ;;  %23014 = vmatprep.subr.mxu0 %v23937_v0 }
 0x14d   : > { %23011 = vmatprep.mubr.msk.f32.mxu1 %vm23938_vm0, %v23937_v0  ;;  %23015 = vmatpush3.msk.msra.mxu0 %vm226_vm1, %v7255_v62  ;;  %v7951_v21 = vpop.permute.xlu1 %7950 }
 0x14e   : > { %23016 = vmatprep.mubr.msk.f32.mxu0 %vm23938_vm0, %v23937_v0  ;;  %11719 = vrot.lane.b32.xlu0 %v21613_v17, %s23940_s8 }
 0x14f   : > { %23012 = vmatmul.mubr.msk.f32.vlgmr.msra.gmra.mrb[90].mxu1 %vm222_vm2, %v21448_v9  ;;  %23017 = vmatmul.mubr.msk.f32.vlgmr.msra.gmra.mrb[92].mxu0 %vm222_vm2, %v21448_v9 }
 0x150   : > { %23019 = vmatprep.subr.mxu1 %v23937_v0  ;;  %11794 = vrot.lane.b32.xlu1 %v21614_v18, %s23940_s8  ;;  %v8026_v23 = vpop.permute.xlu0 %8025  ;;  %v21686_v18 = vld [vmem:[%s23987_s20 + $0x14] sm:$0xf] }
 0x151   : > { %23020 = vmatpush3.msk.msra.mxu1 %vm226_vm1, %v7330_v4  ;;  %23024 = vmatprep.subr.mxu0 %v23937_v0  ;;  %v21507_v4 = vld [vmem:[%s23987_s20 + $0x50] sm:$0xf] }
 0x152   : > { %23021 = vmatprep.mubr.msk.f32.mxu1 %vm23938_vm0, %v23937_v0  ;;  %23025 = vmatpush3.msk.msra.mxu0 %vm226_vm1, %v7405_v5  ;;  %v8101_v25 = vpop.permute.xlu1 %8100  ;;  %v21684_v5 = vld [vmem:[%s23987_s20 + $0xc] sm:$0xf] }
 0x153   : > { %23026 = vmatprep.mubr.msk.f32.mxu0 %vm23938_vm0, %v23937_v0  ;;  %23022 = vmatmul.mubr.msk.f32.vlgmr.msra.gmra.mrb[92].mxu1 %vm222_vm2, %v21448_v9 }
 0x154   : > { %23027 = vmatmul.mubr.msk.f32.vlgmr.msra.gmra.mrb[94].mxu0 %vm222_vm2, %v21448_v9  ;;  %23029 = vmatprep.subr.mxu1 %v23937_v0 }
 0x155   : > { %23030 = vmatpush3.msk.msra.mxu1 %vm226_vm1, %v7480_v10  ;;  %23034 = vmatprep.subr.mxu0 %v23937_v0  ;;  %v8194_v27 = vpop.permute.xlu0 %8193 }
 0x156   : > { %23031 = vmatprep.mubr.msk.f32.mxu1 %vm23938_vm0, %v23937_v0  ;;  %23035 = vmatpush3.msk.msra.mxu0 %vm226_vm1, %v7573_v12 }
 0x157   : > { %23036 = vmatprep.mubr.msk.f32.mxu0 %vm23938_vm0, %v23937_v0  ;;  %23032 = vmatmul.mubr.msk.f32.vlgmr.msra.gmra.mrb[94].mxu1 %vm222_vm2, %v21448_v9  ;;  %v8272_v32 = vpop.permute.xlu1 %8271 }
 0x158   : > { %23037 = vmatmul.mubr.msk.f32.vlgmr.msra.gmra.mrb[96].mxu0 %vm222_vm2, %v21473_v22  ;;  %23039 = vmatprep.subr.mxu1 %v23937_v0 }
 0x159   : > { %23040 = vmatpush3.msk.msra.mxu1 %vm226_vm1, %v7651_v15  ;;  %23044 = vmatprep.subr.mxu0 %v23937_v0  ;;  %v295_v24 = vpop.f32.mrb[0].mxu0  ;;  %v21509_v15 = vld [vmem:[%s23987_s20 + $0x58] sm:$0xf] }
 0x15a   : > { %23041 = vmatprep.mubr.msk.f32.mxu1 %vm23938_vm0, %v23937_v0  ;;  %23045 = vmatpush3.msk.msra.mxu0 %vm226_vm1, %v7726_v16  ;;  %v22558_v26 = vpop.f32.mrb[1].mxu0  ;;  %v8347_v33 = vpop.permute.xlu0 %8346 }
 0x15b   : > { %23046 = vmatprep.mubr.msk.f32.mxu0 %vm23938_vm0, %v23937_v0  ;;  %23042 = vmatmul.mubr.msk.f32.vlgmr.msra.gmra.mrb[96].mxu1 %vm222_vm2, %v21473_v22 }
 0x15c   : > { %23047 = vmatmul.mubr.msk.f32.vlgmr.msra.gmra.mrb[98].mxu0 %vm222_vm2, %v21473_v22  ;;  %23049 = vmatprep.subr.mxu1 %v23937_v0  ;;  %v8422_v41 = vpop.permute.xlu1 %8421 }
 0x15d   : > { %23050 = vmatpush3.msk.msra.mxu1 %vm226_vm1, %v7801_v19  ;;  %23054 = vmatprep.subr.mxu0 %v23937_v0  ;;  %v370_v28 = vpop.f32.mrb[0].mxu1  ;;  %v445_v29 = vpop.f32.mrb[2].mxu0 }
 0x15e   : > { %23051 = vmatprep.mubr.msk.f32.mxu1 %vm23938_vm0, %v23937_v0  ;;  %23055 = vmatpush3.msk.msra.mxu0 %vm226_vm1, %v7876_v20  ;;  %v22563_v30 = vpop.f32.mrb[1].mxu1  ;;  %v22568_v31 = vpop.f32.mrb[3].mxu0 }
 0x15f   : > { %23056 = vmatprep.mubr.msk.f32.mxu0 %vm23938_vm0, %v23937_v0  ;;  %23052 = vmatmul.mubr.msk.f32.vlgmr.msra.gmra.mrb[98].mxu1 %vm222_vm2, %v21473_v22  ;;  %v8497_v44 = vpop.permute.xlu0 %8496 }
 0x160   : > { %23057 = vmatmul.mubr.msk.f32.vlgmr.msra.gmra.mrb[100].mxu0 %vm222_vm2, %v21473_v22  ;;  %23059 = vmatprep.subr.mxu1 %v23937_v0 }
 0x161   : > { %23060 = vmatpush3.msk.msra.mxu1 %vm226_vm1, %v7951_v21  ;;  %23064 = vmatprep.subr.mxu0 %v23937_v0  ;;  %v520_v34 = vpop.f32.mrb[2].mxu1  ;;  %v595_v36 = vpop.f32.mrb[4].mxu0 }
 0x162   : > { %23061 = vmatprep.mubr.msk.f32.mxu1 %vm23938_vm0, %v23937_v0  ;;  %23065 = vmatpush3.msk.msra.mxu0 %vm226_vm1, %v8026_v23  ;;  %v22573_v35 = vpop.f32.mrb[3].mxu1  ;;  %v22578_v37 = vpop.f32.mrb[5].mxu0  ;;  %v21687_v23 = vld [vmem:[%s23987_s20 + $0x18] sm:$0xf] }
 0x163   : > { %23066 = vmatprep.mubr.msk.f32.mxu0 %vm23938_vm0, %v23937_v0  ;;  %23062 = vmatmul.mubr.msk.f32.vlgmr.msra.gmra.mrb[100].mxu1 %vm222_vm2, %v21473_v22  ;;  %v8572_v50 = vpop.permute.xlu1 %8571 }
 0x164   : > { %23067 = vmatmul.mubr.msk.f32.vlgmr.msra.gmra.mrb[102].mxu0 %vm222_vm2, %v21473_v22  ;;  %23069 = vmatprep.subr.mxu1 %v23937_v0  ;;  %v8647_v57 = vpop.permute.xlu0 %8646 }
 0x165   : > { %23070 = vmatpush3.msk.msra.mxu1 %vm226_vm1, %v8101_v25  ;;  %23074 = vmatprep.subr.mxu0 %v23937_v0  ;;  %v24809_v39 = vpop.f32.mrb[4].mxu1  ;;  %v24811_v40 = vpop.f32.mrb[6].mxu0 }
 0x166   : > { %23071 = vmatprep.mubr.msk.f32.mxu1 %vm23938_vm0, %v23937_v0  ;;  %23075 = vmatpush3.msk.msra.mxu0 %vm226_vm1, %v8194_v27  ;;  %v22583_v42 = vpop.f32.mrb[5].mxu1  ;;  %v22588_v43 = vpop.f32.mrb[7].mxu0  ;;  %v21511_v27 = vld [vmem:[%s23987_s20 + $0x60] sm:$0xf] }
 0x167   : > { %23076 = vmatprep.mubr.msk.f32.mxu0 %vm23938_vm0, %v23937_v0  ;;  %23072 = vmatmul.mubr.msk.f32.vlgmr.msra.gmra.mrb[102].mxu1 %vm222_vm2, %v21473_v22  ;;  %v8722_v3 = vpop.permute.xlu1 %8721  ;;  %v21707_v42 = vld [vmem:[%s23987_s20 + $0x2c] sm:$0xf] }
 0x168   : > { %23077 = vmatmul.mubr.msk.f32.vlgmr.msra.gmra.mrb[104].mxu0 %vm222_vm2, %v24807_v38  ;;  %23079 = vmatprep.subr.mxu1 %v23937_v0 }
 0x169   : > { %23080 = vmatpush3.msk.msra.mxu1 %vm226_vm1, %v8272_v32  ;;  %23084 = vmatprep.subr.mxu0 %v23937_v0  ;;  %v24824_v45 = vpop.f32.mrb[6].mxu1  ;;  %v896_v46 = vpop.f32.mrb[8].mxu0  ;;  %v21688_v32 = vld [vmem:[%s23987_s20 + $0x1c] sm:$0xf] }
 0x16a   : > { %23081 = vmatprep.mubr.msk.f32.mxu1 %vm23938_vm0, %v23937_v0  ;;  %23085 = vmatpush3.msk.msra.mxu0 %vm226_vm1, %v8347_v33  ;;  %v24829_v47 = vadd.f32 %v896_v46, %v295_v24  ;;  %v22593_v48 = vpop.f32.mrb[7].mxu1  ;;  %v22598_v49 = vpop.f32.mrb[9].mxu0  ;;  %v21510_v24 = vld [vmem:[%s23987_s20 + $0x5c] sm:$0xf]  ;;  %v21689_v33 = vld [vmem:[%s23987_s20 + $0x20] sm:$0xf] }
 0x16b   : > { %23086 = vmatprep.mubr.msk.f32.mxu0 %vm23938_vm0, %v23937_v0  ;;  %23082 = vmatmul.mubr.msk.f32.vlgmr.msra.gmra.mrb[104].mxu1 %vm222_vm2, %v24807_v38 }
 0x16c   : > { %23087 = vmatmul.mubr.msk.f32.vlgmr.msra.gmra.mrb[106].mxu0 %vm222_vm2, %v24807_v38  ;;  %23089 = vmatprep.subr.mxu1 %v23937_v0 }
 0x16d   : > { %23090 = vmatpush3.msk.msra.mxu1 %vm226_vm1, %v8422_v41  ;;  %23094 = vmatprep.subr.mxu0 %v23937_v0  ;;  %v969_v51 = vpop.f32.mrb[8].mxu1  ;;  %v1042_v52 = vpop.f32.mrb[10].mxu0  ;;  %v21513_v41 = vld [vmem:[%s23987_s20 + $0x68] sm:$0xf] }
 0x16e   : > { %23091 = vmatprep.mubr.msk.f32.mxu1 %vm23938_vm0, %v23937_v0  ;;  %23095 = vmatpush3.msk.msra.mxu0 %vm226_vm1, %v8497_v44  ;;  %v24843_v53 = vadd.f32 %v969_v51, %v370_v28  ;;  %v24845_v54 = vadd.f32 %v1042_v52, %v445_v29  ;;  %v22603_v55 = vpop.f32.mrb[9].mxu1  ;;  %v22608_v56 = vpop.f32.mrb[11].mxu0  ;;  %v21532_v51 = vld [vmem:[%s23987_s20 + $0x78] sm:$0xf]  ;;  %v21709_v52 = vld [vmem:[%s23987_s20 + $0x34] sm:$0xf] }
 0x16f   : > { %23096 = vmatprep.mubr.msk.f32.mxu0 %vm23938_vm0, %v23937_v0  ;;  %23092 = vmatmul.mubr.msk.f32.vlgmr.msra.gmra.mrb[106].mxu1 %vm222_vm2, %v24807_v38  ;;  %v24990_v55 = vld [vmem:[%s26717_s2 + $0x18] sm:$0xf] }
 0x170   : > { %23097 = vmatmul.mubr.msk.f32.vlgmr.msra.gmra.mrb[108].mxu0 %vm222_vm2, %v24807_v38  ;;  %23099 = vmatprep.subr.mxu1 %v23937_v0 }
 0x171   : > { %23100 = vmatpush3.msk.msra.mxu1 %vm226_vm1, %v8572_v50  ;;  %23104 = vmatprep.subr.mxu0 %v23937_v0  ;;  %v1115_v59 = vpop.f32.mrb[10].mxu1  ;;  %v1188_v60 = vpop.f32.mrb[12].mxu0  ;;  %v21514_v50 = vld [vmem:[%s23987_s20 + $0x6c] sm:$0xf] }
 0x172   : > { %23101 = vmatprep.mubr.msk.f32.mxu1 %vm23938_vm0, %v23937_v0  ;;  %23105 = vmatpush3.msk.msra.mxu0 %vm226_vm1, %v8647_v57  ;;  %v24861_v62 = vadd.f32 %v1115_v59, %v520_v34  ;;  %v24863_v63 = vadd.f32 %v1188_v60, %v595_v36  ;;  %v22613_v1 = vpop.f32.mrb[11].mxu1  ;;  %v22618_v2 = vpop.f32.mrb[13].mxu0  ;;  %v21512_v36 = vld [vmem:[%s23987_s20 + $0x64] sm:$0xf]  ;;  %v21710_v59 = vld [vmem:[%s23987_s20 + $0x38] sm:$0xf] }
 0x173   : > { %23106 = vmatprep.mubr.msk.f32.mxu0 %vm23938_vm0, %v23937_v0  ;;  %13097 = vrot.lane.b32.xlu0 %v21682_v58, %s23939_s21  ;;  %v21534_v1 = vld [vmem:[%s23987_s20 + $0x80] sm:$0xf] }
 0x174   : > { %23102 = vmatmul.mubr.msk.f32.vlgmr.msra.gmra.mrb[108].mxu1 %vm222_vm2, %v24807_v38  ;;  %23107 = vmatmul.mubr.msk.f32.vlgmr.msra.gmra.mrb[110].mxu0 %vm222_vm2, %v24807_v38 }
 0x175   : > { %23109 = vmatprep.subr.mxu1 %v23937_v0  ;;  %13175 = vrot.lane.b32.xlu1 %v21683_v61, %s23939_s21  ;;  %v1261_v6 = vpop.f32.mrb[12].mxu1  ;;  %v1334_v7 = vpop.f32.mrb[14].mxu0 }
 0x176   : > { %23110 = vmatpush3.msk.msra.mxu1 %vm226_vm1, %v8722_v3  ;;  %23114 = vmatprep.subr.mxu0 %v23937_v0  ;;  %v24884_v9 = vadd.f32 %v1261_v6, %v24809_v39  ;;  %v24887_v10 = vadd.f32 %v1334_v7, %v24811_v40  ;;  %v22623_v11 = vpop.f32.mrb[13].mxu1  ;;  %v22628_v12 = vpop.f32.mrb[15].mxu0 }
 0x177   : > { %23111 = vmatprep.mubr.msk.f32.mxu1 %vm23938_vm0, %v23937_v0  ;;  %23115 = vmatpush3.msk.msra.mxu0 %vm226_vm1, %v21507_v4  ;;  %v21711_v4 = vld [vmem:[%s23987_s20 + $0x3c] sm:$0xf]  ;;  %v21535_v12 = vld [vmem:[%s23987_s20 + $0x84] sm:$0xf] }
 0x178   : > { %23116 = vmatprep.mubr.msk.f32.mxu0 %vm23938_vm0, %v23937_v0  ;;  %13250 = vrot.lane.b32.xlu0 %v21684_v5, %s23939_s21 }
 0x179   : > { %23112 = vmatmul.mubr.msk.f32.vlgmr.msra.gmra.mrb[110].mxu1 %vm222_vm2, %v24807_v38  ;;  %23117 = vmatmul.mubr.msk.f32.vlgmr.msra.gmra.mrb[112].mxu0 %vm222_vm2, %v24881_v8  ;;  %v1407_v16 = vpop.f32.mrb[14].mxu1  ;;  %v1495_v17 = vpop.f32.mrb[16].mxu0 }
 0x17a   : > { %23119 = vmatprep.subr.mxu1 %v23937_v0  ;;  %13325 = vrot.lane.b32.xlu1 %v21685_v13, %s23939_s21  ;;  %v24906_v19 = vadd.f32 %v1407_v16, %v24824_v45  ;;  %v24909_v20 = vadd.f32 %v1495_v17, %v24829_v47  ;;  %v22633_v21 = vpop.f32.mrb[15].mxu1  ;;  %v22638_v22 = vpop.f32.mrb[17].mxu0  ;;  %v21708_v45 = vld [vmem:[%s23987_s20 + $0x30] sm:$0xf] }
 0x17b   : > { %23120 = vmatpush3.msk.msra.mxu1 %vm226_vm1, %v21508_v14  ;;  %23124 = vmatprep.subr.mxu0 %v23937_v0  ;;  %v21714_v22 = vld [vmem:[%s23987_s20 + $0x48] sm:$0xf] }
 0x17c   : > { %23121 = vmatprep.mubr.msk.f32.mxu1 %vm23938_vm0, %v23937_v0  ;;  %23125 = vmatpush3.msk.msra.mxu0 %vm226_vm1, %v21509_v15  ;;  %v21536_v15 = vld [vmem:[%s23987_s20 + $0x88] sm:$0xf] }
 0x17d   : > { %23126 = vmatprep.mubr.msk.f32.mxu0 %vm23938_vm0, %v23937_v0  ;;  %13400 = vrot.lane.b32.xlu0 %v21686_v18, %s23939_s21  ;;  %v1570_v25 = vpop.f32.mrb[16].mxu1  ;;  %v1645_v26 = vpop.f32.mrb[18].mxu0 }
 0x17e   : > { %23122 = vmatmul.mubr.msk.f32.vlgmr.msra.gmra.mrb[112].mxu1 %vm222_vm2, %v24881_v8  ;;  %23127 = vmatmul.mubr.msk.f32.vlgmr.msra.gmra.mrb[114].mxu0 %vm222_vm2, %v24881_v8  ;;  %v24927_v28 = vadd.f32 %v1570_v25, %v24843_v53  ;;  %v24930_v29 = vadd.f32 %v1645_v26, %v24845_v54  ;;  %v22643_v30 = vpop.f32.mrb[17].mxu1  ;;  %v22648_v31 = vpop.f32.mrb[19].mxu0  ;;  %v21537_v25 = vld [vmem:[%s23987_s20 + $0x8c] sm:$0xf] }
 0x17f   : > { %23129 = vmatprep.subr.mxu1 %v23937_v0  ;;  %13475 = vrot.lane.b32.xlu1 %v21687_v23, %s23939_s21 }
 0x180   : > { %23130 = vmatpush3.msk.msra.mxu1 %vm226_vm1, %v21510_v24  ;;  %23134 = vmatprep.subr.mxu0 %v23937_v0 }
 0x181   : > { %23131 = vmatprep.mubr.msk.f32.mxu1 %vm23938_vm0, %v23937_v0  ;;  %23135 = vmatpush3.msk.msra.mxu0 %vm226_vm1, %v21511_v27  ;;  %v1720_v34 = vpop.f32.mrb[18].mxu1  ;;  %v1795_v35 = vpop.f32.mrb[20].mxu0 }
 0x182   : > { %23136 = vmatprep.mubr.msk.f32.mxu0 %vm23938_vm0, %v23937_v0  ;;  %13550 = vrot.lane.b32.xlu0 %v21688_v32, %s23939_s21  ;;  %v24946_v37 = vadd.f32 %v1720_v34, %v24861_v62  ;;  %v24949_v38 = vadd.f32 %v1795_v35, %v24863_v63  ;;  %v22653_v39 = vpop.f32.mrb[19].mxu1  ;;  %v22658_v40 = vpop.f32.mrb[21].mxu0  ;;  %v21533_v63 = vld [vmem:[%s23987_s20 + $0x7c] sm:$0xf]  ;;  %v21732_v32 = vld [vmem:[%s23987_s20 + $0x4] sm:$0xf] }
 0x183   : > { %23132 = vmatmul.mubr.msk.f32.vlgmr.msra.gmra.mrb[114].mxu1 %vm222_vm2, %v24881_v8  ;;  %23137 = vmatmul.mubr.msk.f32.vlgmr.msra.gmra.mrb[116].mxu0 %vm222_vm2, %v24881_v8  ;;  %v21539_v40 = vld [vmem:[%s23987_s20 + $0x94] sm:$0xf] }
 0x184   : > { %23139 = vmatprep.subr.mxu1 %v23937_v0  ;;  %13625 = vrot.lane.b32.xlu1 %v21689_v33, %s23939_s21 }
 0x185   : > { %23140 = vmatpush3.msk.msra.mxu1 %vm226_vm1, %v21512_v36  ;;  %23144 = vmatprep.subr.mxu0 %v23937_v0  ;;  %v1870_v43 = vpop.f32.mrb[20].mxu1  ;;  %v1945_v44 = vpop.f32.mrb[22].mxu0  ;;  %v21733_v36 = vld [vmem:[%s23987_s20 + $0x8] sm:$0xf] }
 0x186   : > { %23141 = vmatprep.mubr.msk.f32.mxu1 %vm23938_vm0, %v23937_v0  ;;  %23145 = vmatpush3.msk.msra.mxu0 %vm226_vm1, %v21513_v41  ;;  %v24966_v46 = vadd.f32 %v1870_v43, %v24884_v9  ;;  %v24969_v47 = vadd.f32 %v1945_v44, %v24887_v10  ;;  %v22663_v48 = vpop.f32.mrb[21].mxu1  ;;  %v22668_v49 = vpop.f32.mrb[23].mxu0  ;;  %v21712_v10 = vld [vmem:[%s23987_s20 + $0x40] sm:$0xf]  ;;  %v21734_v43 = vld [vmem:[%s23987_s20 + $0xc] sm:$0xf] }
 0x187   : > { %23146 = vmatprep.mubr.msk.f32.mxu0 %vm23938_vm0, %v23937_v0  ;;  %13718 = vrot.lane.b32.xlu0 %v21707_v42, %s23939_s21 }
 0x188   : > { %23142 = vmatmul.mubr.msk.f32.vlgmr.msra.gmra.mrb[116].mxu1 %vm222_vm2, %v24881_v8  ;;  %23147 = vmatmul.mubr.msk.f32.vlgmr.msra.gmra.mrb[118].mxu0 %vm222_vm2, %v24881_v8 }
 0x189   : > { %23149 = vmatprep.subr.mxu1 %v23937_v0  ;;  %13796 = vrot.lane.b32.xlu1 %v21708_v45, %s23939_s21  ;;  %v24983_v53 = vpop.permute.xlu0 %10024  ;;  %v2020_v54 = vpop.f32.mrb[22].mxu1 }
 0x18a   : > { %23150 = vmatpush3.msk.msra.mxu1 %vm226_vm1, %v21514_v50  ;;  %23154 = vmatprep.subr.mxu0 %v23937_v0  ;;  %v24993_v56 = vadd.f32 %v2020_v54, %v24906_v19  ;;  %v2115_v57 = vpop.f32.mrb[24].mxu0  ;;  %v22673_v58 = vpop.f32.mrb[23].mxu1  ;;  %v21735_v50 = vld [vmem:[%s23987_s20 + $0x10] sm:$0xf] }
 0x18b   : > { %23151 = vmatprep.mubr.msk.f32.mxu1 %vm23938_vm0, %v23937_v0  ;;  %23155 = vmatpush3.msk.msra.mxu0 %vm226_vm1, %v21532_v51  ;;  %v24999_v60 = vpop.permute.xlu1 %10102  ;;  %v25002_v61 = vadd.f32 %v2115_v57, %v24909_v20  ;;  %v22678_v62 = vpop.f32.mrb[25].mxu0  ;;  %v21713_v20 = vld [vmem:[%s23987_s20 + $0x44] sm:$0xf] }
 0x18c   : > { %23156 = vmatprep.mubr.msk.f32.mxu0 %vm23938_vm0, %v23937_v0  ;;  %13871 = vrot.lane.b32.xlu0 %v21709_v52, %s23939_s21  ;;  %v21737_v62 = vld [vmem:[%s23987_s20 + $0x18] sm:$0xf] }
 0x18d   : > { %23152 = vmatmul.mubr.msk.f32.vlgmr.msra.gmra.mrb[118].mxu1 %vm222_vm2, %v24881_v8  ;;  %23157 = vmatmul.mubr.msk.f32.vlgmr.msra.gmra.mrb[120].mxu0 %vm222_vm2, %v24990_v55  ;;  %v2188_v2 = vpop.f32.mrb[24].mxu1  ;;  %v2261_v3 = vpop.f32.mrb[26].mxu0 }
 0x18e   : > { %23159 = vmatprep.subr.mxu1 %v23937_v0  ;;  %13946 = vrot.lane.b32.xlu1 %v21710_v59, %s23939_s21  ;;  %v25016_v5 = vpop.permute.xlu0 %10177  ;;  %v25019_v6 = vadd.f32 %v2188_v2, %v24927_v28  ;;  %v25022_v7 = vadd.f32 %v2261_v3, %v24930_v29  ;;  %v22683_v8 = vpop.f32.mrb[25].mxu1  ;;  %v21538_v29 = vld [vmem:[%s23987_s20 + $0x90] sm:$0xf] }
 0x18f   : > { %23160 = vmatpush3.msk.msra.mxu1 %vm226_vm1, %v21533_v63  ;;  %23164 = vmatprep.subr.mxu0 %v23937_v0  ;;  %v22688_v9 = vpop.f32.mrb[27].mxu0 }
 0x190   : > { %23161 = vmatprep.mubr.msk.f32.mxu1 %vm23938_vm0, %v23937_v0  ;;  %23165 = vmatpush3.msk.msra.mxu0 %vm226_vm1, %v21534_v1  ;;  %v25030_v11 = vpop.permute.xlu1 %10252 }
 0x191   : > { %23166 = vmatprep.mubr.msk.f32.mxu0 %vm23938_vm0, %v23937_v0  ;;  %14021 = vrot.lane.b32.xlu0 %v21711_v4, %s23939_s21  ;;  %v2334_v13 = vpop.f32.mrb[26].mxu1  ;;  %v2407_v14 = vpop.f32.mrb[28].mxu0 }
 0x192   : > { %23162 = vmatmul.mubr.msk.f32.vlgmr.msra.gmra.mrb[120].mxu1 %vm222_vm2, %v24990_v55  ;;  %23167 = vmatmul.mubr.msk.f32.vlgmr.msra.gmra.mrb[122].mxu0 %vm222_vm2, %v24990_v55  ;;  %v25042_v16 = vadd.f32 %v2334_v13, %v24946_v37  ;;  %v25045_v17 = vadd.f32 %v2407_v14, %v24949_v38  ;;  %v22693_v18 = vpop.f32.mrb[27].mxu1  ;;  %v22698_v19 = vpop.f32.mrb[29].mxu0 }
 0x193   : > { %23169 = vmatprep.subr.mxu1 %v23937_v0  ;;  %14096 = vrot.lane.b32.xlu1 %v21712_v10, %s23939_s21  ;;  %v25050_v21 = vpop.permute.xlu0 %10327 }
 0x194   : > { %23170 = vmatpush3.msk.msra.mxu1 %vm226_vm1, %v21535_v12  ;;  %23174 = vmatprep.subr.mxu0 %v23937_v0 }
 0x195   : > { %23171 = vmatprep.mubr.msk.f32.mxu1 %vm23938_vm0, %v23937_v0  ;;  %23175 = vmatpush3.msk.msra.mxu0 %vm226_vm1, %v21536_v15  ;;  %v25058_v23 = vpop.permute.xlu1 %10402  ;;  %v2480_v24 = vpop.f32.mrb[28].mxu1 }
 0x196   : > { %23176 = vmatprep.mubr.msk.f32.mxu0 %vm23938_vm0, %v23937_v0  ;;  %14171 = vrot.lane.b32.xlu0 %v21713_v20, %s23939_s21  ;;  %v25065_v26 = vadd.f32 %v2480_v24, %v24966_v46  ;;  %v2553_v27 = vpop.f32.mrb[30].mxu0  ;;  %v22703_v28 = vpop.f32.mrb[29].mxu1  ;;  %v25112_v46 = vld [vmem:[%s26717_s2 + $0x1c] sm:$0xf] }
 0x197   : > { %23172 = vmatmul.mubr.msk.f32.vlgmr.msra.gmra.mrb[122].mxu1 %vm222_vm2, %v24990_v55  ;;  %23177 = vmatmul.mubr.msk.f32.vlgmr.msra.gmra.mrb[124].mxu0 %vm222_vm2, %v24990_v55  ;;  %v25073_v30 = vadd.f32 %v2553_v27, %v24969_v47  ;;  %v22708_v31 = vpop.f32.mrb[31].mxu0 }
 0x198   : > { %23179 = vmatprep.subr.mxu1 %v23937_v0  ;;  %14246 = vrot.lane.b32.xlu1 %v21714_v22, %s23939_s21  ;;  %v25078_v33 = vpop.permute.xlu0 %10477 }
 0x199   : > { %23180 = vmatpush3.msk.msra.mxu1 %vm226_vm1, %v21537_v25  ;;  %23184 = vmatprep.subr.mxu0 %v23937_v0  ;;  %v2626_v34 = vpop.f32.mrb[30].mxu1  ;;  %v2723_v35 = vpop.f32.mrb[32].mxu0 }
 0x19a   : > { %23181 = vmatprep.mubr.msk.f32.mxu1 %vm23938_vm0, %v23937_v0  ;;  %23185 = vmatpush3.msk.msra.mxu0 %vm226_vm1, %v21538_v29  ;;  %v25087_v37 = vadd.f32 %v2626_v34, %v24993_v56  ;;  %v25090_v38 = vadd.f32 %v2723_v35, %v25002_v61  ;;  %v22713_v39 = vpop.f32.mrb[31].mxu1  ;;  %v22718_v41 = vpop.f32.mrb[33].mxu0 }
 0x19b   : > { %23186 = vmatprep.mubr.msk.f32.mxu0 %vm23938_vm0, %v23937_v0  ;;  %14339 = vrot.lane.b32.xlu0 %v21732_v32, %s23940_s8  ;;  %v25100_v42 = vpop.permute.xlu1 %10552 }
 0x19c   : > { %23182 = vmatmul.mubr.msk.f32.vlgmr.msra.gmra.mrb[124].mxu1 %vm222_vm2, %v24990_v55  ;;  %23187 = vmatmul.mubr.msk.f32.vlgmr.msra.gmra.mrb[126].mxu0 %vm222_vm2, %v24990_v55 }
 0x19d   : > { %23189 = vmatprep.subr.mxu1 %v23937_v0  ;;  %14417 = vrot.lane.b32.xlu1 %v21733_v36, %s23940_s8  ;;  %v25105_v44 = vpop.permute.xlu0 %10645  ;;  %v2798_v45 = vpop.f32.mrb[32].mxu1 }
 0x19e   : > { %23190 = vmatpush3.msk.msra.mxu1 %vm226_vm1, %v21539_v40  ;;  %23194 = vmatprep.subr.mxu0 %v23937_v0  ;;  %v25115_v47 = vadd.f32 %v2798_v45, %v25019_v6  ;;  %v2873_v48 = vpop.f32.mrb[34].mxu0  ;;  %v22723_v49 = vpop.f32.mrb[33].mxu1  ;;  %v21738_v6 = vld [vmem:[%s23987_s20 + $0x1c] sm:$0xf] }
 0x19f   : > { %23191 = vmatprep.mubr.msk.f32.mxu1 %vm23938_vm0, %v23937_v0  ;;  %23195 = vmatpush3.msk.msra.mxu0 %vm226_vm1, %v24983_v53  ;;  %v3254_v51 = vadd.f32 %v2873_v48, %v25022_v7  ;;  %v22728_v52 = vpop.f32.mrb[35].mxu0  ;;  %v21736_v53 = vld [vmem:[%s23987_s20 + $0x14] sm:$0xf]  ;;  %v21739_v7 = vld [vmem:[%s23987_s20 + $0x20] sm:$0xf] }
 0x1a0   : > { %23196 = vmatprep.mubr.msk.f32.mxu0 %vm23938_vm0, %v23937_v0  ;;  %14492 = vrot.lane.b32.xlu0 %v21734_v43, %s23940_s8 }
 0x1a1   : > { %23192 = vmatmul.mubr.msk.f32.vlgmr.msra.gmra.mrb[126].mxu1 %vm222_vm2, %v24990_v55  ;;  %23197 = vmatmul.mubr.msk.f32.vlgmr.msra.gmra.mrb[128].mxu0 %vm222_vm2, %v25112_v46  ;;  %v2948_v54 = vpop.f32.mrb[34].mxu1  ;;  %v3023_v56 = vpop.f32.mrb[36].mxu0 }
 0x1a2   : > { %23199 = vmatprep.subr.mxu1 %v23937_v0  ;;  %14567 = vrot.lane.b32.xlu1 %v21735_v50, %s23940_s8  ;;  %v25134_v57 = vadd.f32 %v2948_v54, %v25042_v16  ;;  %v25137_v58 = vadd.f32 %v3023_v56, %v25045_v17  ;;  %v22733_v59 = vpop.f32.mrb[35].mxu1  ;;  %v25142_v55 = vpop.permute.xlu1 %10723 }
 0x1a3   : > { %23200 = vmatpush3.msk.msra.mxu1 %vm226_vm1, %v24999_v60  ;;  %23204 = vmatprep.subr.mxu0 %v23937_v0  ;;  %v22738_v61 = vpop.f32.mrb[37].mxu0  ;;  %v25149_v63 = vpop.permute.xlu0 %10798 }
 0x1a4   : > { %23201 = vmatprep.mubr.msk.f32.mxu1 %vm23938_vm0, %v23937_v0  ;;  %23205 = vmatpush3.msk.msra.mxu0 %vm226_vm1, %v25016_v5 }
 0x1a5   : > { %23206 = vmatprep.mubr.msk.f32.mxu0 %vm23938_vm0, %v23937_v0  ;;  %14642 = vrot.lane.b32.xlu0 %v21736_v53, %s23940_s8  ;;  %v3098_v60 = vpop.f32.mrb[36].mxu1  ;;  %v3173_v1 = vpop.f32.mrb[38].mxu0 }
 0x1a6   : > { %23202 = vmatmul.mubr.msk.f32.vlgmr.msra.gmra.mrb[128].mxu1 %vm222_vm2, %v25112_v46  ;;  %23207 = vmatmul.mubr.msk.f32.vlgmr.msra.gmra.mrb[130].mxu0 %vm222_vm2, %v25112_v46  ;;  %v25159_v2 = vadd.f32 %v3098_v60, %v25065_v26  ;;  %v25162_v3 = vadd.f32 %v3173_v1, %v25073_v30  ;;  %v22743_v4 = vpop.f32.mrb[37].mxu1  ;;  %v22748_v5 = vpop.f32.mrb[39].mxu0 }
 0x1a7   : > { %23209 = vmatprep.subr.mxu1 %v23937_v0  ;;  %14717 = vrot.lane.b32.xlu1 %v21737_v62, %s23940_s8  ;;  %v10874_v8 = vpop.permute.xlu1 %10873  ;;  %v10949_v13 = vpop.permute.xlu0 %10948  ;;  %v21807_v5 = vld [vmem:[%s23987_s20 + $0x54] sm:$0xf] }
 0x1a8   : > { %23210 = vmatpush3.msk.msra.mxu1 %vm226_vm1, %v25030_v11  ;;  %23214 = vmatprep.subr.mxu0 %v23937_v0 }
 0x1a9   : > { %23211 = vmatprep.mubr.msk.f32.mxu1 %vm23938_vm0, %v23937_v0  ;;  %23215 = vmatpush3.msk.msra.mxu0 %vm226_vm1, %v25050_v21  ;;  %v3248_v9 = vpop.f32.mrb[38].mxu1  ;;  %v3344_v11 = vpop.f32.mrb[40].mxu0 }
 0x1aa   : > { %23216 = vmatprep.mubr.msk.f32.mxu0 %vm23938_vm0, %v23937_v0  ;;  %14792 = vrot.lane.b32.xlu0 %v21738_v6, %s23940_s8  ;;  %v25179_v10 = vadd.f32 %v3248_v9, %v25087_v37  ;;  %v22753_v12 = vpop.f32.mrb[39].mxu1  ;;  %v25186_v14 = vadd.f32 %v3344_v11, %v25090_v38  ;;  %v22758_v15 = vpop.f32.mrb[41].mxu0  ;;  %v21808_v9 = vld [vmem:[%s23987_s20 + $0x58] sm:$0xf] }
 0x1ab   : > { %23212 = vmatmul.mubr.msk.f32.vlgmr.msra.gmra.mrb[130].mxu1 %vm222_vm2, %v25112_v46  ;;  %23217 = vmatmul.mubr.msk.f32.vlgmr.msra.gmra.mrb[132].mxu0 %vm222_vm2, %v25112_v46  ;;  %v11024_v21 = vpop.permute.xlu1 %11023 }
 0x1ac   : > { %23219 = vmatprep.subr.mxu1 %v23937_v0  ;;  %14867 = vrot.lane.b32.xlu1 %v21739_v7, %s23940_s8  ;;  %v11099_v24 = vpop.permute.xlu0 %11098 }
 0x1ad   : > { %23220 = vmatpush3.msk.msra.mxu1 %vm226_vm1, %v25058_v23  ;;  %23224 = vmatprep.subr.mxu0 %v23937_v0  ;;  %v3419_v16 = vpop.f32.mrb[40].mxu1  ;;  %v3494_v17 = vpop.f32.mrb[42].mxu0  ;;  %v25215_v23 = vld [vmem:[%s26717_s2 + $0x20] sm:$0xf] }
 0x1ae   : > { %23221 = vmatprep.mubr.msk.f32.mxu1 %vm23938_vm0, %v23937_v0  ;;  %23225 = vmatpush3.msk.msra.mxu0 %vm226_vm1, %v25078_v33  ;;  %v25198_v18 = vadd.f32 %v3419_v16, %v25115_v47  ;;  %v25200_v19 = vadd.f32 %v3494_v17, %v3254_v51  ;;  %v22763_v20 = vpop.f32.mrb[41].mxu1  ;;  %v22768_v22 = vpop.f32.mrb[43].mxu0  ;;  %v25289_v47 = vld [vmem:[%s26717_s2 + $0x24] sm:$0xf]  ;;  %v21809_v17 = vld [vmem:[%s23987_s20 + $0x5c] sm:$0xf] }
 0x1af   : > { %23226 = vmatprep.mubr.msk.f32.mxu0 %vm23938_vm0, %v23937_v0  ;;  %23222 = vmatmul.mubr.msk.f32.vlgmr.msra.gmra.mrb[132].mxu1 %vm222_vm2, %v25112_v46  ;;  %v11174_v31 = vpop.permute.xlu1 %11173  ;;  %v21810_v20 = vld [vmem:[%s23987_s20 + $0x60] sm:$0xf] }
 0x1b0   : > { %23227 = vmatmul.mubr.msk.f32.vlgmr.msra.gmra.mrb[134].mxu0 %vm222_vm2, %v25112_v46  ;;  %23229 = vmatprep.subr.mxu1 %v23937_v0 }
 0x1b1   : > { %23230 = vmatpush3.msk.msra.mxu1 %vm226_vm1, %v25100_v42  ;;  %23234 = vmatprep.subr.mxu0 %v23937_v0  ;;  %v11267_v34 = vpop.permute.xlu0 %11266 }
 0x1b2   : > { %23231 = vmatprep.mubr.msk.f32.mxu1 %vm23938_vm0, %v23937_v0  ;;  %23235 = vmatpush3.msk.msra.mxu0 %vm226_vm1, %v25105_v44  ;;  %v3569_v25 = vpop.f32.mrb[42].mxu1  ;;  %v3644_v26 = vpop.f32.mrb[44].mxu0 }
 0x1b3   : > { %23236 = vmatprep.mubr.msk.f32.mxu0 %vm23938_vm0, %v23937_v0  ;;  %23232 = vmatmul.mubr.msk.f32.vlgmr.msra.gmra.mrb[134].mxu1 %vm222_vm2, %v25112_v46  ;;  %v25226_v27 = vadd.f32 %v3569_v25, %v25134_v57  ;;  %v25229_v28 = vadd.f32 %v3644_v26, %v25137_v58  ;;  %v22773_v29 = vpop.f32.mrb[43].mxu1  ;;  %v22778_v30 = vpop.f32.mrb[45].mxu0 }
 0x1b4   : > { %23237 = vmatmul.mubr.msk.f32.vlgmr.msra.gmra.mrb[136].mxu0 %vm222_vm2, %v25215_v23  ;;  %23239 = vmatprep.subr.mxu1 %v23937_v0  ;;  %v11345_v39 = vpop.permute.xlu1 %11344 }
 0x1b5   : > { %23240 = vmatpush3.msk.msra.mxu1 %vm226_vm1, %v25142_v55  ;;  %23244 = vmatprep.subr.mxu0 %v23937_v0 }
 0x1b6   : > { %23241 = vmatprep.mubr.msk.f32.mxu1 %vm23938_vm0, %v23937_v0  ;;  %23245 = vmatpush3.msk.msra.mxu0 %vm226_vm1, %v25149_v63  ;;  %v11420_v45 = vpop.permute.xlu0 %11419 }
 0x1b7   : > { %23246 = vmatprep.mubr.msk.f32.mxu0 %vm23938_vm0, %v23937_v0  ;;  %23242 = vmatmul.mubr.msk.f32.vlgmr.msra.gmra.mrb[136].mxu1 %vm222_vm2, %v25215_v23  ;;  %v3719_v32 = vpop.f32.mrb[44].mxu1  ;;  %v3794_v33 = vpop.f32.mrb[46].mxu0 }
 0x1b8   : > { %23247 = vmatmul.mubr.msk.f32.vlgmr.msra.gmra.mrb[138].mxu0 %vm222_vm2, %v25215_v23  ;;  %23249 = vmatprep.subr.mxu1 %v23937_v0  ;;  %v25249_v35 = vadd.f32 %v3719_v32, %v25159_v2  ;;  %v25252_v36 = vadd.f32 %v3794_v33, %v25162_v3  ;;  %v22783_v37 = vpop.f32.mrb[45].mxu1  ;;  %v22788_v38 = vpop.f32.mrb[47].mxu0  ;;  %v21812_v33 = vld [vmem:[%s23987_s20 + $0x68] sm:$0xf] }
 0x1b9   : > { %23250 = vmatpush3.msk.msra.mxu1 %vm226_vm1, %v10874_v8  ;;  %23254 = vmatprep.subr.mxu0 %v23937_v0  ;;  %v11495_v50 = vpop.permute.xlu1 %11494  ;;  %v21636_v37 = vld [vmem:[%s23987_s20 + $0x14] sm:$0xf] }
 0x1ba   : > { %23251 = vmatprep.mubr.msk.f32.mxu1 %vm23938_vm0, %v23937_v0  ;;  %23255 = vmatpush3.msk.msra.mxu0 %vm226_vm1, %v10949_v13 }
 0x1bb   : > { %23256 = vmatprep.mubr.msk.f32.mxu0 %vm23938_vm0, %v23937_v0  ;;  %23252 = vmatmul.mubr.msk.f32.vlgmr.msra.gmra.mrb[138].mxu1 %vm222_vm2, %v25215_v23  ;;  %v11570_v53 = vpop.permute.xlu0 %11569 }
 0x1bc   : > { %23257 = vmatmul.mubr.msk.f32.vlgmr.msra.gmra.mrb[140].mxu0 %vm222_vm2, %v25215_v23  ;;  %23259 = vmatprep.subr.mxu1 %v23937_v0  ;;  %v3869_v40 = vpop.f32.mrb[46].mxu1  ;;  %v3964_v41 = vpop.f32.mrb[48].mxu0 }
 0x1bd   : > { %23260 = vmatpush3.msk.msra.mxu1 %vm226_vm1, %v11024_v21  ;;  %23264 = vmatprep.subr.mxu0 %v23937_v0  ;;  %v25269_v42 = vadd.f32 %v3869_v40, %v25179_v10  ;;  %v25272_v43 = vadd.f32 %v3964_v41, %v25186_v14  ;;  %v22793_v44 = vpop.f32.mrb[47].mxu1  ;;  %v22798_v46 = vpop.f32.mrb[49].mxu0  ;;  %v21632_v14 = vld [vmem:[%s23987_s20 + $0x4] sm:$0xf] }
 0x1be   : > { %23261 = vmatprep.mubr.msk.f32.mxu1 %vm23938_vm0, %v23937_v0  ;;  %23265 = vmatpush3.msk.msra.mxu0 %vm226_vm1, %v11099_v24  ;;  %v11645_v63 = vpop.permute.xlu1 %11644  ;;  %v21633_v24 = vld [vmem:[%s23987_s20 + $0x8] sm:$0xf]  ;;  %v21637_v46 = vld [vmem:[%s23987_s20 + $0x18] sm:$0xf] }
 0x1bf   : > { %23266 = vmatprep.mubr.msk.f32.mxu0 %vm23938_vm0, %v23937_v0  ;;  %23262 = vmatmul.mubr.msk.f32.vlgmr.msra.gmra.mrb[140].mxu1 %vm222_vm2, %v25215_v23 }
 0x1c0   : > { %23267 = vmatmul.mubr.msk.f32.vlgmr.msra.gmra.mrb[142].mxu0 %vm222_vm2, %v25215_v23  ;;  %23269 = vmatprep.subr.mxu1 %v23937_v0  ;;  %v11720_v60 = vpop.permute.xlu0 %11719 }
 0x1c1   : > { %23270 = vmatpush3.msk.msra.mxu1 %vm226_vm1, %v11174_v31  ;;  %23274 = vmatprep.subr.mxu0 %v23937_v0  ;;  %v4037_v48 = vpop.f32.mrb[48].mxu1  ;;  %v4110_v49 = vpop.f32.mrb[50].mxu0 }
 0x1c2   : > { %23271 = vmatprep.mubr.msk.f32.mxu1 %vm23938_vm0, %v23937_v0  ;;  %23275 = vmatpush3.msk.msra.mxu0 %vm226_vm1, %v11267_v34  ;;  %v25295_v51 = vadd.f32 %v4037_v48, %v25198_v18  ;;  %v25298_v52 = vadd.f32 %v4110_v49, %v25200_v19  ;;  %v22803_v54 = vpop.f32.mrb[49].mxu1  ;;  %v22808_v56 = vpop.f32.mrb[51].mxu0  ;;  %v25372_v18 = vld [vmem:[%s26717_s2 + $0x28] sm:$0xf]  ;;  %v21638_v48 = vld [vmem:[%s23987_s20 + $0x1c] sm:$0xf] }
 0x1c3   : > { %23276 = vmatprep.mubr.msk.f32.mxu0 %vm23938_vm0, %v23937_v0  ;;  %23272 = vmatmul.mubr.msk.f32.vlgmr.msra.gmra.mrb[142].mxu1 %vm222_vm2, %v25215_v23  ;;  %v11795_v8 = vpop.permute.xlu1 %11794 }
 0x1c4   : > { %23277 = vmatmul.mubr.msk.f32.vlgmr.msra.gmra.mrb[144].mxu0 %vm222_vm2, %v25289_v47  ;;  %23279 = vmatprep.subr.mxu1 %v23937_v0 }
 0x1c5   : > { %23280 = vmatpush3.msk.msra.mxu1 %vm226_vm1, %v11345_v39  ;;  %23284 = vmatprep.subr.mxu0 %v23937_v0  ;;  %v21813_v39 = vld [vmem:[%s23987_s20 + $0x6c] sm:$0xf] }
 0x1c6   : > { %23281 = vmatprep.mubr.msk.f32.mxu1 %vm23938_vm0, %v23937_v0  ;;  %23285 = vmatpush3.msk.msra.mxu0 %vm226_vm1, %v11420_v45  ;;  %v4183_v57 = vpop.f32.mrb[50].mxu1  ;;  %v4256_v58 = vpop.f32.mrb[52].mxu0  ;;  %v21814_v45 = vld [vmem:[%s23987_s20 + $0x70] sm:$0xf] }
 0x1c7   : > { %23286 = vmatprep.mubr.msk.f32.mxu0 %vm23938_vm0, %v23937_v0  ;;  %23282 = vmatmul.mubr.msk.f32.vlgmr.msra.gmra.mrb[144].mxu1 %vm222_vm2, %v25289_v47  ;;  %v25317_v59 = vadd.f32 %v4183_v57, %v25226_v27  ;;  %v25320_v55 = vadd.f32 %v4256_v58, %v25229_v28  ;;  %v22813_v61 = vpop.f32.mrb[51].mxu1  ;;  %v22818_v62 = vpop.f32.mrb[53].mxu0  ;;  %v21634_v27 = vld [vmem:[%s23987_s20 + $0xc] sm:$0xf]  ;;  %v21811_v28 = vld [vmem:[%s23987_s20 + $0x64] sm:$0xf] }
 0x1c8   : > { %23287 = vmatmul.mubr.msk.f32.vlgmr.msra.gmra.mrb[146].mxu0 %vm222_vm2, %v25289_v47  ;;  %23289 = vmatprep.subr.mxu1 %v23937_v0  ;;  %v21639_v58 = vld [vmem:[%s23987_s20 + $0x20] sm:$0xf]  ;;  %v21657_v62 = vld [vmem:[%s23987_s20 + $0x2c] sm:$0xf] }
 0x1c9   : > { %23290 = vmatpush3.msk.msra.mxu1 %vm226_vm1, %v11495_v50  ;;  %23294 = vmatprep.subr.mxu0 %v23937_v0 }
 0x1ca   : > { %23291 = vmatprep.mubr.msk.f32.mxu1 %vm23938_vm0, %v23937_v0  ;;  %23295 = vmatpush3.msk.msra.mxu0 %vm226_vm1, %v11570_v53  ;;  %v4329_v1 = vpop.f32.mrb[52].mxu1  ;;  %v21833_v53 = vld [vmem:[%s23987_s20 + $0x80] sm:$0xf] }
 0x1cb   : > { %23296 = vmatprep.mubr.msk.f32.mxu0 %vm23938_vm0, %v23937_v0  ;;  %23292 = vmatmul.mubr.msk.f32.vlgmr.msra.gmra.mrb[146].mxu1 %vm222_vm2, %v25289_v47  ;;  %v25335_v2 = vadd.f32 %v4329_v1, %v25249_v35  ;;  %v4402_v3 = vpop.f32.mrb[54].mxu0  ;;  %v22823_v4 = vpop.f32.mrb[53].mxu1  ;;  %v21834_v1 = vld [vmem:[%s23987_s20 + $0x84] sm:$0xf] }
 0x1cc   : > { %23297 = vmatmul.mubr.msk.f32.vlgmr.msra.gmra.mrb[148].mxu0 %vm222_vm2, %v25289_v47  ;;  %23299 = vmatprep.subr.mxu1 %v23937_v0  ;;  %v25342_v6 = vadd.f32 %v4402_v3, %v25252_v36  ;;  %v22828_v7 = vpop.f32.mrb[55].mxu0  ;;  %v21635_v36 = vld [vmem:[%s23987_s20 + $0x10] sm:$0xf]  ;;  %v25481_v3 = vld [vmem:[%s26717_s2 + $0x2c] sm:$0xf] }
 0x1cd   : > { %23300 = vmatpush3.msk.msra.mxu1 %vm226_vm1, %v11645_v63  ;;  %23304 = vmatprep.subr.mxu0 %v23937_v0 }
 0x1ce   : > { %23301 = vmatprep.mubr.msk.f32.mxu1 %vm23938_vm0, %v23937_v0  ;;  %23305 = vmatpush3.msk.msra.mxu0 %vm226_vm1, %v11720_v60  ;;  %v4475_v10 = vpop.f32.mrb[54].mxu1 }
 0x1cf   : > { %23306 = vmatprep.mubr.msk.f32.mxu0 %vm23938_vm0, %v23937_v0  ;;  %16170 = vrot.lane.b32.xlu0 %v21807_v5, %s23939_s21  ;;  %v25354_v11 = vadd.f32 %v4475_v10, %v25269_v42  ;;  %v4572_v12 = vpop.f32.mrb[56].mxu0  ;;  %v22833_v13 = vpop.f32.mrb[55].mxu1  ;;  %v21835_v5 = vld [vmem:[%s23987_s20 + $0x88] sm:$0xf] }
 0x1d0   : > { %23302 = vmatmul.mubr.msk.f32.vlgmr.msra.gmra.mrb[148].mxu1 %vm222_vm2, %v25289_v47  ;;  %23307 = vmatmul.mubr.msk.f32.vlgmr.msra.gmra.mrb[150].mxu0 %vm222_vm2, %v25289_v47  ;;  %v25362_v15 = vadd.f32 %v4572_v12, %v25272_v43  ;;  %v22838_v16 = vpop.f32.mrb[57].mxu0  ;;  %v21659_v13 = vld [vmem:[%s23987_s20 + $0x34] sm:$0xf] }
 0x1d1   : > { %23309 = vmatprep.subr.mxu1 %v23937_v0  ;;  %16248 = vrot.lane.b32.xlu1 %v21808_v9, %s23939_s21  ;;  %v21658_v9 = vld [vmem:[%s23987_s20 + $0x30] sm:$0xf] }
 0x1d2   : > { %23310 = vmatpush3.msk.msra.mxu1 %vm226_vm1, %v11795_v8  ;;  %23314 = vmatprep.subr.mxu0 %v23937_v0  ;;  %v4647_v19 = vpop.f32.mrb[56].mxu1 }
 0x1d3   : > { %23311 = vmatprep.mubr.msk.f32.mxu1 %vm23938_vm0, %v23937_v0  ;;  %23315 = vmatpush3.msk.msra.mxu0 %vm226_vm1, %v21632_v14  ;;  %v25379_v21 = vadd.f32 %v4647_v19, %v25295_v51  ;;  %v4722_v22 = vpop.f32.mrb[58].mxu0  ;;  %v22843_v23 = vpop.f32.mrb[57].mxu1  ;;  %v21836_v14 = vld [vmem:[%s23987_s20 + $0x8c] sm:$0xf] }
 0x1d4   : > { %23316 = vmatprep.mubr.msk.f32.mxu0 %vm23938_vm0, %v23937_v0  ;;  %16323 = vrot.lane.b32.xlu0 %v21809_v17, %s23939_s21  ;;  %v25386_v25 = vadd.f32 %v4722_v22, %v25298_v52  ;;  %v22848_v26 = vpop.f32.mrb[59].mxu0  ;;  %v21832_v52 = vld [vmem:[%s23987_s20 + $0x7c] sm:$0xf]  ;;  %v21660_v23 = vld [vmem:[%s23987_s20 + $0x38] sm:$0xf] }
 0x1d5   : > { %23312 = vmatmul.mubr.msk.f32.vlgmr.msra.gmra.mrb[150].mxu1 %vm222_vm2, %v25289_v47  ;;  %23317 = vmatmul.mubr.msk.f32.vlgmr.msra.gmra.mrb[152].mxu0 %vm222_vm2, %v25372_v18  ;;  %v21838_v26 = vld [vmem:[%s23987_s20 + $0x94] sm:$0xf] }
 0x1d6   : > { %23319 = vmatprep.subr.mxu1 %v23937_v0  ;;  %16398 = vrot.lane.b32.xlu1 %v21810_v20, %s23939_s21  ;;  %v4797_v29 = vpop.f32.mrb[58].mxu1 }
 0x1d7   : > { %23320 = vmatpush3.msk.msra.mxu1 %vm226_vm1, %v21633_v24  ;;  %23324 = vmatprep.subr.mxu0 %v23937_v0  ;;  %v25399_v30 = vadd.f32 %v4797_v29, %v25317_v59  ;;  %v4872_v31 = vpop.f32.mrb[60].mxu0  ;;  %v22853_v32 = vpop.f32.mrb[59].mxu1 }
 0x1d8   : > { %23321 = vmatprep.mubr.msk.f32.mxu1 %vm23938_vm0, %v23937_v0  ;;  %23325 = vmatpush3.msk.msra.mxu0 %vm226_vm1, %v21634_v27  ;;  %v25406_v34 = vadd.f32 %v4872_v31, %v25320_v55  ;;  %v22858_v35 = vpop.f32.mrb[61].mxu0 }
 0x1d9   : > { %23326 = vmatprep.mubr.msk.f32.mxu0 %vm23938_vm0, %v23937_v0  ;;  %16473 = vrot.lane.b32.xlu0 %v21811_v28, %s23939_s21 }
 0x1da   : > { %23322 = vmatmul.mubr.msk.f32.vlgmr.msra.gmra.mrb[152].mxu1 %vm222_vm2, %v25372_v18  ;;  %23327 = vmatmul.mubr.msk.f32.vlgmr.msra.gmra.mrb[154].mxu0 %vm222_vm2, %v25372_v18  ;;  %v4947_v38 = vpop.f32.mrb[60].mxu1 }
 0x1db   : > { %23329 = vmatprep.subr.mxu1 %v23937_v0  ;;  %16548 = vrot.lane.b32.xlu1 %v21812_v33, %s23939_s21  ;;  %v25421_v40 = vadd.f32 %v4947_v38, %v25335_v2  ;;  %v5022_v41 = vpop.f32.mrb[62].mxu0  ;;  %v22863_v42 = vpop.f32.mrb[61].mxu1  ;;  %v21857_v38 = vld [vmem:[%s23987_s20 + $0x54] sm:$0xf] }
 0x1dc   : > { %23330 = vmatpush3.msk.msra.mxu1 %vm226_vm1, %v21635_v36  ;;  %23334 = vmatprep.subr.mxu0 %v23937_v0  ;;  %v25426_v43 = vadd.f32 %v5022_v41, %v25342_v6  ;;  %v22868_v44 = vpop.f32.mrb[63].mxu0  ;;  %v21858_v42 = vld [vmem:[%s23987_s20 + $0x58] sm:$0xf] }
 0x1dd   : > { %23331 = vmatprep.mubr.msk.f32.mxu1 %vm23938_vm0, %v23937_v0  ;;  %23335 = vmatpush3.msk.msra.mxu0 %vm226_vm1, %v21636_v37  ;;  %v21663_v37 = vld [vmem:[%s23987_s20 + $0x44] sm:$0xf] }
 0x1de   : > { %23336 = vmatprep.mubr.msk.f32.mxu0 %vm23938_vm0, %v23937_v0  ;;  %16623 = vrot.lane.b32.xlu0 %v21813_v39, %s23939_s21  ;;  %v5097_v47 = vpop.f32.mrb[62].mxu1 }
 0x1df   : > { %23332 = vmatmul.mubr.msk.f32.vlgmr.msra.gmra.mrb[154].mxu1 %vm222_vm2, %v25372_v18  ;;  %23337 = vmatmul.mubr.msk.f32.vlgmr.msra.gmra.mrb[156].mxu0 %vm222_vm2, %v25372_v18  ;;  %v25442_v49 = vadd.f32 %v5097_v47, %v25354_v11  ;;  %v5193_v50 = vpop.f32.mrb[64].mxu0  ;;  %v22873_v51 = vpop.f32.mrb[63].mxu1 }
 0x1e0   : > { %23339 = vmatprep.subr.mxu1 %v23937_v0  ;;  %16698 = vrot.lane.b32.xlu1 %v21814_v45, %s23939_s21  ;;  %v25448_v54 = vadd.f32 %v5193_v50, %v25362_v15  ;;  %v22878_v56 = vpop.f32.mrb[65].mxu0  ;;  %v25595_v50 = vld [vmem:[%s26717_s2 + $0x30] sm:$0xf] }
 0x1e1   : > { %23340 = vmatpush3.msk.msra.mxu1 %vm226_vm1, %v21637_v46  ;;  %23344 = vmatprep.subr.mxu0 %v23937_v0  ;;  %v21664_v46 = vld [vmem:[%s23987_s20 + $0x48] sm:$0xf] }
 0x1e2   : > { %23341 = vmatprep.mubr.msk.f32.mxu1 %vm23938_vm0, %v23937_v0  ;;  %23345 = vmatpush3.msk.msra.mxu0 %vm226_vm1, %v21638_v48  ;;  %v5268_v57 = vpop.f32.mrb[64].mxu1 }
 0x1e3   : > { %23346 = vmatprep.mubr.msk.f32.mxu0 %vm23938_vm0, %v23937_v0  ;;  %16791 = vrot.lane.b32.xlu0 %v21832_v52, %s23939_s21  ;;  %v25461_v59 = vadd.f32 %v5268_v57, %v25379_v21  ;;  %v5343_v55 = vpop.f32.mrb[66].mxu0  ;;  %v22883_v61 = vpop.f32.mrb[65].mxu1 }
 0x1e4   : > { %23342 = vmatmul.mubr.msk.f32.vlgmr.msra.gmra.mrb[156].mxu1 %vm222_vm2, %v25372_v18  ;;  %23347 = vmatmul.mubr.msk.f32.vlgmr.msra.gmra.mrb[158].mxu0 %vm222_vm2, %v25372_v18  ;;  %v25469_v63 = vadd.f32 %v5343_v55, %v25386_v25  ;;  %v22888_v60 = vpop.f32.mrb[67].mxu0  ;;  %v21661_v25 = vld [vmem:[%s23987_s20 + $0x3c] sm:$0xf]  ;;  %v21861_v55 = vld [vmem:[%s23987_s20 + $0x64] sm:$0xf] }
 0x1e5   : > { %23349 = vmatprep.subr.mxu1 %v23937_v0  ;;  %16869 = vrot.lane.b32.xlu1 %v21833_v53, %s23939_s21  ;;  %v25474_v2 = vpop.permute.xlu0 %13097  ;;  %v21862_v60 = vld [vmem:[%s23987_s20 + $0x68] sm:$0xf] }
 0x1e6   : > { %23350 = vmatpush3.msk.msra.mxu1 %vm226_vm1, %v21639_v58  ;;  %23354 = vmatprep.subr.mxu0 %v23937_v0  ;;  %v5418_v4 = vpop.f32.mrb[66].mxu1 }
 0x1e7   : > { %23351 = vmatprep.mubr.msk.f32.mxu1 %vm23938_vm0, %v23937_v0  ;;  %23355 = vmatpush3.msk.msra.mxu0 %vm226_vm1, %v21657_v62  ;;  %v25487_v6 = vpop.permute.xlu1 %13175  ;;  %v25490_v7 = vadd.f32 %v5418_v4, %v25399_v30  ;;  %v5493_v8 = vpop.f32.mrb[68].mxu0  ;;  %v21839_v30 = vld [vmem:[%s23987_s20 + $0x98] sm:$0xf] }
 0x1e8   : > { %23356 = vmatprep.mubr.msk.f32.mxu0 %vm23938_vm0, %v23937_v0  ;;  %16944 = vrot.lane.b32.xlu0 %v21834_v1, %s23939_s21  ;;  %v25497_v10 = vadd.f32 %v5493_v8, %v25406_v34  ;;  %v22893_v11 = vpop.f32.mrb[67].mxu1  ;;  %v22898_v12 = vpop.f32.mrb[69].mxu0  ;;  %v21662_v34 = vld [vmem:[%s23987_s20 + $0x40] sm:$0xf] }
 0x1e9   : > { %23352 = vmatmul.mubr.msk.f32.vlgmr.msra.gmra.mrb[158].mxu1 %vm222_vm2, %v25372_v18  ;;  %23357 = vmatmul.mubr.msk.f32.vlgmr.msra.gmra.mrb[160].mxu0 %vm222_vm2, %v25481_v3  ;;  %v21837_v18 = vld [vmem:[%s23987_s20 + $0x90] sm:$0xf] }
 0x1ea   : > { %23359 = vmatprep.subr.mxu1 %v23937_v0  ;;  %17019 = vrot.lane.b32.xlu1 %v21835_v5, %s23939_s21  ;;  %v25507_v15 = vpop.permute.xlu0 %13250 }
 0x1eb   : > { %23360 = vmatpush3.msk.msra.mxu1 %vm226_vm1, %v21658_v9  ;;  %23364 = vmatprep.subr.mxu0 %v23937_v0  ;;  %v5568_v16 = vpop.f32.mrb[68].mxu1  ;;  %v5643_v17 = vpop.f32.mrb[70].mxu0  ;;  %v21864_v9 = vld [vmem:[%s23987_s20 + $0x70] sm:$0xf] }
 0x1ec   : > { %23361 = vmatprep.mubr.msk.f32.mxu1 %vm23938_vm0, %v23937_v0  ;;  %23365 = vmatpush3.msk.msra.mxu0 %vm226_vm1, %v21659_v13  ;;  %v25515_v19 = vpop.permute.xlu1 %13325  ;;  %v25518_v20 = vadd.f32 %v5568_v16, %v25421_v40  ;;  %v25521_v21 = vadd.f32 %v5643_v17, %v25426_v43  ;;  %v22903_v22 = vpop.f32.mrb[69].mxu1 }
 0x1ed   : > { %23366 = vmatprep.mubr.msk.f32.mxu0 %vm23938_vm0, %v23937_v0  ;;  %17094 = vrot.lane.b32.xlu0 %v21836_v14, %s23939_s21  ;;  %v22908_v24 = vpop.f32.mrb[71].mxu0 }
 0x1ee   : > { %23362 = vmatmul.mubr.msk.f32.vlgmr.msra.gmra.mrb[160].mxu1 %vm222_vm2, %v25481_v3  ;;  %23367 = vmatmul.mubr.msk.f32.vlgmr.msra.gmra.mrb[162].mxu0 %vm222_vm2, %v25481_v3 }
 0x1ef   : > { %23369 = vmatprep.subr.mxu1 %v23937_v0  ;;  %17169 = vrot.lane.b32.xlu1 %v21837_v18, %s23939_s21  ;;  %v25535_v27 = vpop.permute.xlu0 %13400 }
 0x1f0   : > { %23370 = vmatpush3.msk.msra.mxu1 %vm226_vm1, %v21660_v23  ;;  %23374 = vmatprep.subr.mxu0 %v23937_v0  ;;  %v5718_v28 = vpop.f32.mrb[70].mxu1  ;;  %v5811_v29 = vpop.f32.mrb[72].mxu0  ;;  %v25695_v23 = vld [vmem:[%s26717_s2 + $0x34] sm:$0xf] }
 0x1f1   : > { %23371 = vmatprep.mubr.msk.f32.mxu1 %vm23938_vm0, %v23937_v0  ;;  %23375 = vmatpush3.msk.msra.mxu0 %vm226_vm1, %v21661_v25  ;;  %v25544_v31 = vadd.f32 %v5718_v28, %v25442_v49  ;;  %v25547_v32 = vadd.f32 %v5811_v29, %v25448_v54  ;;  %v22913_v33 = vpop.f32.mrb[71].mxu1  ;;  %v25553_v35 = vpop.permute.xlu1 %13475  ;;  %v21859_v49 = vld [vmem:[%s23987_s20 + $0x5c] sm:$0xf]  ;;  %v21860_v54 = vld [vmem:[%s23987_s20 + $0x60] sm:$0xf] }
 0x1f2   : > { %23376 = vmatprep.mubr.msk.f32.mxu0 %vm23938_vm0, %v23937_v0  ;;  %17244 = vrot.lane.b32.xlu0 %v21838_v26, %s23939_s21  ;;  %v22918_v36 = vpop.f32.mrb[73].mxu0 }
 0x1f3   : > { %23372 = vmatmul.mubr.msk.f32.vlgmr.msra.gmra.mrb[162].mxu1 %vm222_vm2, %v25481_v3  ;;  %23377 = vmatmul.mubr.msk.f32.vlgmr.msra.gmra.mrb[164].mxu0 %vm222_vm2, %v25481_v3 }
 0x1f4   : > { %23379 = vmatprep.subr.mxu1 %v23937_v0  ;;  %17319 = vrot.lane.b32.xlu1 %v21839_v30, %s23939_s21  ;;  %v25563_v39 = vpop.permute.xlu0 %13550 }
 0x1f5   : > { %23380 = vmatpush3.msk.msra.mxu1 %vm226_vm1, %v21662_v34  ;;  %23384 = vmatprep.subr.mxu0 %v23937_v0  ;;  %v5884_v40 = vpop.f32.mrb[72].mxu1  ;;  %v5957_v41 = vpop.f32.mrb[74].mxu0 }
 0x1f6   : > { %23381 = vmatprep.mubr.msk.f32.mxu1 %vm23938_vm0, %v23937_v0  ;;  %23385 = vmatpush3.msk.msra.mxu0 %vm226_vm1, %v21663_v37  ;;  %v25572_v43 = vadd.f32 %v5884_v40, %v25461_v59  ;;  %v25575_v44 = vadd.f32 %v5957_v41, %v25469_v63  ;;  %v22923_v45 = vpop.f32.mrb[73].mxu1  ;;  %v22928_v47 = vpop.f32.mrb[75].mxu0 }
 0x1f7   : > { %23386 = vmatprep.mubr.msk.f32.mxu0 %vm23938_vm0, %v23937_v0  ;;  %17412 = vrot.lane.b32.xlu0 %v21857_v38, %s23940_s8  ;;  %v25585_v48 = vpop.permute.xlu1 %13625  ;;  %v25768_v47 = vld [vmem:[%s26717_s2 + $0x38] sm:$0xf] }
 0x1f8   : > { %23382 = vmatmul.mubr.msk.f32.vlgmr.msra.gmra.mrb[164].mxu1 %vm222_vm2, %v25481_v3  ;;  %23387 = vmatmul.mubr.msk.f32.vlgmr.msra.gmra.mrb[166].mxu0 %vm222_vm2, %v25481_v3 }
 0x1f9   : > { %23389 = vmatprep.subr.mxu1 %v23937_v0  ;;  %17490 = vrot.lane.b32.xlu1 %v21858_v42, %s23940_s8  ;;  %v25602_v56 = vpop.permute.xlu0 %13718 }
 0x1fa   : > { %23390 = vmatpush3.msk.msra.mxu1 %vm226_vm1, %v21664_v46  ;;  %23394 = vmatprep.subr.mxu0 %v23937_v0  ;;  %v6030_v51 = vpop.f32.mrb[74].mxu1  ;;  %v6103_v52 = vpop.f32.mrb[76].mxu0 }
 0x1fb   : > { %23391 = vmatprep.mubr.msk.f32.mxu1 %vm23938_vm0, %v23937_v0  ;;  %23395 = vmatpush3.msk.msra.mxu0 %vm226_vm1, %v25474_v2  ;;  %v25605_v53 = vadd.f32 %v6030_v51, %v25490_v7  ;;  %v25608_v57 = vadd.f32 %v6103_v52, %v25497_v10  ;;  %v22933_v58 = vpop.f32.mrb[75].mxu1  ;;  %v22938_v59 = vpop.f32.mrb[77].mxu0 }
 0x1fc   : > { %23396 = vmatprep.mubr.msk.f32.mxu0 %vm23938_vm0, %v23937_v0  ;;  %17565 = vrot.lane.b32.xlu0 %v21859_v49, %s23940_s8  ;;  %v25620_v61 = vpop.permute.xlu1 %13796 }
 0x1fd   : > { %23392 = vmatmul.mubr.msk.f32.vlgmr.msra.gmra.mrb[166].mxu1 %vm222_vm2, %v25481_v3  ;;  %23397 = vmatmul.mubr.msk.f32.vlgmr.msra.gmra.mrb[168].mxu0 %vm222_vm2, %v25595_v50 }
 0x1fe   : > { %23399 = vmatprep.subr.mxu1 %v23937_v0  ;;  %17640 = vrot.lane.b32.xlu1 %v21860_v54, %s23940_s8  ;;  %v13872_v4 = vpop.permute.xlu0 %13871 }
 0x1ff   : > { %23400 = vmatpush3.msk.msra.mxu1 %vm226_vm1, %v25487_v6  ;;  %23404 = vmatprep.subr.mxu0 %v23937_v0  ;;  %v6176_v62 = vpop.f32.mrb[76].mxu1  ;;  %v6249_v63 = vpop.f32.mrb[78].mxu0  ;;  %v21863_v6 = vld [vmem:[%s23987_s20 + $0x6c] sm:$0xf] }
 0x200   : > { %23401 = vmatprep.mubr.msk.f32.mxu1 %vm23938_vm0, %v23937_v0  ;;  %23405 = vmatpush3.msk.msra.mxu0 %vm226_vm1, %v25507_v15  ;;  %v25631_v1 = vadd.f32 %v6176_v62, %v25518_v20  ;;  %v25634_v2 = vadd.f32 %v6249_v63, %v25521_v21  ;;  %v22943_v3 = vpop.f32.mrb[77].mxu1  ;;  %v22948_v5 = vpop.f32.mrb[79].mxu0 }
 0x201   : > { %23406 = vmatprep.mubr.msk.f32.mxu0 %vm23938_vm0, %v23937_v0  ;;  %17715 = vrot.lane.b32.xlu0 %v21861_v55, %s23940_s8  ;;  %v13947_v10 = vpop.permute.xlu1 %13946  ;;  %v21932_v5 = vld [vmem:[%s23987_s20 + $0x8] sm:$0xf] }
 0x202   : > { %23402 = vmatmul.mubr.msk.f32.vlgmr.msra.gmra.mrb[168].mxu1 %vm222_vm2, %v25595_v50  ;;  %23407 = vmatmul.mubr.msk.f32.vlgmr.msra.gmra.mrb[170].mxu0 %vm222_vm2, %v25595_v50 }
 0x203   : > { %23409 = vmatprep.subr.mxu1 %v23937_v0  ;;  %17790 = vrot.lane.b32.xlu1 %v21862_v60, %s23940_s8  ;;  %v14022_v15 = vpop.permute.xlu0 %14021 }
 0x204   : > { %23410 = vmatpush3.msk.msra.mxu1 %vm226_vm1, %v25515_v19  ;;  %23414 = vmatprep.subr.mxu0 %v23937_v0  ;;  %v6322_v7 = vpop.f32.mrb[78].mxu1  ;;  %v6417_v8 = vpop.f32.mrb[80].mxu0 }
 0x205   : > { %23411 = vmatprep.mubr.msk.f32.mxu1 %vm23938_vm0, %v23937_v0  ;;  %23415 = vmatpush3.msk.msra.mxu0 %vm226_vm1, %v25535_v27  ;;  %v25655_v11 = vadd.f32 %v6322_v7, %v25544_v31  ;;  %v25658_v12 = vadd.f32 %v6417_v8, %v25547_v32  ;;  %v22953_v13 = vpop.f32.mrb[79].mxu1  ;;  %v22958_v14 = vpop.f32.mrb[81].mxu0 }
 0x206   : > { %23416 = vmatprep.mubr.msk.f32.mxu0 %vm23938_vm0, %v23937_v0  ;;  %17865 = vrot.lane.b32.xlu0 %v21863_v6, %s23940_s8  ;;  %v14097_v21 = vpop.permute.xlu1 %14096  ;;  %v21757_v14 = vld [vmem:[%s23987_s20 + $0x54] sm:$0xf] }
 0x207   : > { %23412 = vmatmul.mubr.msk.f32.vlgmr.msra.gmra.mrb[170].mxu1 %vm222_vm2, %v25595_v50  ;;  %23417 = vmatmul.mubr.msk.f32.vlgmr.msra.gmra.mrb[172].mxu0 %vm222_vm2, %v25595_v50 }
 0x208   : > { %23419 = vmatprep.subr.mxu1 %v23937_v0  ;;  %17940 = vrot.lane.b32.xlu1 %v21864_v9, %s23940_s8  ;;  %v14172_v24 = vpop.permute.xlu0 %14171  ;;  %v21933_v9 = vld [vmem:[%s23987_s20 + $0xc] sm:$0xf] }
 0x209   : > { %23420 = vmatpush3.msk.msra.mxu1 %vm226_vm1, %v25553_v35  ;;  %23424 = vmatprep.subr.mxu0 %v23937_v0  ;;  %v6490_v16 = vpop.f32.mrb[80].mxu1  ;;  %v6563_v17 = vpop.f32.mrb[82].mxu0 }
 0x20a   : > { %23421 = vmatprep.mubr.msk.f32.mxu1 %vm23938_vm0, %v23937_v0  ;;  %23425 = vmatpush3.msk.msra.mxu0 %vm226_vm1, %v25563_v39  ;;  %v25677_v18 = vadd.f32 %v6490_v16, %v25572_v43  ;;  %v25680_v19 = vadd.f32 %v6563_v17, %v25575_v44  ;;  %v22963_v20 = vpop.f32.mrb[81].mxu1  ;;  %v22968_v22 = vpop.f32.mrb[83].mxu0  ;;  %v21934_v17 = vld [vmem:[%s23987_s20 + $0x10] sm:$0xf] }
 0x20b   : > { %23426 = vmatprep.mubr.msk.f32.mxu0 %vm23938_vm0, %v23937_v0  ;;  %23422 = vmatmul.mubr.msk.f32.vlgmr.msra.gmra.mrb[172].mxu1 %vm222_vm2, %v25595_v50  ;;  %v14247_v31 = vpop.permute.xlu1 %14246  ;;  %v21935_v20 = vld [vmem:[%s23987_s20 + $0x14] sm:$0xf] }
 0x20c   : > { %23427 = vmatmul.mubr.msk.f32.vlgmr.msra.gmra.mrb[174].mxu0 %vm222_vm2, %v25595_v50  ;;  %23429 = vmatprep.subr.mxu1 %v23937_v0 }
 0x20d   : > { %23430 = vmatpush3.msk.msra.mxu1 %vm226_vm1, %v25585_v48  ;;  %23434 = vmatprep.subr.mxu0 %v23937_v0  ;;  %v14340_v34 = vpop.permute.xlu0 %14339 }
 0x20e   : > { %23431 = vmatprep.mubr.msk.f32.mxu1 %vm23938_vm0, %v23937_v0  ;;  %23435 = vmatpush3.msk.msra.mxu0 %vm226_vm1, %v25602_v56  ;;  %v6636_v25 = vpop.f32.mrb[82].mxu1  ;;  %v6709_v26 = vpop.f32.mrb[84].mxu0 }
 0x20f   : > { %23436 = vmatprep.mubr.msk.f32.mxu0 %vm23938_vm0, %v23937_v0  ;;  %23432 = vmatmul.mubr.msk.f32.vlgmr.msra.gmra.mrb[174].mxu1 %vm222_vm2, %v25595_v50  ;;  %v25706_v27 = vadd.f32 %v6636_v25, %v25605_v53  ;;  %v25709_v28 = vadd.f32 %v6709_v26, %v25608_v57  ;;  %v22973_v29 = vpop.f32.mrb[83].mxu1  ;;  %v22978_v30 = vpop.f32.mrb[85].mxu0 }
 0x210   : > { %23437 = vmatmul.mubr.msk.f32.vlgmr.msra.gmra.mrb[176].mxu0 %vm222_vm2, %v25695_v23  ;;  %23439 = vmatprep.subr.mxu1 %v23937_v0  ;;  %v14418_v39 = vpop.permute.xlu1 %14417 }
 0x211   : > { %23440 = vmatpush3.msk.msra.mxu1 %vm226_vm1, %v25620_v61  ;;  %23444 = vmatprep.subr.mxu0 %v23937_v0 }
 0x212   : > { %23441 = vmatprep.mubr.msk.f32.mxu1 %vm23938_vm0, %v23937_v0  ;;  %23445 = vmatpush3.msk.msra.mxu0 %vm226_vm1, %v13872_v4  ;;  %v14493_v45 = vpop.permute.xlu0 %14492 }
 0x213   : > { %23446 = vmatprep.mubr.msk.f32.mxu0 %vm23938_vm0, %v23937_v0  ;;  %23442 = vmatmul.mubr.msk.f32.vlgmr.msra.gmra.mrb[176].mxu1 %vm222_vm2, %v25695_v23  ;;  %v6782_v32 = vpop.f32.mrb[84].mxu1  ;;  %v6855_v33 = vpop.f32.mrb[86].mxu0 }
 0x214   : > { %23447 = vmatmul.mubr.msk.f32.vlgmr.msra.gmra.mrb[178].mxu0 %vm222_vm2, %v25695_v23  ;;  %23449 = vmatprep.subr.mxu1 %v23937_v0  ;;  %v25728_v35 = vadd.f32 %v6782_v32, %v25631_v1  ;;  %v25731_v36 = vadd.f32 %v6855_v33, %v25634_v2  ;;  %v22983_v37 = vpop.f32.mrb[85].mxu1  ;;  %v22988_v38 = vpop.f32.mrb[87].mxu0  ;;  %v21937_v33 = vld [vmem:[%s23987_s20 + $0x1c] sm:$0xf] }
 0x215   : > { %23450 = vmatpush3.msk.msra.mxu1 %vm226_vm1, %v13947_v10  ;;  %23454 = vmatprep.subr.mxu0 %v23937_v0  ;;  %v14568_v50 = vpop.permute.xlu1 %14567  ;;  %v21761_v37 = vld [vmem:[%s23987_s20 + $0x64] sm:$0xf] }
 0x216   : > { %23451 = vmatprep.mubr.msk.f32.mxu1 %vm23938_vm0, %v23937_v0  ;;  %23455 = vmatpush3.msk.msra.mxu0 %vm226_vm1, %v14022_v15 }
 0x217   : > { %23456 = vmatprep.mubr.msk.f32.mxu0 %vm23938_vm0, %v23937_v0  ;;  %23452 = vmatmul.mubr.msk.f32.vlgmr.msra.gmra.mrb[178].mxu1 %vm222_vm2, %v25695_v23  ;;  %v14643_v53 = vpop.permute.xlu0 %14642 }
 0x218   : > { %23457 = vmatmul.mubr.msk.f32.vlgmr.msra.gmra.mrb[180].mxu0 %vm222_vm2, %v25695_v23  ;;  %23459 = vmatprep.subr.mxu1 %v23937_v0  ;;  %v6928_v40 = vpop.f32.mrb[86].mxu1  ;;  %v7024_v41 = vpop.f32.mrb[88].mxu0 }
 0x219   : > { %23460 = vmatpush3.msk.msra.mxu1 %vm226_vm1, %v14097_v21  ;;  %23464 = vmatprep.subr.mxu0 %v23937_v0  ;;  %v25748_v42 = vadd.f32 %v6928_v40, %v25655_v11  ;;  %v25751_v43 = vadd.f32 %v7024_v41, %v25658_v12  ;;  %v22993_v44 = vpop.f32.mrb[87].mxu1  ;;  %v22998_v46 = vpop.f32.mrb[89].mxu0 }
 0x21a   : > { %23461 = vmatprep.mubr.msk.f32.mxu1 %vm23938_vm0, %v23937_v0  ;;  %23465 = vmatpush3.msk.msra.mxu0 %vm226_vm1, %v14172_v24  ;;  %v14718_v63 = vpop.permute.xlu1 %14717  ;;  %v21758_v24 = vld [vmem:[%s23987_s20 + $0x58] sm:$0xf]  ;;  %v21762_v46 = vld [vmem:[%s23987_s20 + $0x68] sm:$0xf] }
 0x21b   : > { %23466 = vmatprep.mubr.msk.f32.mxu0 %vm23938_vm0, %v23937_v0  ;;  %23462 = vmatmul.mubr.msk.f32.vlgmr.msra.gmra.mrb[180].mxu1 %vm222_vm2, %v25695_v23 }
 0x21c   : > { %23467 = vmatmul.mubr.msk.f32.vlgmr.msra.gmra.mrb[182].mxu0 %vm222_vm2, %v25695_v23  ;;  %23469 = vmatprep.subr.mxu1 %v23937_v0  ;;  %v14793_v60 = vpop.permute.xlu0 %14792 }
 0x21d   : > { %23470 = vmatpush3.msk.msra.mxu1 %vm226_vm1, %v14247_v31  ;;  %23474 = vmatprep.subr.mxu0 %v23937_v0  ;;  %v7099_v48 = vpop.f32.mrb[88].mxu1  ;;  %v7174_v49 = vpop.f32.mrb[90].mxu0 }
 0x21e   : > { %23471 = vmatprep.mubr.msk.f32.mxu1 %vm23938_vm0, %v23937_v0  ;;  %23475 = vmatpush3.msk.msra.mxu0 %vm226_vm1, %v14340_v34  ;;  %v25774_v51 = vadd.f32 %v7099_v48, %v25677_v18  ;;  %v25777_v52 = vadd.f32 %v7174_v49, %v25680_v19  ;;  %v23003_v54 = vpop.f32.mrb[89].mxu1  ;;  %v23008_v56 = vpop.f32.mrb[91].mxu0  ;;  %v25851_v18 = vld [vmem:[%s26717_s2 + $0x3c] sm:$0xf]  ;;  %v21763_v48 = vld [vmem:[%s23987_s20 + $0x6c] sm:$0xf] }
 0x21f   : > { %23476 = vmatprep.mubr.msk.f32.mxu0 %vm23938_vm0, %v23937_v0  ;;  %23472 = vmatmul.mubr.msk.f32.vlgmr.msra.gmra.mrb[182].mxu1 %vm222_vm2, %v25695_v23  ;;  %v14868_v8 = vpop.permute.xlu1 %14867 }
 0x220   : > { %23477 = vmatmul.mubr.msk.f32.vlgmr.msra.gmra.mrb[184].mxu0 %vm222_vm2, %v25768_v47  ;;  %23479 = vmatprep.subr.mxu1 %v23937_v0 }
 0x221   : > { %23480 = vmatpush3.msk.msra.mxu1 %vm226_vm1, %v14418_v39  ;;  %23484 = vmatprep.subr.mxu0 %v23937_v0  ;;  %v21938_v39 = vld [vmem:[%s23987_s20 + $0x20] sm:$0xf] }
 0x222   : > { %23481 = vmatprep.mubr.msk.f32.mxu1 %vm23938_vm0, %v23937_v0  ;;  %23485 = vmatpush3.msk.msra.mxu0 %vm226_vm1, %v14493_v45  ;;  %v7249_v57 = vpop.f32.mrb[90].mxu1  ;;  %v7324_v58 = vpop.f32.mrb[92].mxu0  ;;  %v21939_v45 = vld [vmem:[%s23987_s20 + $0x24] sm:$0xf] }
 0x223   : > { %23486 = vmatprep.mubr.msk.f32.mxu0 %vm23938_vm0, %v23937_v0  ;;  %23482 = vmatmul.mubr.msk.f32.vlgmr.msra.gmra.mrb[184].mxu1 %vm222_vm2, %v25768_v47  ;;  %v25796_v59 = vadd.f32 %v7249_v57, %v25706_v27  ;;  %v25799_v55 = vadd.f32 %v7324_v58, %v25709_v28  ;;  %v23013_v61 = vpop.f32.mrb[91].mxu1  ;;  %v23018_v62 = vpop.f32.mrb[93].mxu0  ;;  %v21759_v27 = vld [vmem:[%s23987_s20 + $0x5c] sm:$0xf]  ;;  %v21936_v28 = vld [vmem:[%s23987_s20 + $0x18] sm:$0xf] }
 0x224   : > { %23487 = vmatmul.mubr.msk.f32.vlgmr.msra.gmra.mrb[186].mxu0 %vm222_vm2, %v25768_v47  ;;  %23489 = vmatprep.subr.mxu1 %v23937_v0  ;;  %v21764_v58 = vld [vmem:[%s23987_s20 + $0x70] sm:$0xf]  ;;  %v21782_v62 = vld [vmem:[%s23987_s20 + $0x7c] sm:$0xf] }
 0x225   : > { %23490 = vmatpush3.msk.msra.mxu1 %vm226_vm1, %v14568_v50  ;;  %23494 = vmatprep.subr.mxu0 %v23937_v0 }
 0x226   : > { %23491 = vmatprep.mubr.msk.f32.mxu1 %vm23938_vm0, %v23937_v0  ;;  %23495 = vmatpush3.msk.msra.mxu0 %vm226_vm1, %v14643_v53  ;;  %v7399_v1 = vpop.f32.mrb[92].mxu1  ;;  %v21958_v53 = vld [vmem:[%s23987_s20 + $0x34] sm:$0xf] }
 0x227   : > { %23496 = vmatprep.mubr.msk.f32.mxu0 %vm23938_vm0, %v23937_v0  ;;  %23492 = vmatmul.mubr.msk.f32.vlgmr.msra.gmra.mrb[186].mxu1 %vm222_vm2, %v25768_v47  ;;  %v25814_v2 = vadd.f32 %v7399_v1, %v25728_v35  ;;  %v7474_v3 = vpop.f32.mrb[94].mxu0  ;;  %v23023_v4 = vpop.f32.mrb[93].mxu1  ;;  %v21959_v1 = vld [vmem:[%s23987_s20 + $0x38] sm:$0xf] }
 0x228   : > { %23497 = vmatmul.mubr.msk.f32.vlgmr.msra.gmra.mrb[188].mxu0 %vm222_vm2, %v25768_v47  ;;  %23499 = vmatprep.subr.mxu1 %v23937_v0  ;;  %v25821_v6 = vadd.f32 %v7474_v3, %v25731_v36  ;;  %v23028_v7 = vpop.f32.mrb[95].mxu0  ;;  %v21760_v36 = vld [vmem:[%s23987_s20 + $0x60] sm:$0xf] }
 0x229   : > { %23500 = vmatpush3.msk.msra.mxu1 %vm226_vm1, %v14718_v63  ;;  %23504 = vmatprep.subr.mxu0 %v23937_v0  ;;  %v25960_v3 = vld [vmem:[%s26717_s2 + $0x40] sm:$0xf] }
 0x22a   : > { %23501 = vmatprep.mubr.msk.f32.mxu1 %vm23938_vm0, %v23937_v0  ;;  %23505 = vmatpush3.msk.msra.mxu0 %vm226_vm1, %v14793_v60  ;;  %v7549_v10 = vpop.f32.mrb[94].mxu1 }
 0x22b   : > { %23506 = vmatprep.mubr.msk.f32.mxu0 %vm23938_vm0, %v23937_v0  ;;  %19245 = vrot.lane.b32.xlu0 %v21932_v5, %s23939_s21  ;;  %v25833_v11 = vadd.f32 %v7549_v10, %v25748_v42  ;;  %v7645_v12 = vpop.f32.mrb[96].mxu0  ;;  %v23033_v13 = vpop.f32.mrb[95].mxu1  ;;  %v21960_v5 = vld [vmem:[%s23987_s20 + $0x3c] sm:$0xf] }
 0x22c   : > { %23502 = vmatmul.mubr.msk.f32.vlgmr.msra.gmra.mrb[188].mxu1 %vm222_vm2, %v25768_v47  ;;  %23507 = vmatmul.mubr.msk.f32.vlgmr.msra.gmra.mrb[190].mxu0 %vm222_vm2, %v25768_v47  ;;  %v25841_v15 = vadd.f32 %v7645_v12, %v25751_v43  ;;  %v23038_v16 = vpop.f32.mrb[97].mxu0  ;;  %v21784_v13 = vld [vmem:[%s23987_s20 + $0x84] sm:$0xf] }
 0x22d   : > { %23509 = vmatprep.subr.mxu1 %v23937_v0  ;;  %19323 = vrot.lane.b32.xlu1 %v21933_v9, %s23939_s21  ;;  %v21783_v9 = vld [vmem:[%s23987_s20 + $0x80] sm:$0xf] }
 0x22e   : > { %23510 = vmatpush3.msk.msra.mxu1 %vm226_vm1, %v14868_v8  ;;  %23514 = vmatprep.subr.mxu0 %v23937_v0  ;;  %v7720_v19 = vpop.f32.mrb[96].mxu1 }
 0x22f   : > { %23511 = vmatprep.mubr.msk.f32.mxu1 %vm23938_vm0, %v23937_v0  ;;  %23515 = vmatpush3.msk.msra.mxu0 %vm226_vm1, %v21757_v14  ;;  %v25858_v21 = vadd.f32 %v7720_v19, %v25774_v51  ;;  %v7795_v22 = vpop.f32.mrb[98].mxu0  ;;  %v23043_v23 = vpop.f32.mrb[97].mxu1  ;;  %v21961_v14 = vld [vmem:[%s23987_s20 + $0x40] sm:$0xf] }
 0x230   : > { %23516 = vmatprep.mubr.msk.f32.mxu0 %vm23938_vm0, %v23937_v0  ;;  %19398 = vrot.lane.b32.xlu0 %v21934_v17, %s23939_s21  ;;  %v25865_v25 = vadd.f32 %v7795_v22, %v25777_v52  ;;  %v23048_v26 = vpop.f32.mrb[99].mxu0  ;;  %v21957_v52 = vld [vmem:[%s23987_s20 + $0x30] sm:$0xf]  ;;  %v21785_v23 = vld [vmem:[%s23987_s20 + $0x88] sm:$0xf] }
 0x231   : > { %23512 = vmatmul.mubr.msk.f32.vlgmr.msra.gmra.mrb[190].mxu1 %vm222_vm2, %v25768_v47  ;;  %23517 = vmatmul.mubr.msk.f32.vlgmr.msra.gmra.mrb[192].mxu0 %vm222_vm2, %v25851_v18  ;;  %v21963_v26 = vld [vmem:[%s23987_s20 + $0x48] sm:$0xf] }
 0x232   : > { %23519 = vmatprep.subr.mxu1 %v23937_v0  ;;  %19473 = vrot.lane.b32.xlu1 %v21935_v20, %s23939_s21  ;;  %v7870_v29 = vpop.f32.mrb[98].mxu1 }
 0x233   : > { %23520 = vmatpush3.msk.msra.mxu1 %vm226_vm1, %v21758_v24  ;;  %23524 = vmatprep.subr.mxu0 %v23937_v0  ;;  %v25878_v30 = vadd.f32 %v7870_v29, %v25796_v59  ;;  %v7945_v31 = vpop.f32.mrb[100].mxu0  ;;  %v23053_v32 = vpop.f32.mrb[99].mxu1 }
 0x234   : > { %23521 = vmatprep.mubr.msk.f32.mxu1 %vm23938_vm0, %v23937_v0  ;;  %23525 = vmatpush3.msk.msra.mxu0 %vm226_vm1, %v21759_v27  ;;  %v25885_v34 = vadd.f32 %v7945_v31, %v25799_v55  ;;  %v23058_v35 = vpop.f32.mrb[101].mxu0 }
 0x235   : > { %23526 = vmatprep.mubr.msk.f32.mxu0 %vm23938_vm0, %v23937_v0  ;;  %19548 = vrot.lane.b32.xlu0 %v21936_v28, %s23939_s21 }
 0x236   : > { %23522 = vmatmul.mubr.msk.f32.vlgmr.msra.gmra.mrb[192].mxu1 %vm222_vm2, %v25851_v18  ;;  %23527 = vmatmul.mubr.msk.f32.vlgmr.msra.gmra.mrb[194].mxu0 %vm222_vm2, %v25851_v18  ;;  %v8020_v38 = vpop.f32.mrb[100].mxu1 }
 0x237   : > { %23529 = vmatprep.subr.mxu1 %v23937_v0  ;;  %19623 = vrot.lane.b32.xlu1 %v21937_v33, %s23939_s21  ;;  %v25900_v40 = vadd.f32 %v8020_v38, %v25814_v2  ;;  %v8095_v41 = vpop.f32.mrb[102].mxu0  ;;  %v23063_v42 = vpop.f32.mrb[101].mxu1  ;;  %v21982_v38 = vld [vmem:[%s23987_s20 + $0x8] sm:$0xf] }
 0x238   : > { %23530 = vmatpush3.msk.msra.mxu1 %vm226_vm1, %v21760_v36  ;;  %23534 = vmatprep.subr.mxu0 %v23937_v0  ;;  %v25905_v43 = vadd.f32 %v8095_v41, %v25821_v6  ;;  %v23068_v44 = vpop.f32.mrb[103].mxu0  ;;  %v21983_v42 = vld [vmem:[%s23987_s20 + $0xc] sm:$0xf] }
 0x239   : > { %23531 = vmatprep.mubr.msk.f32.mxu1 %vm23938_vm0, %v23937_v0  ;;  %23535 = vmatpush3.msk.msra.mxu0 %vm226_vm1, %v21761_v37  ;;  %v21788_v37 = vld [vmem:[%s23987_s20 + $0x94] sm:$0xf] }
 0x23a   : > { %23536 = vmatprep.mubr.msk.f32.mxu0 %vm23938_vm0, %v23937_v0  ;;  %19698 = vrot.lane.b32.xlu0 %v21938_v39, %s23939_s21  ;;  %v8170_v47 = vpop.f32.mrb[102].mxu1 }
 0x23b   : > { %23532 = vmatmul.mubr.msk.f32.vlgmr.msra.gmra.mrb[194].mxu1 %vm222_vm2, %v25851_v18  ;;  %23537 = vmatmul.mubr.msk.f32.vlgmr.msra.gmra.mrb[196].mxu0 %vm222_vm2, %v25851_v18  ;;  %v25921_v49 = vadd.f32 %v8170_v47, %v25833_v11  ;;  %v8266_v50 = vpop.f32.mrb[104].mxu0  ;;  %v23073_v51 = vpop.f32.mrb[103].mxu1 }
 0x23c   : > { %23539 = vmatprep.subr.mxu1 %v23937_v0  ;;  %19773 = vrot.lane.b32.xlu1 %v21939_v45, %s23939_s21  ;;  %v25927_v54 = vadd.f32 %v8266_v50, %v25841_v15  ;;  %v23078_v56 = vpop.f32.mrb[105].mxu0  ;;  %v26074_v50 = vld [vmem:[%s26717_s2 + $0x44] sm:$0xf] }
 0x23d   : > { %23540 = vmatpush3.msk.msra.mxu1 %vm226_vm1, %v21762_v46  ;;  %23544 = vmatprep.subr.mxu0 %v23937_v0  ;;  %v21789_v46 = vld [vmem:[%s23987_s20 + $0x98] sm:$0xf] }
 0x23e   : > { %23541 = vmatprep.mubr.msk.f32.mxu1 %vm23938_vm0, %v23937_v0  ;;  %23545 = vmatpush3.msk.msra.mxu0 %vm226_vm1, %v21763_v48  ;;  %v8341_v57 = vpop.f32.mrb[104].mxu1 }
 0x23f   : > { %23546 = vmatprep.mubr.msk.f32.mxu0 %vm23938_vm0, %v23937_v0  ;;  %19866 = vrot.lane.b32.xlu0 %v21957_v52, %s23939_s21  ;;  %v25940_v59 = vadd.f32 %v8341_v57, %v25858_v21  ;;  %v8416_v55 = vpop.f32.mrb[106].mxu0  ;;  %v23083_v61 = vpop.f32.mrb[105].mxu1 }
 0x240   : > { %23542 = vmatmul.mubr.msk.f32.vlgmr.msra.gmra.mrb[196].mxu1 %vm222_vm2, %v25851_v18  ;;  %23547 = vmatmul.mubr.msk.f32.vlgmr.msra.gmra.mrb[198].mxu0 %vm222_vm2, %v25851_v18  ;;  %v25948_v63 = vadd.f32 %v8416_v55, %v25865_v25  ;;  %v23088_v60 = vpop.f32.mrb[107].mxu0  ;;  %v21786_v25 = vld [vmem:[%s23987_s20 + $0x8c] sm:$0xf]  ;;  %v21986_v55 = vld [vmem:[%s23987_s20 + $0x18] sm:$0xf] }
 0x241   : > { %23549 = vmatprep.subr.mxu1 %v23937_v0  ;;  %19944 = vrot.lane.b32.xlu1 %v21958_v53, %s23939_s21  ;;  %v25953_v2 = vpop.permute.xlu0 %16170  ;;  %v21987_v60 = vld [vmem:[%s23987_s20 + $0x1c] sm:$0xf] }
 0x242   : > { %23550 = vmatpush3.msk.msra.mxu1 %vm226_vm1, %v21764_v58  ;;  %23554 = vmatprep.subr.mxu0 %v23937_v0  ;;  %v8491_v4 = vpop.f32.mrb[106].mxu1 }
 0x243   : > { %23551 = vmatprep.mubr.msk.f32.mxu1 %vm23938_vm0, %v23937_v0  ;;  %23555 = vmatpush3.msk.msra.mxu0 %vm226_vm1, %v21782_v62  ;;  %v25966_v6 = vpop.permute.xlu1 %16248  ;;  %v25969_v7 = vadd.f32 %v8491_v4, %v25878_v30  ;;  %v8566_v8 = vpop.f32.mrb[108].mxu0  ;;  %v21964_v30 = vld [vmem:[%s23987_s20 + $0x4c] sm:$0xf] }
 0x244   : > { %23556 = vmatprep.mubr.msk.f32.mxu0 %vm23938_vm0, %v23937_v0  ;;  %20019 = vrot.lane.b32.xlu0 %v21959_v1, %s23939_s21  ;;  %v25976_v10 = vadd.f32 %v8566_v8, %v25885_v34  ;;  %v23093_v11 = vpop.f32.mrb[107].mxu1  ;;  %v23098_v12 = vpop.f32.mrb[109].mxu0  ;;  %v21787_v34 = vld [vmem:[%s23987_s20 + $0x90] sm:$0xf] }
 0x245   : > { %23552 = vmatmul.mubr.msk.f32.vlgmr.msra.gmra.mrb[198].mxu1 %vm222_vm2, %v25851_v18  ;;  %23557 = vmatmul.mubr.msk.f32.vlgmr.msra.gmra.mrb[200].mxu0 %vm222_vm2, %v25960_v3  ;;  %v21962_v18 = vld [vmem:[%s23987_s20 + $0x44] sm:$0xf] }
 0x246   : > { %23559 = vmatprep.subr.mxu1 %v23937_v0  ;;  %20094 = vrot.lane.b32.xlu1 %v21960_v5, %s23939_s21  ;;  %v25986_v15 = vpop.permute.xlu0 %16323 }
 0x247   : > { %23560 = vmatpush3.msk.msra.mxu1 %vm226_vm1, %v21783_v9  ;;  %23564 = vmatprep.subr.mxu0 %v23937_v0  ;;  %v8641_v16 = vpop.f32.mrb[108].mxu1  ;;  %v8716_v17 = vpop.f32.mrb[110].mxu0  ;;  %v21989_v9 = vld [vmem:[%s23987_s20 + $0x24] sm:$0xf] }
 0x248   : > { %23561 = vmatprep.mubr.msk.f32.mxu1 %vm23938_vm0, %v23937_v0  ;;  %23565 = vmatpush3.msk.msra.mxu0 %vm226_vm1, %v21784_v13  ;;  %v25994_v19 = vpop.permute.xlu1 %16398  ;;  %v25997_v20 = vadd.f32 %v8641_v16, %v25900_v40  ;;  %v26000_v21 = vadd.f32 %v8716_v17, %v25905_v43  ;;  %v23103_v22 = vpop.f32.mrb[109].mxu1 }
 0x249   : > { %23566 = vmatprep.mubr.msk.f32.mxu0 %vm23938_vm0, %v23937_v0  ;;  %20169 = vrot.lane.b32.xlu0 %v21961_v14, %s23939_s21  ;;  %v23108_v24 = vpop.f32.mrb[111].mxu0 }
 0x24a   : > { %23562 = vmatmul.mubr.msk.f32.vlgmr.msra.gmra.mrb[200].mxu1 %vm222_vm2, %v25960_v3  ;;  %23567 = vmatmul.mubr.msk.f32.vlgmr.msra.gmra.mrb[202].mxu0 %vm222_vm2, %v25960_v3 }
 0x24b   : > { %23569 = vmatprep.subr.mxu1 %v23937_v0  ;;  %20244 = vrot.lane.b32.xlu1 %v21962_v18, %s23939_s21  ;;  %v26014_v27 = vpop.permute.xlu0 %16473 }
 0x24c   : > { %23570 = vmatpush3.msk.msra.mxu1 %vm226_vm1, %v21785_v23  ;;  %23574 = vmatprep.subr.mxu0 %v23937_v0  ;;  %v8791_v28 = vpop.f32.mrb[110].mxu1  ;;  %v8885_v29 = vpop.f32.mrb[112].mxu0  ;;  %v26174_v23 = vld [vmem:[%s26717_s2 + $0x48] sm:$0xf] }
 0x24d   : > { %23571 = vmatprep.mubr.msk.f32.mxu1 %vm23938_vm0, %v23937_v0  ;;  %23575 = vmatpush3.msk.msra.mxu0 %vm226_vm1, %v21786_v25  ;;  %v26023_v31 = vadd.f32 %v8791_v28, %v25921_v49  ;;  %v26026_v32 = vadd.f32 %v8885_v29, %v25927_v54  ;;  %v23113_v33 = vpop.f32.mrb[111].mxu1  ;;  %v26032_v35 = vpop.permute.xlu1 %16548  ;;  %v21984_v49 = vld [vmem:[%s23987_s20 + $0x10] sm:$0xf]  ;;  %v21985_v54 = vld [vmem:[%s23987_s20 + $0x14] sm:$0xf] }
 0x24e   : > { %23576 = vmatprep.mubr.msk.f32.mxu0 %vm23938_vm0, %v23937_v0  ;;  %20319 = vrot.lane.b32.xlu0 %v21963_v26, %s23939_s21  ;;  %v23118_v36 = vpop.f32.mrb[113].mxu0 }
 0x24f   : > { %23572 = vmatmul.mubr.msk.f32.vlgmr.msra.gmra.mrb[202].mxu1 %vm222_vm2, %v25960_v3  ;;  %23577 = vmatmul.mubr.msk.f32.vlgmr.msra.gmra.mrb[204].mxu0 %vm222_vm2, %v25960_v3 }
 0x250   : > { %23579 = vmatprep.subr.mxu1 %v23937_v0  ;;  %20394 = vrot.lane.b32.xlu1 %v21964_v30, %s23939_s21  ;;  %v26042_v39 = vpop.permute.xlu0 %16623 }
 0x251   : > { %23580 = vmatpush3.msk.msra.mxu1 %vm226_vm1, %v21787_v34  ;;  %23584 = vmatprep.subr.mxu0 %v23937_v0  ;;  %v8958_v40 = vpop.f32.mrb[112].mxu1  ;;  %v9031_v41 = vpop.f32.mrb[114].mxu0 }
 0x252   : > { %23581 = vmatprep.mubr.msk.f32.mxu1 %vm23938_vm0, %v23937_v0  ;;  %23585 = vmatpush3.msk.msra.mxu0 %vm226_vm1, %v21788_v37  ;;  %v26051_v43 = vadd.f32 %v8958_v40, %v25940_v59  ;;  %v26054_v44 = vadd.f32 %v9031_v41, %v25948_v63  ;;  %v23123_v45 = vpop.f32.mrb[113].mxu1  ;;  %v23128_v47 = vpop.f32.mrb[115].mxu0 }
 0x253   : > { %23586 = vmatprep.mubr.msk.f32.mxu0 %vm23938_vm0, %v23937_v0  ;;  %20487 = vrot.lane.b32.xlu0 %v21982_v38, %s23940_s8  ;;  %v26064_v48 = vpop.permute.xlu1 %16698  ;;  %v26247_v47 = vld [vmem:[%s26717_s2 + $0x4c] sm:$0xf] }
 0x254   : > { %23582 = vmatmul.mubr.msk.f32.vlgmr.msra.gmra.mrb[204].mxu1 %vm222_vm2, %v25960_v3  ;;  %23587 = vmatmul.mubr.msk.f32.vlgmr.msra.gmra.mrb[206].mxu0 %vm222_vm2, %v25960_v3 }
 0x255   : > { %23589 = vmatprep.subr.mxu1 %v23937_v0  ;;  %20565 = vrot.lane.b32.xlu1 %v21983_v42, %s23940_s8  ;;  %v26081_v56 = vpop.permute.xlu0 %16791 }
 0x256   : > { %23590 = vmatpush3.msk.msra.mxu1 %vm226_vm1, %v21789_v46  ;;  %23594 = vmatprep.subr.mxu0 %v23937_v0  ;;  %v9104_v51 = vpop.f32.mrb[114].mxu1  ;;  %v9177_v52 = vpop.f32.mrb[116].mxu0 }
 0x257   : > { %23591 = vmatprep.mubr.msk.f32.mxu1 %vm23938_vm0, %v23937_v0  ;;  %23595 = vmatpush3.msk.msra.mxu0 %vm226_vm1, %v25953_v2  ;;  %v26084_v53 = vadd.f32 %v9104_v51, %v25969_v7  ;;  %v26087_v57 = vadd.f32 %v9177_v52, %v25976_v10  ;;  %v23133_v58 = vpop.f32.mrb[115].mxu1  ;;  %v23138_v59 = vpop.f32.mrb[117].mxu0 }
 0x258   : > { %23596 = vmatprep.mubr.msk.f32.mxu0 %vm23938_vm0, %v23937_v0  ;;  %20640 = vrot.lane.b32.xlu0 %v21984_v49, %s23940_s8  ;;  %v26099_v61 = vpop.permute.xlu1 %16869 }
 0x259   : > { %23592 = vmatmul.mubr.msk.f32.vlgmr.msra.gmra.mrb[206].mxu1 %vm222_vm2, %v25960_v3  ;;  %23597 = vmatmul.mubr.msk.f32.vlgmr.msra.gmra.mrb[208].mxu0 %vm222_vm2, %v26074_v50 }
 0x25a   : > { %23599 = vmatprep.subr.mxu1 %v23937_v0  ;;  %20715 = vrot.lane.b32.xlu1 %v21985_v54, %s23940_s8  ;;  %v16945_v4 = vpop.permute.xlu0 %16944 }
 0x25b   : > { %23600 = vmatpush3.msk.msra.mxu1 %vm226_vm1, %v25966_v6  ;;  %23604 = vmatprep.subr.mxu0 %v23937_v0  ;;  %v9250_v62 = vpop.f32.mrb[116].mxu1  ;;  %v9323_v63 = vpop.f32.mrb[118].mxu0  ;;  %v21988_v6 = vld [vmem:[%s23987_s20 + $0x20] sm:$0xf] }
 0x25c   : > { %23601 = vmatprep.mubr.msk.f32.mxu1 %vm23938_vm0, %v23937_v0  ;;  %23605 = vmatpush3.msk.msra.mxu0 %vm226_vm1, %v25986_v15  ;;  %v26110_v1 = vadd.f32 %v9250_v62, %v25997_v20  ;;  %v26113_v2 = vadd.f32 %v9323_v63, %v26000_v21  ;;  %v23143_v3 = vpop.f32.mrb[117].mxu1  ;;  %v23148_v5 = vpop.f32.mrb[119].mxu0 }
 0x25d   : > { %23606 = vmatprep.mubr.msk.f32.mxu0 %vm23938_vm0, %v23937_v0  ;;  %20790 = vrot.lane.b32.xlu0 %v21986_v55, %s23940_s8  ;;  %v17020_v10 = vpop.permute.xlu1 %17019 }
 0x25e   : > { %23602 = vmatmul.mubr.msk.f32.vlgmr.msra.gmra.mrb[208].mxu1 %vm222_vm2, %v26074_v50  ;;  %23607 = vmatmul.mubr.msk.f32.vlgmr.msra.gmra.mrb[210].mxu0 %vm222_vm2, %v26074_v50 }
 0x25f   : > { %23609 = vmatprep.subr.mxu1 %v23937_v0  ;;  %20865 = vrot.lane.b32.xlu1 %v21987_v60, %s23940_s8  ;;  %v17095_v15 = vpop.permute.xlu0 %17094 }
 0x260   : > { %23610 = vmatpush3.msk.msra.mxu1 %vm226_vm1, %v25994_v19  ;;  %23614 = vmatprep.subr.mxu0 %v23937_v0  ;;  %v9396_v7 = vpop.f32.mrb[118].mxu1  ;;  %v9490_v8 = vpop.f32.mrb[120].mxu0 }
 0x261   : > { %23611 = vmatprep.mubr.msk.f32.mxu1 %vm23938_vm0, %v23937_v0  ;;  %23615 = vmatpush3.msk.msra.mxu0 %vm226_vm1, %v26014_v27  ;;  %v26134_v11 = vadd.f32 %v9396_v7, %v26023_v31  ;;  %v26137_v12 = vadd.f32 %v9490_v8, %v26026_v32  ;;  %v23153_v13 = vpop.f32.mrb[119].mxu1  ;;  %v23158_v14 = vpop.f32.mrb[121].mxu0 }
 0x262   : > { %23616 = vmatprep.mubr.msk.f32.mxu0 %vm23938_vm0, %v23937_v0  ;;  %20940 = vrot.lane.b32.xlu0 %v21988_v6, %s23940_s8  ;;  %v17170_v21 = vpop.permute.xlu1 %17169 }
 0x263   : > { %23612 = vmatmul.mubr.msk.f32.vlgmr.msra.gmra.mrb[210].mxu1 %vm222_vm2, %v26074_v50  ;;  %23617 = vmatmul.mubr.msk.f32.vlgmr.msra.gmra.mrb[212].mxu0 %vm222_vm2, %v26074_v50 }
 0x264   : > { %23619 = vmatprep.subr.mxu1 %v23937_v0  ;;  %21015 = vrot.lane.b32.xlu1 %v21989_v9, %s23940_s8  ;;  %v17245_v24 = vpop.permute.xlu0 %17244  ;;  %v21882_v9 = vld [vmem:[%s23987_s20 + $0x8] sm:$0xf] }
 0x265   : > { %23620 = vmatpush3.msk.msra.mxu1 %vm226_vm1, %v26032_v35  ;;  %23624 = vmatprep.subr.mxu0 %v23937_v0  ;;  %v9563_v16 = vpop.f32.mrb[120].mxu1  ;;  %v9636_v17 = vpop.f32.mrb[122].mxu0 }
 0x266   : > { %23621 = vmatprep.mubr.msk.f32.mxu1 %vm23938_vm0, %v23937_v0  ;;  %23625 = vmatpush3.msk.msra.mxu0 %vm226_vm1, %v26042_v39  ;;  %v26156_v18 = vadd.f32 %v9563_v16, %v26051_v43  ;;  %v26159_v19 = vadd.f32 %v9636_v17, %v26054_v44  ;;  %v23163_v20 = vpop.f32.mrb[121].mxu1  ;;  %v23168_v22 = vpop.f32.mrb[123].mxu0  ;;  %v21883_v16 = vld [vmem:[%s23987_s20 + $0xc] sm:$0xf] }
 0x267   : > { %23626 = vmatprep.mubr.msk.f32.mxu0 %vm23938_vm0, %v23937_v0  ;;  %23622 = vmatmul.mubr.msk.f32.vlgmr.msra.gmra.mrb[212].mxu1 %vm222_vm2, %v26074_v50  ;;  %v17320_v31 = vpop.permute.xlu1 %17319 }
 0x268   : > { %23627 = vmatmul.mubr.msk.f32.vlgmr.msra.gmra.mrb[214].mxu0 %vm222_vm2, %v26074_v50  ;;  %23629 = vmatprep.subr.mxu1 %v23937_v0 }
 0x269   : > { %23630 = vmatpush3.msk.msra.mxu1 %vm226_vm1, %v26064_v48  ;;  %23634 = vmatprep.subr.mxu0 %v23937_v0  ;;  %v17413_v34 = vpop.permute.xlu0 %17412 }
 0x26a   : > { %23631 = vmatprep.mubr.msk.f32.mxu1 %vm23938_vm0, %v23937_v0  ;;  %23635 = vmatpush3.msk.msra.mxu0 %vm226_vm1, %v26081_v56  ;;  %v9709_v25 = vpop.f32.mrb[122].mxu1  ;;  %v9782_v26 = vpop.f32.mrb[124].mxu0 }
 0x26b   : > { %23636 = vmatprep.mubr.msk.f32.mxu0 %vm23938_vm0, %v23937_v0  ;;  %23632 = vmatmul.mubr.msk.f32.vlgmr.msra.gmra.mrb[214].mxu1 %vm222_vm2, %v26074_v50  ;;  %v26185_v27 = vadd.f32 %v9709_v25, %v26084_v53  ;;  %v26188_v28 = vadd.f32 %v9782_v26, %v26087_v57  ;;  %v23173_v29 = vpop.f32.mrb[123].mxu1  ;;  %v23178_v30 = vpop.f32.mrb[125].mxu0  ;;  %v21886_v26 = vld [vmem:[%s23987_s20 + $0x18] sm:$0xf] }
 0x26c   : > { %23637 = vmatmul.mubr.msk.f32.vlgmr.msra.gmra.mrb[216].mxu0 %vm222_vm2, %v26174_v23  ;;  %23639 = vmatprep.subr.mxu1 %v23937_v0  ;;  %v17491_v39 = vpop.permute.xlu1 %17490 }
 0x26d   : > { %23640 = vmatpush3.msk.msra.mxu1 %vm226_vm1, %v26099_v61  ;;  %23644 = vmatprep.subr.mxu0 %v23937_v0 }
 0x26e   : > { %23641 = vmatprep.mubr.msk.f32.mxu1 %vm23938_vm0, %v23937_v0  ;;  %23645 = vmatpush3.msk.msra.mxu0 %vm226_vm1, %v16945_v4  ;;  %v17566_v45 = vpop.permute.xlu0 %17565 }
 0x26f   : > { %23646 = vmatprep.mubr.msk.f32.mxu0 %vm23938_vm0, %v23937_v0  ;;  %23642 = vmatmul.mubr.msk.f32.vlgmr.msra.gmra.mrb[216].mxu1 %vm222_vm2, %v26174_v23  ;;  %v9855_v32 = vpop.f32.mrb[124].mxu1  ;;  %v9928_v33 = vpop.f32.mrb[126].mxu0 }
 0x270   : > { %23647 = vmatmul.mubr.msk.f32.vlgmr.msra.gmra.mrb[218].mxu0 %vm222_vm2, %v26174_v23  ;;  %23649 = vmatprep.subr.mxu1 %v23937_v0  ;;  %v26207_v35 = vadd.f32 %v9855_v32, %v26110_v1  ;;  %v26210_v36 = vadd.f32 %v9928_v33, %v26113_v2  ;;  %v23183_v37 = vpop.f32.mrb[125].mxu1  ;;  %v23188_v38 = vpop.f32.mrb[127].mxu0  ;;  %v21887_v32 = vld [vmem:[%s23987_s20 + $0x1c] sm:$0xf] }
 0x271   : > { %23650 = vmatpush3.msk.msra.mxu1 %vm226_vm1, %v17020_v10  ;;  %23654 = vmatprep.subr.mxu0 %v23937_v0  ;;  %v17641_v50 = vpop.permute.xlu1 %17640 }
 0x272   : > { %23651 = vmatprep.mubr.msk.f32.mxu1 %vm23938_vm0, %v23937_v0  ;;  %23655 = vmatpush3.msk.msra.mxu0 %vm226_vm1, %v17095_v15  ;;  %v26325_v15 = vld [vmem:[%s26717_s2 + $0x50] sm:$0xf] }
 0x273   : > { %23656 = vmatprep.mubr.msk.f32.mxu0 %vm23938_vm0, %v23937_v0  ;;  %23652 = vmatmul.mubr.msk.f32.vlgmr.msra.gmra.mrb[218].mxu1 %vm222_vm2, %v26174_v23  ;;  %v17716_v53 = vpop.permute.xlu0 %17715 }
 0x274   : > { %23657 = vmatmul.mubr.msk.f32.vlgmr.msra.gmra.mrb[220].mxu0 %vm222_vm2, %v26174_v23  ;;  %23659 = vmatprep.subr.mxu1 %v23937_v0  ;;  %v10001_v40 = vpop.f32.mrb[126].mxu1  ;;  %v10097_v41 = vpop.f32.mrb[128].mxu0 }
 0x275   : > { %23660 = vmatpush3.msk.msra.mxu1 %vm226_vm1, %v17170_v21  ;;  %23664 = vmatprep.subr.mxu0 %v23937_v0  ;;  %v26227_v42 = vadd.f32 %v10001_v40, %v26134_v11  ;;  %v26230_v43 = vadd.f32 %v10097_v41, %v26137_v12  ;;  %v23193_v44 = vpop.f32.mrb[127].mxu1  ;;  %v23198_v46 = vpop.f32.mrb[129].mxu0  ;;  %v21889_v40 = vld [vmem:[%s23987_s20 + $0x24] sm:$0xf] }
 0x276   : > { %23661 = vmatprep.mubr.msk.f32.mxu1 %vm23938_vm0, %v23937_v0  ;;  %23665 = vmatpush3.msk.msra.mxu0 %vm226_vm1, %v17245_v24  ;;  %v17791_v63 = vpop.permute.xlu1 %17790  ;;  %v21885_v24 = vld [vmem:[%s23987_s20 + $0x14] sm:$0xf] }
 0x277   : > { %23666 = vmatprep.mubr.msk.f32.mxu0 %vm23938_vm0, %v23937_v0  ;;  %23662 = vmatmul.mubr.msk.f32.vlgmr.msra.gmra.mrb[220].mxu1 %vm222_vm2, %v26174_v23 }
 0x278   : > { %23667 = vmatmul.mubr.msk.f32.vlgmr.msra.gmra.mrb[222].mxu0 %vm222_vm2, %v26174_v23  ;;  %23669 = vmatprep.subr.mxu1 %v23937_v0  ;;  %v17866_v60 = vpop.permute.xlu0 %17865 }
 0x279   : > { %23670 = vmatpush3.msk.msra.mxu1 %vm226_vm1, %v17320_v31  ;;  %23674 = vmatprep.subr.mxu0 %v23937_v0  ;;  %v10172_v48 = vpop.f32.mrb[128].mxu1  ;;  %v10247_v49 = vpop.f32.mrb[130].mxu0 }
 0x27a   : > { %23671 = vmatprep.mubr.msk.f32.mxu1 %vm23938_vm0, %v23937_v0  ;;  %23675 = vmatpush3.msk.msra.mxu0 %vm226_vm1, %v17413_v34  ;;  %v26253_v51 = vadd.f32 %v10172_v48, %v26156_v18  ;;  %v26256_v52 = vadd.f32 %v10247_v49, %v26159_v19  ;;  %v23203_v54 = vpop.f32.mrb[129].mxu1  ;;  %v23208_v56 = vpop.f32.mrb[131].mxu0  ;;  %v21884_v18 = vld [vmem:[%s23987_s20 + $0x10] sm:$0xf]  ;;  %v21888_v34 = vld [vmem:[%s23987_s20 + $0x20] sm:$0xf] }
 0x27b   : > { %23676 = vmatprep.mubr.msk.f32.mxu0 %vm23938_vm0, %v23937_v0  ;;  %23672 = vmatmul.mubr.msk.f32.vlgmr.msra.gmra.mrb[222].mxu1 %vm222_vm2, %v26174_v23  ;;  %v17941_v7 = vpop.permute.xlu1 %17940  ;;  %v26410_v48 = vld [vmem:[%s26717_s2 + $0x54] sm:$0xf] }
 0x27c   : > { %23677 = vmatmul.mubr.msk.f32.vlgmr.msra.gmra.mrb[224].mxu0 %vm222_vm2, %v26247_v47  ;;  %23679 = vmatprep.subr.mxu1 %v23937_v0  ;;  %v21908_v49 = vld [vmem:[%s23987_s20 + $0x34] sm:$0xf] }
 0x27d   : > { %23680 = vmatpush3.msk.msra.mxu1 %vm226_vm1, %v17491_v39  ;;  %23684 = vmatprep.subr.mxu0 %v23937_v0 }
 0x27e   : > { %23681 = vmatprep.mubr.msk.f32.mxu1 %vm23938_vm0, %v23937_v0  ;;  %23685 = vmatpush3.msk.msra.mxu0 %vm226_vm1, %v17566_v45  ;;  %v10322_v57 = vpop.f32.mrb[130].mxu1  ;;  %v10397_v58 = vpop.f32.mrb[132].mxu0 }
 0x27f   : > { %23686 = vmatprep.mubr.msk.f32.mxu0 %vm23938_vm0, %v23937_v0  ;;  %23682 = vmatmul.mubr.msk.f32.vlgmr.msra.gmra.mrb[224].mxu1 %vm222_vm2, %v26247_v47  ;;  %v26275_v59 = vadd.f32 %v10322_v57, %v26185_v27  ;;  %v26278_v55 = vadd.f32 %v10397_v58, %v26188_v28  ;;  %v23213_v61 = vpop.f32.mrb[131].mxu1  ;;  %v23218_v62 = vpop.f32.mrb[133].mxu0 }
 0x280   : > { %23687 = vmatmul.mubr.msk.f32.vlgmr.msra.gmra.mrb[226].mxu0 %vm222_vm2, %v26247_v47  ;;  %23689 = vmatprep.subr.mxu1 %v23937_v0  ;;  %v21911_v61 = vld [vmem:[%s23987_s20 + $0x40] sm:$0xf] }
 0x281   : > { %23690 = vmatpush3.msk.msra.mxu1 %vm226_vm1, %v17641_v50  ;;  %23694 = vmatprep.subr.mxu0 %v23937_v0 }
 0x282   : > { %23691 = vmatprep.mubr.msk.f32.mxu1 %vm23938_vm0, %v23937_v0  ;;  %23695 = vmatpush3.msk.msra.mxu0 %vm226_vm1, %v17716_v53  ;;  %v10472_v1 = vpop.f32.mrb[132].mxu1 }
 0x283   : > { %23696 = vmatprep.mubr.msk.f32.mxu0 %vm23938_vm0, %v23937_v0  ;;  %23692 = vmatmul.mubr.msk.f32.vlgmr.msra.gmra.mrb[226].mxu1 %vm222_vm2, %v26247_v47  ;;  %v26293_v2 = vadd.f32 %v10472_v1, %v26207_v35  ;;  %v10547_v3 = vpop.f32.mrb[134].mxu0  ;;  %v23223_v4 = vpop.f32.mrb[133].mxu1 }
 0x284   : > { %23697 = vmatmul.mubr.msk.f32.vlgmr.msra.gmra.mrb[228].mxu0 %vm222_vm2, %v26247_v47  ;;  %23699 = vmatprep.subr.mxu1 %v23937_v0  ;;  %v26299_v5 = vadd.f32 %v10547_v3, %v26210_v36  ;;  %v23228_v6 = vpop.f32.mrb[135].mxu0  ;;  %v21912_v4 = vld [vmem:[%s23987_s20 + $0x44] sm:$0xf] }
 0x285   : > { %23700 = vmatpush3.msk.msra.mxu1 %vm226_vm1, %v17791_v63  ;;  %23704 = vmatprep.subr.mxu0 %v23937_v0  ;;  %v21913_v6 = vld [vmem:[%s23987_s20 + $0x48] sm:$0xf] }
 0x286   : > { %23701 = vmatprep.mubr.msk.f32.mxu1 %vm23938_vm0, %v23937_v0  ;;  %23705 = vmatpush3.msk.msra.mxu0 %vm226_vm1, %v17866_v60  ;;  %v10622_v8 = vpop.f32.mrb[134].mxu1 }
 0x287   : > { %23706 = vmatprep.mubr.msk.f32.mxu0 %vm23938_vm0, %v23937_v0  ;;  %23702 = vmatmul.mubr.msk.f32.vlgmr.msra.gmra.mrb[228].mxu1 %vm222_vm2, %v26247_v47  ;;  %v26312_v10 = vadd.f32 %v10622_v8, %v26227_v42  ;;  %v10718_v11 = vpop.f32.mrb[136].mxu0  ;;  %v23233_v12 = vpop.f32.mrb[135].mxu1  ;;  %v21907_v42 = vld [vmem:[%s23987_s20 + $0x30] sm:$0xf] }
 0x288   : > { %23707 = vmatmul.mubr.msk.f32.vlgmr.msra.gmra.mrb[230].mxu0 %vm222_vm2, %v26247_v47  ;;  %23709 = vmatprep.subr.mxu1 %v23937_v0  ;;  %v26318_v13 = vadd.f32 %v10718_v11, %v26230_v43  ;;  %v23238_v14 = vpop.f32.mrb[137].mxu0 }
 0x289   : > { %23710 = vmatpush3.msk.msra.mxu1 %vm226_vm1, %v17941_v7  ;;  %23714 = vmatprep.subr.mxu0 %v23937_v0  ;;  %v21914_v14 = vld [vmem:[%s23987_s20 + $0x4c] sm:$0xf] }
 0x28a   : > { %23711 = vmatprep.mubr.msk.f32.mxu1 %vm23938_vm0, %v23937_v0  ;;  %23715 = vmatpush3.msk.msra.mxu0 %vm226_vm1, %v21882_v9  ;;  %v10793_v17 = vpop.f32.mrb[136].mxu1 }
 0x28b   : > { %23716 = vmatprep.mubr.msk.f32.mxu0 %vm23938_vm0, %v23937_v0  ;;  %23712 = vmatmul.mubr.msk.f32.vlgmr.msra.gmra.mrb[230].mxu1 %vm222_vm2, %v26247_v47  ;;  %v26337_v19 = vadd.f32 %v10793_v17, %v26253_v51  ;;  %v10868_v20 = vpop.f32.mrb[138].mxu0  ;;  %v23243_v21 = vpop.f32.mrb[137].mxu1  ;;  %v21909_v51 = vld [vmem:[%s23987_s20 + $0x38] sm:$0xf] }
 0x28c   : > { %23717 = vmatmul.mubr.msk.f32.vlgmr.msra.gmra.mrb[232].mxu0 %vm222_vm2, %v26325_v15  ;;  %23719 = vmatprep.subr.mxu1 %v23937_v0  ;;  %v26343_v22 = vadd.f32 %v10868_v20, %v26256_v52  ;;  %v23248_v23 = vpop.f32.mrb[139].mxu0 }
 0x28d   : > { %23720 = vmatpush3.msk.msra.mxu1 %vm226_vm1, %v21883_v16  ;;  %23724 = vmatprep.subr.mxu0 %v23937_v0 }
 0x28e   : > { %23721 = vmatprep.mubr.msk.f32.mxu1 %vm23938_vm0, %v23937_v0  ;;  %23725 = vmatpush3.msk.msra.mxu0 %vm226_vm1, %v21884_v18  ;;  %v10943_v25 = vpop.f32.mrb[138].mxu1  ;;  %v26488_v18 = vld [vmem:[%s26717_s2 + $0x58] sm:$0xf] }
 0x28f   : > { %23726 = vmatprep.mubr.msk.f32.mxu0 %vm23938_vm0, %v23937_v0  ;;  %23722 = vmatmul.mubr.msk.f32.vlgmr.msra.gmra.mrb[232].mxu1 %vm222_vm2, %v26325_v15  ;;  %v26357_v27 = vadd.f32 %v10943_v25, %v26275_v59  ;;  %v11018_v28 = vpop.f32.mrb[140].mxu0  ;;  %v23253_v29 = vpop.f32.mrb[139].mxu1  ;;  %v21910_v59 = vld [vmem:[%s23987_s20 + $0x3c] sm:$0xf] }
 0x290   : > { %23727 = vmatmul.mubr.msk.f32.vlgmr.msra.gmra.mrb[234].mxu0 %vm222_vm2, %v26325_v15  ;;  %23729 = vmatprep.subr.mxu1 %v23937_v0  ;;  %v26363_v30 = vadd.f32 %v11018_v28, %v26278_v55  ;;  %v23258_v31 = vpop.f32.mrb[141].mxu0 }
 0x291   : > { %23730 = vmatpush3.msk.msra.mxu1 %vm226_vm1, %v21885_v24  ;;  %23734 = vmatprep.subr.mxu0 %v23937_v0 }
 0x292   : > { %23731 = vmatprep.mubr.msk.f32.mxu1 %vm23938_vm0, %v23937_v0  ;;  %23735 = vmatpush3.msk.msra.mxu0 %vm226_vm1, %v21886_v26  ;;  %v11093_v33 = vpop.f32.mrb[140].mxu1 }
 0x293   : > { %23736 = vmatprep.mubr.msk.f32.mxu0 %vm23938_vm0, %v23937_v0  ;;  %23732 = vmatmul.mubr.msk.f32.vlgmr.msra.gmra.mrb[234].mxu1 %vm222_vm2, %v26325_v15  ;;  %v26377_v35 = vadd.f32 %v11093_v33, %v26293_v2  ;;  %v11168_v36 = vpop.f32.mrb[142].mxu0  ;;  %v23263_v37 = vpop.f32.mrb[141].mxu1 }
 0x294   : > { %23737 = vmatmul.mubr.msk.f32.vlgmr.msra.gmra.mrb[236].mxu0 %vm222_vm2, %v26325_v15  ;;  %23739 = vmatprep.subr.mxu1 %v23937_v0  ;;  %v26383_v38 = vadd.f32 %v11168_v36, %v26299_v5  ;;  %v23268_v39 = vpop.f32.mrb[143].mxu0 }
 0x295   : > { %23740 = vmatpush3.msk.msra.mxu1 %vm226_vm1, %v21887_v32  ;;  %23744 = vmatprep.subr.mxu0 %v23937_v0 }
 0x296   : > { %23741 = vmatprep.mubr.msk.f32.mxu1 %vm23938_vm0, %v23937_v0  ;;  %23745 = vmatpush3.msk.msra.mxu0 %vm226_vm1, %v21888_v34  ;;  %v11243_v41 = vpop.f32.mrb[142].mxu1 }
 0x297   : > { %23746 = vmatprep.mubr.msk.f32.mxu0 %vm23938_vm0, %v23937_v0  ;;  %23742 = vmatmul.mubr.msk.f32.vlgmr.msra.gmra.mrb[236].mxu1 %vm222_vm2, %v26325_v15  ;;  %v26397_v43 = vadd.f32 %v11243_v41, %v26312_v10  ;;  %v11339_v44 = vpop.f32.mrb[144].mxu0  ;;  %v23273_v45 = vpop.f32.mrb[143].mxu1 }
 0x298   : > { %23747 = vmatmul.mubr.msk.f32.vlgmr.msra.gmra.mrb[238].mxu0 %vm222_vm2, %v26325_v15  ;;  %23749 = vmatprep.subr.mxu1 %v23937_v0  ;;  %v26403_v46 = vadd.f32 %v11339_v44, %v26318_v13  ;;  %v23278_v47 = vpop.f32.mrb[145].mxu0 }
 0x299   : > { %23750 = vmatpush3.msk.msra.mxu1 %vm226_vm1, %v21889_v40  ;;  %23754 = vmatprep.subr.mxu0 %v23937_v0  ;;  %v26565_v47 = vld [vmem:[%s26717_s2 + $0x5c] sm:$0xf] }
 0x29a   : > { %23751 = vmatprep.mubr.msk.f32.mxu1 %vm23938_vm0, %v23937_v0  ;;  %23755 = vmatpush3.msk.msra.mxu0 %vm226_vm1, %v21907_v42  ;;  %v11414_v50 = vpop.f32.mrb[144].mxu1 }
 0x29b   : > { %23756 = vmatprep.mubr.msk.f32.mxu0 %vm23938_vm0, %v23937_v0  ;;  %23752 = vmatmul.mubr.msk.f32.vlgmr.msra.gmra.mrb[238].mxu1 %vm222_vm2, %v26325_v15  ;;  %v26422_v52 = vadd.f32 %v11414_v50, %v26337_v19  ;;  %v11489_v54 = vpop.f32.mrb[146].mxu0  ;;  %v23283_v56 = vpop.f32.mrb[145].mxu1 }
 0x29c   : > { %23757 = vmatmul.mubr.msk.f32.vlgmr.msra.gmra.mrb[240].mxu0 %vm222_vm2, %v26410_v48  ;;  %23759 = vmatprep.subr.mxu1 %v23937_v0  ;;  %v26428_v53 = vadd.f32 %v11489_v54, %v26343_v22  ;;  %v23288_v57 = vpop.f32.mrb[147].mxu0 }
 0x29d   : > { %23760 = vmatpush3.msk.msra.mxu1 %vm226_vm1, %v21908_v49  ;;  %23764 = vmatprep.subr.mxu0 %v23937_v0  ;;  %v19246_v58 = vpop.permute.xlu0 %19245 }
 0x29e   : > { %23761 = vmatprep.mubr.msk.f32.mxu1 %vm23938_vm0, %v23937_v0  ;;  %23765 = vmatpush3.msk.msra.mxu0 %vm226_vm1, %v21909_v51  ;;  %v11564_v55 = vpop.f32.mrb[146].mxu1 }
 0x29f   : > { %23766 = vmatprep.mubr.msk.f32.mxu0 %vm23938_vm0, %v23937_v0  ;;  %23762 = vmatmul.mubr.msk.f32.vlgmr.msra.gmra.mrb[240].mxu1 %vm222_vm2, %v26410_v48  ;;  %v19324_v62 = vpop.permute.xlu1 %19323  ;;  %v26442_v63 = vadd.f32 %v11564_v55, %v26357_v27  ;;  %v11639_v60 = vpop.f32.mrb[148].mxu0 }
 0x2a0   : > { %23767 = vmatmul.mubr.msk.f32.vlgmr.msra.gmra.mrb[242].mxu0 %vm222_vm2, %v26410_v48  ;;  %23769 = vmatprep.subr.mxu1 %v23937_v0  ;;  %v26448_v1 = vadd.f32 %v11639_v60, %v26363_v30  ;;  %v23293_v2 = vpop.f32.mrb[147].mxu1  ;;  %v23298_v3 = vpop.f32.mrb[149].mxu0 }
 0x2a1   : > { %23770 = vmatpush3.msk.msra.mxu1 %vm226_vm1, %v21910_v59  ;;  %23774 = vmatprep.subr.mxu0 %v23937_v0 }
 0x2a2   : > { %23771 = vmatprep.mubr.msk.f32.mxu1 %vm23938_vm0, %v23937_v0  ;;  %23775 = vmatpush3.msk.msra.mxu0 %vm226_vm1, %v21911_v61  ;;  %v19399_v5 = vpop.permute.xlu0 %19398 }
 0x2a3   : > { %23776 = vmatprep.mubr.msk.f32.mxu0 %vm23938_vm0, %v23937_v0  ;;  %23772 = vmatmul.mubr.msk.f32.vlgmr.msra.gmra.mrb[242].mxu1 %vm222_vm2, %v26410_v48  ;;  %v11714_v7 = vpop.f32.mrb[148].mxu1  ;;  %v11789_v8 = vpop.f32.mrb[150].mxu0 }
 0x2a4   : > { %23777 = vmatmul.mubr.msk.f32.vlgmr.msra.gmra.mrb[244].mxu0 %vm222_vm2, %v26410_v48  ;;  %23779 = vmatprep.subr.mxu1 %v23937_v0  ;;  %v19474_v9 = vpop.permute.xlu1 %19473  ;;  %v26465_v10 = vadd.f32 %v11714_v7, %v26377_v35  ;;  %v26468_v11 = vadd.f32 %v11789_v8, %v26383_v38  ;;  %v23303_v12 = vpop.f32.mrb[149].mxu1 }
 0x2a5   : > { %23780 = vmatpush3.msk.msra.mxu1 %vm226_vm1, %v21912_v4  ;;  %23784 = vmatprep.subr.mxu0 %v23937_v0  ;;  %v23308_v13 = vpop.f32.mrb[151].mxu0 }
 0x2a6   : > { %23781 = vmatprep.mubr.msk.f32.mxu1 %vm23938_vm0, %v23937_v0  ;;  %23785 = vmatpush3.msk.msra.mxu0 %vm226_vm1, %v21913_v6 }
 0x2a7   : > { %23786 = vmatprep.mubr.msk.f32.mxu0 %vm23938_vm0, %v23937_v0  ;;  %23782 = vmatmul.mubr.msk.f32.vlgmr.msra.gmra.mrb[244].mxu1 %vm222_vm2, %v26410_v48  ;;  %v19549_v15 = vpop.permute.xlu0 %19548 }
 0x2a8   : > { %23787 = vmatmul.mubr.msk.f32.vlgmr.msra.gmra.mrb[246].mxu0 %vm222_vm2, %v26410_v48  ;;  %23789 = vmatprep.subr.mxu1 %v23937_v0  ;;  %v11864_v16 = vpop.f32.mrb[150].mxu1  ;;  %v11958_v17 = vpop.f32.mrb[152].mxu0 }
 0x2a9   : > { %23790 = vmatpush3.msk.msra.mxu1 %vm226_vm1, %v21914_v14  ;;  %23794 = vmatprep.subr.mxu0 %v23937_v0  ;;  %v19624_v19 = vpop.permute.xlu1 %19623  ;;  %v26491_v20 = vadd.f32 %v11864_v16, %v26397_v43  ;;  %v26494_v21 = vadd.f32 %v11958_v17, %v26403_v46  ;;  %v23313_v22 = vpop.f32.mrb[151].mxu1 }
 0x2aa   : > { %23791 = vmatprep.mubr.msk.f32.mxu1 %vm23938_vm0, %v23937_v0  ;;  %23795 = vmatpush3.msk.msra.mxu0 %vm226_vm1, %v19246_v58  ;;  %v23318_v23 = vpop.f32.mrb[153].mxu0 }
 0x2ab   : > { %23796 = vmatprep.mubr.msk.f32.mxu0 %vm23938_vm0, %v23937_v0  ;;  %23792 = vmatmul.mubr.msk.f32.vlgmr.msra.gmra.mrb[246].mxu1 %vm222_vm2, %v26410_v48 }
 0x2ac   : > { %23797 = vmatmul.mubr.msk.f32.vlgmr.msra.gmra.mrb[248].mxu0 %vm222_vm2, %v26488_v18  ;;  %23799 = vmatprep.subr.mxu1 %v23937_v0  ;;  %v19699_v24 = vpop.permute.xlu0 %19698 }
 0x2ad   : > { %23800 = vmatpush3.msk.msra.mxu1 %vm226_vm1, %v19324_v62  ;;  %23804 = vmatprep.subr.mxu0 %v23937_v0  ;;  %v12031_v25 = vpop.f32.mrb[152].mxu1  ;;  %v12104_v26 = vpop.f32.mrb[154].mxu0 }
 0x2ae   : > { %23801 = vmatprep.mubr.msk.f32.mxu1 %vm23938_vm0, %v23937_v0  ;;  %23805 = vmatpush3.msk.msra.mxu0 %vm226_vm1, %v19399_v5  ;;  %v19774_v27 = vpop.permute.xlu1 %19773  ;;  %v26512_v28 = vadd.f32 %v12031_v25, %v26422_v52  ;;  %v26515_v29 = vadd.f32 %v12104_v26, %v26428_v53  ;;  %v23323_v30 = vpop.f32.mrb[153].mxu1 }
 0x2af   : > { %23806 = vmatprep.mubr.msk.f32.mxu0 %vm23938_vm0, %v23937_v0  ;;  %23802 = vmatmul.mubr.msk.f32.vlgmr.msra.gmra.mrb[248].mxu1 %vm222_vm2, %v26488_v18  ;;  %v23328_v31 = vpop.f32.mrb[155].mxu0 }
 0x2b0   : > { %23807 = vmatmul.mubr.msk.f32.vlgmr.msra.gmra.mrb[250].mxu0 %vm222_vm2, %v26488_v18  ;;  %23809 = vmatprep.subr.mxu1 %v23937_v0 }
 0x2b1   : > { %23810 = vmatpush3.msk.msra.mxu1 %vm226_vm1, %v19474_v9  ;;  %23814 = vmatprep.subr.mxu0 %v23937_v0  ;;  %v19867_v32 = vpop.permute.xlu0 %19866 }
 0x2b2   : > { %23811 = vmatprep.mubr.msk.f32.mxu1 %vm23938_vm0, %v23937_v0  ;;  %23815 = vmatpush3.msk.msra.mxu0 %vm226_vm1, %v19549_v15  ;;  %v12177_v33 = vpop.f32.mrb[154].mxu1  ;;  %v12250_v34 = vpop.f32.mrb[156].mxu0 }
 0x2b3   : > { %23816 = vmatprep.mubr.msk.f32.mxu0 %vm23938_vm0, %v23937_v0  ;;  %23812 = vmatmul.mubr.msk.f32.vlgmr.msra.gmra.mrb[250].mxu1 %vm222_vm2, %v26488_v18  ;;  %v19945_v35 = vpop.permute.xlu1 %19944  ;;  %v26534_v36 = vadd.f32 %v12177_v33, %v26442_v63  ;;  %v26537_v37 = vadd.f32 %v12250_v34, %v26448_v1  ;;  %v23333_v38 = vpop.f32.mrb[155].mxu1 }
 0x2b4   : > { %23817 = vmatmul.mubr.msk.f32.vlgmr.msra.gmra.mrb[252].mxu0 %vm222_vm2, %v26488_v18  ;;  %23819 = vmatprep.subr.mxu1 %v23937_v0  ;;  %v23338_v39 = vpop.f32.mrb[157].mxu0  ;;  %v23941_v38 = vmov 0  }
 0x2b5   : > { %23820 = vmatpush3.msk.msra.mxu1 %vm226_vm1, %v19624_v19  ;;  %23824 = vmatprep.subr.mxu0 %v23937_v0 }
 0x2b6   : > { %23821 = vmatprep.mubr.msk.f32.mxu1 %vm23938_vm0, %v23937_v0  ;;  %23825 = vmatpush3.msk.msra.mxu0 %vm226_vm1, %v19699_v24  ;;  %v20020_v40 = vpop.permute.xlu0 %20019 }
 0x2b7   : > { %23826 = vmatprep.mubr.msk.f32.mxu0 %vm23938_vm0, %v23937_v0  ;;  %23822 = vmatmul.mubr.msk.f32.vlgmr.msra.gmra.mrb[252].mxu1 %vm222_vm2, %v26488_v18  ;;  %v12323_v41 = vpop.f32.mrb[156].mxu1  ;;  %v12396_v42 = vpop.f32.mrb[158].mxu0 }
 0x2b8   : > { %23827 = vmatmul.mubr.msk.f32.vlgmr.msra.gmra.mrb[254].mxu0 %vm222_vm2, %v26488_v18  ;;  %23829 = vmatprep.subr.mxu1 %v23937_v0  ;;  %v20095_v43 = vpop.permute.xlu1 %20094  ;;  %v26555_v44 = vadd.f32 %v12323_v41, %v26465_v10  ;;  %v26558_v45 = vadd.f32 %v12396_v42, %v26468_v11  ;;  %v23343_v46 = vpop.f32.mrb[157].mxu1  ;;  %v21990_v10 = vld [vmem:[%s26717_s2 + $0x60] sm:$0xf] }
 0x2b9   : > { %23830 = vmatpush3.msk.msra.mxu1 %vm226_vm1, %v19774_v27  ;;  %23834 = vmatprep.subr.mxu0 %v23937_v0  ;;  %v23348_v48 = vpop.f32.mrb[159].mxu0 }
 0x2ba   : > { %23831 = vmatprep.mubr.msk.f32.mxu1 %vm23938_vm0, %v23937_v0  ;;  %23835 = vmatpush3.msk.msra.mxu0 %vm226_vm1, %v19867_v32 }
 0x2bb   : > { %23836 = vmatprep.mubr.msk.f32.mxu0 %vm23938_vm0, %v23937_v0  ;;  %23832 = vmatmul.mubr.msk.f32.vlgmr.msra.gmra.mrb[254].mxu1 %vm222_vm2, %v26488_v18  ;;  %v20170_v49 = vpop.permute.xlu0 %20169 }
 0x2bc   : > { %23837 = vmatmul.mubr.msk.f32.vlgmr.msra.gmra.mrb[0].mxu0 %vm222_vm2, %v26565_v47  ;;  %23839 = vmatprep.subr.mxu1 %v23937_v0  ;;  %v12469_v50 = vpop.f32.mrb[158].mxu1  ;;  %v12563_v51 = vpop.f32.mrb[160].mxu0 }
 0x2bd   : > { %23840 = vmatpush3.msk.msra.mxu1 %vm226_vm1, %v19945_v35  ;;  %23844 = vmatprep.subr.mxu0 %v23937_v0  ;;  %v20245_v52 = vpop.permute.xlu1 %20244  ;;  %v26580_v54 = vadd.f32 %v12469_v50, %v26491_v20  ;;  %v26583_v56 = vadd.f32 %v12563_v51, %v26494_v21  ;;  %v23353_v53 = vpop.f32.mrb[159].mxu1  ;;  %v21097_v35 = vld [vmem:[%s26718_s3] sm:$0xf] }
 0x2be   : > { %23841 = vmatprep.mubr.msk.f32.mxu1 %vm23938_vm0, %v23937_v0  ;;  %23845 = vmatpush3.msk.msra.mxu0 %vm226_vm1, %v20020_v40  ;;  %v23358_v57 = vpop.f32.mrb[161].mxu0 }
 0x2bf   : > { %23846 = vmatprep.mubr.msk.f32.mxu0 %vm23938_vm0, %v23937_v0  ;;  %23842 = vmatmul.mubr.msk.f32.vlgmr.msra.gmra.mrb[0].mxu1 %vm222_vm2, %v26565_v47 }
 0x2c0   : > { %23847 = vmatmul.mubr.msk.f32.vlgmr.msra.gmra.mrb[2].mxu0 %vm222_vm2, %v26565_v47  ;;  %23849 = vmatprep.subr.mxu1 %v23937_v0  ;;  %v20320_v58 = vpop.permute.xlu0 %20319 }
 0x2c1   : > { %23850 = vmatpush3.msk.msra.mxu1 %vm226_vm1, %v20095_v43  ;;  %23854 = vmatprep.subr.mxu0 %v23937_v0  ;;  %v12636_v59 = vpop.f32.mrb[160].mxu1  ;;  %v12709_v55 = vpop.f32.mrb[162].mxu0 }
 0x2c2   : > { %23851 = vmatprep.mubr.msk.f32.mxu1 %vm23938_vm0, %v23937_v0  ;;  %23855 = vmatpush3.msk.msra.mxu0 %vm226_vm1, %v20170_v49  ;;  %v20395_v61 = vpop.permute.xlu1 %20394  ;;  %v26601_v62 = vadd.f32 %v12636_v59, %v26512_v28  ;;  %v26604_v63 = vadd.f32 %v12709_v55, %v26515_v29  ;;  %v23363_v60 = vpop.f32.mrb[161].mxu1 }
 0x2c3   : > { %23856 = vmatprep.mubr.msk.f32.mxu0 %vm23938_vm0, %v23937_v0  ;;  %23852 = vmatmul.mubr.msk.f32.vlgmr.msra.gmra.mrb[2].mxu1 %vm222_vm2, %v26565_v47  ;;  %v23368_v1 = vpop.f32.mrb[163].mxu0 }
 0x2c4   : > { %23857 = vmatmul.mubr.msk.f32.vlgmr.msra.gmra.mrb[4].mxu0 %vm222_vm2, %v26565_v47  ;;  %23859 = vmatprep.subr.mxu1 %v23937_v0 }
 0x2c5   : > { %23860 = vmatpush3.msk.msra.mxu1 %vm226_vm1, %v20245_v52  ;;  %23864 = vmatprep.subr.mxu0 %v23937_v0  ;;  %v20488_v2 = vpop.permute.xlu0 %20487 }
 0x2c6   : > { %23861 = vmatprep.mubr.msk.f32.mxu1 %vm23938_vm0, %v23937_v0  ;;  %23865 = vmatpush3.msk.msra.mxu0 %vm226_vm1, %v20320_v58  ;;  %v12782_v3 = vpop.f32.mrb[162].mxu1  ;;  %v12855_v4 = vpop.f32.mrb[164].mxu0 }
 0x2c7   : > { %23866 = vmatprep.mubr.msk.f32.mxu0 %vm23938_vm0, %v23937_v0  ;;  %23862 = vmatmul.mubr.msk.f32.vlgmr.msra.gmra.mrb[4].mxu1 %vm222_vm2, %v26565_v47  ;;  %v20566_v5 = vpop.permute.xlu1 %20565  ;;  %v26623_v6 = vadd.f32 %v12782_v3, %v26534_v36  ;;  %v26626_v7 = vadd.f32 %v12855_v4, %v26537_v37  ;;  %v23373_v8 = vpop.f32.mrb[163].mxu1 }
 0x2c8   : > { %23867 = vmatmul.mubr.msk.f32.vlgmr.msra.gmra.mrb[6].mxu0 %vm222_vm2, %v26565_v47  ;;  %23869 = vmatprep.subr.mxu1 %v23937_v0  ;;  %v23378_v9 = vpop.f32.mrb[165].mxu0 }
 0x2c9   : > { %23870 = vmatpush3.msk.msra.mxu1 %vm226_vm1, %v20395_v61  ;;  %23874 = vmatprep.subr.mxu0 %v23937_v0 }
 0x2ca   : > { %23871 = vmatprep.mubr.msk.f32.mxu1 %vm23938_vm0, %v23937_v0  ;;  %23875 = vmatpush3.msk.msra.mxu0 %vm226_vm1, %v20488_v2  ;;  %v20641_v11 = vpop.permute.xlu0 %20640 }
 0x2cb   : > { %23876 = vmatprep.mubr.msk.f32.mxu0 %vm23938_vm0, %v23937_v0  ;;  %23872 = vmatmul.mubr.msk.f32.vlgmr.msra.gmra.mrb[6].mxu1 %vm222_vm2, %v26565_v47  ;;  %v12928_v12 = vpop.f32.mrb[164].mxu1  ;;  %v13001_v13 = vpop.f32.mrb[166].mxu0 }
 0x2cc   : > { %23877 = vmatmul.mubr.msk.f32.vlgmr.msra.gmra.mrb[8].mxu0 %vm222_vm2, %v21990_v10  ;;  %23879 = vmatprep.subr.mxu1 %v23937_v0  ;;  %v20716_v14 = vpop.permute.xlu1 %20715  ;;  %v13083_v15 = vadd.f32 %v12928_v12, %v26555_v44  ;;  %v13084_v16 = vadd.f32 %v13001_v13, %v26558_v45  ;;  %v23383_v17 = vpop.f32.mrb[165].mxu1 }
 0x2cd   : > { %23880 = vmatpush3.msk.msra.mxu1 %vm226_vm1, %v20566_v5  ;;  %23884 = vmatprep.subr.mxu0 %v23937_v0  ;;  %v23388_v18 = vpop.f32.mrb[167].mxu0 }
 0x2ce   : > { %23881 = vmatprep.mubr.msk.f32.mxu1 %vm23938_vm0, %v23937_v0  ;;  %23885 = vmatpush3.msk.msra.mxu0 %vm226_vm1, %v20641_v11 }
 0x2cf   : > { %23886 = vmatprep.mubr.msk.f32.mxu0 %vm23938_vm0, %v23937_v0  ;;  %23882 = vmatmul.mubr.msk.f32.vlgmr.msra.gmra.mrb[8].mxu1 %vm222_vm2, %v21990_v10  ;;  %v20791_v19 = vpop.permute.xlu0 %20790 }
 0x2d0   : > { %23887 = vmatmul.mubr.msk.f32.vlgmr.msra.gmra.mrb[10].mxu0 %vm222_vm2, %v21990_v10  ;;  %23889 = vmatprep.subr.mxu1 %v23937_v0  ;;  %v13074_v20 = vpop.f32.mrb[166].mxu1  ;;  %v13170_v21 = vpop.f32.mrb[168].mxu0 }
 0x2d1   : > { %23890 = vmatpush3.msk.msra.mxu1 %vm226_vm1, %v20716_v14  ;;  %23894 = vmatprep.subr.mxu0 %v23937_v0  ;;  %v20866_v22 = vpop.permute.xlu1 %20865  ;;  %v13085_v23 = vadd.f32 %v13074_v20, %v26580_v54  ;;  %v13699_v24 = vadd.f32 %v13170_v21, %v26583_v56  ;;  %v23393_v25 = vpop.f32.mrb[167].mxu1 }
 0x2d2   : > { %23891 = vmatprep.mubr.msk.f32.mxu1 %vm23938_vm0, %v23937_v0  ;;  %23895 = vmatpush3.msk.msra.mxu0 %vm226_vm1, %v20791_v19  ;;  %v23398_v26 = vpop.f32.mrb[169].mxu0 }
 0x2d3   : > { %23896 = vmatprep.mubr.msk.f32.mxu0 %vm23938_vm0, %v23937_v0  ;;  %23892 = vmatmul.mubr.msk.f32.vlgmr.msra.gmra.mrb[10].mxu1 %vm222_vm2, %v21990_v10 }
 0x2d4   : > { %23897 = vmatmul.mubr.msk.f32.vlgmr.msra.gmra.mrb[12].mxu0 %vm222_vm2, %v21990_v10  ;;  %23899 = vmatprep.subr.mxu1 %v23937_v0  ;;  %v20941_v27 = vpop.permute.xlu0 %20940 }
 0x2d5   : > { %23900 = vmatpush3.msk.msra.mxu1 %vm226_vm1, %v20866_v22  ;;  %23904 = vmatprep.subr.mxu0 %v23937_v0  ;;  %v13245_v28 = vpop.f32.mrb[168].mxu1  ;;  %v13320_v29 = vpop.f32.mrb[170].mxu0 }
 0x2d6   : > { %23901 = vmatprep.mubr.msk.f32.mxu1 %vm23938_vm0, %v23937_v0  ;;  %23905 = vmatpush3.msk.msra.mxu0 %vm226_vm1, %v20941_v27  ;;  %v21016_v30 = vpop.permute.xlu1 %21015  ;;  %v13700_v31 = vadd.f32 %v13245_v28, %v26601_v62  ;;  %v13701_v32 = vadd.f32 %v13320_v29, %v26604_v63  ;;  %v23403_v33 = vpop.f32.mrb[169].mxu1 }
 0x2d7   : > { %23906 = vmatprep.mubr.msk.f32.mxu0 %vm23938_vm0, %v23937_v0  ;;  %23902 = vmatmul.mubr.msk.f32.vlgmr.msra.gmra.mrb[12].mxu1 %vm222_vm2, %v21990_v10  ;;  %v23408_v34 = vpop.f32.mrb[171].mxu0 }
 0x2d8   : > { %23907 = vmatmul.mubr.msk.f32.vlgmr.msra.gmra.mrb[14].mxu0 %vm222_vm2, %v21990_v10  ;;  %23909 = vmatprep.subr.mxu1 %v23937_v0 }
 0x2d9   : > { %23910 = vmatpush3.msk.msra.mxu1 %vm226_vm1, %v21016_v30  ;;  %23911 = vmatprep.mubr.msk.f32.mxu1 %vm23938_vm0, %v23937_v0 }
 0x2da   : > { %v13395_v36 = vpop.f32.mrb[170].mxu1  ;;  %v13470_v37 = vpop.f32.mrb[172].mxu0  ;;  %23928 = vset.pattern.permute.xlu0 %v23941_v38 }
 0x2db   : > { %23912 = vmatmul.mubr.msk.f32.vlgmr.msra.gmra.mrb[14].mxu1 %vm222_vm2, %v21990_v10  ;;  %v13702_v39 = vadd.f32 %v13395_v36, %v26623_v6  ;;  %v13703_v40 = vadd.f32 %v13470_v37, %v26626_v7  ;;  %v23413_v41 = vpop.f32.mrb[171].mxu1  ;;  %v23418_v42 = vpop.f32.mrb[173].mxu0  ;;  %21100 = vperm.xlu0 %23928, %v21097_v35  }
 0x2de   : > { %v13545_v43 = vpop.f32.mrb[172].mxu1 }
 0x2df   : > { %v13704_v44 = vadd.f32 %v13545_v43, %v13083_v15  ;;  %v13620_v45 = vpop.f32.mrb[174].mxu0  ;;  %v23423_v46 = vpop.f32.mrb[173].mxu1 }
 0x2e0   : > { %v13705_v47 = vadd.f32 %v13620_v45, %v13084_v16  ;;  %v23428_v48 = vpop.f32.mrb[175].mxu0 }
 0x2e2   : > { %v13695_v0 = vpop.f32.mrb[174].mxu1 }
 0x2e3   : > { %v13706_v49 = vadd.f32 %v13695_v0, %v13085_v23  ;;  %v13791_v50 = vpop.f32.mrb[176].mxu0  ;;  %v23433_v51 = vpop.f32.mrb[175].mxu1 }
 0x2e4   : > { %v14320_v52 = vadd.f32 %v13791_v50, %v13699_v24  ;;  %v23438_v54 = vpop.f32.mrb[177].mxu0 }
 0x2e6   : > { %v13866_v56 = vpop.f32.mrb[176].mxu1 }
 0x2e7   : > { %v14321_v53 = vadd.f32 %v13866_v56, %v13700_v31  ;;  %v13941_v57 = vpop.f32.mrb[178].mxu0  ;;  %v23443_v58 = vpop.f32.mrb[177].mxu1 }
 0x2e8   : > { %v14322_v59 = vadd.f32 %v13941_v57, %v13701_v32  ;;  %v23448_v55 = vpop.f32.mrb[179].mxu0 }
 0x2ea   : > { %v14016_v61 = vpop.f32.mrb[178].mxu1 }
 0x2eb   : > { %v14323_v62 = vadd.f32 %v14016_v61, %v13702_v39  ;;  %v14091_v63 = vpop.f32.mrb[180].mxu0  ;;  %v23453_v60 = vpop.f32.mrb[179].mxu1 }
 0x2ec   : > { %v14324_v1 = vadd.f32 %v14091_v63, %v13703_v40  ;;  %v23458_v2 = vpop.f32.mrb[181].mxu0 }
 0x2ee   : > { %v14166_v3 = vpop.f32.mrb[180].mxu1 }
 0x2ef   : > { %v14325_v4 = vadd.f32 %v14166_v3, %v13704_v44  ;;  %v14241_v5 = vpop.f32.mrb[182].mxu0  ;;  %v23463_v6 = vpop.f32.mrb[181].mxu1 }
 0x2f0   : > { %v14326_v7 = vadd.f32 %v14241_v5, %v13705_v47  ;;  %v23468_v8 = vpop.f32.mrb[183].mxu0 }
 0x2f2   : > { %v14316_v9 = vpop.f32.mrb[182].mxu1 }
 0x2f3   : > { %v14327_v10 = vadd.f32 %v14316_v9, %v13706_v49  ;;  %v14412_v11 = vpop.f32.mrb[184].mxu0  ;;  %v23473_v12 = vpop.f32.mrb[183].mxu1 }
 0x2f4   : > { %v14941_v13 = vadd.f32 %v14412_v11, %v14320_v52  ;;  %v23478_v14 = vpop.f32.mrb[185].mxu0 }
 0x2f6   : > { %v14487_v15 = vpop.f32.mrb[184].mxu1 }
 0x2f7   : > { %v14942_v16 = vadd.f32 %v14487_v15, %v14321_v53  ;;  %v14562_v17 = vpop.f32.mrb[186].mxu0  ;;  %v23483_v18 = vpop.f32.mrb[185].mxu1 }
 0x2f8   : > { %v14943_v19 = vadd.f32 %v14562_v17, %v14322_v59  ;;  %v23488_v20 = vpop.f32.mrb[187].mxu0 }
 0x2fa   : > { %v14637_v21 = vpop.f32.mrb[186].mxu1 }
 0x2fb   : > { %v14944_v22 = vadd.f32 %v14637_v21, %v14323_v62  ;;  %v14712_v23 = vpop.f32.mrb[188].mxu0  ;;  %v23493_v24 = vpop.f32.mrb[187].mxu1 }
 0x2fc   : > { %v14945_v25 = vadd.f32 %v14712_v23, %v14324_v1  ;;  %v23498_v26 = vpop.f32.mrb[189].mxu0 }
 0x2ff   : > { %v14787_v27 = vpop.f32.mrb[188].mxu1  ;;  %v14862_v28 = vpop.f32.mrb[190].mxu0 }
 0x300   : > { %v14946_v29 = vadd.f32 %v14787_v27, %v14325_v4  ;;  %v14947_v30 = vadd.f32 %v14862_v28, %v14326_v7  ;;  %v23503_v31 = vpop.f32.mrb[189].mxu1  ;;  %v23508_v32 = vpop.f32.mrb[191].mxu0 }
 0x304   : > { %v14937_v33 = vpop.f32.mrb[190].mxu1  ;;  %v15031_v34 = vpop.f32.mrb[192].mxu0 }
 0x305   : > { %v14948_v35 = vadd.f32 %v14937_v33, %v14327_v10  ;;  %v15546_v36 = vadd.f32 %v15031_v34, %v14941_v13  ;;  %v23513_v37 = vpop.f32.mrb[191].mxu1  ;;  %v23518_v38 = vpop.f32.mrb[193].mxu0 }
 0x309   : > { %v15104_v39 = vpop.f32.mrb[192].mxu1  ;;  %v15177_v40 = vpop.f32.mrb[194].mxu0 }
 0x30a   : > { %v15547_v41 = vadd.f32 %v15104_v39, %v14942_v16  ;;  %v15548_v42 = vadd.f32 %v15177_v40, %v14943_v19  ;;  %v23523_v43 = vpop.f32.mrb[193].mxu1  ;;  %v23528_v44 = vpop.f32.mrb[195].mxu0 }
 0x30e   : > { %v15250_v45 = vpop.f32.mrb[194].mxu1  ;;  %v15323_v46 = vpop.f32.mrb[196].mxu0 }
 0x30f   : > { %v15549_v47 = vadd.f32 %v15250_v45, %v14944_v22  ;;  %v15550_v48 = vadd.f32 %v15323_v46, %v14945_v25  ;;  %v23533_v0 = vpop.f32.mrb[195].mxu1  ;;  %v23538_v49 = vpop.f32.mrb[197].mxu0 }
 0x313   : > { %v15396_v50 = vpop.f32.mrb[196].mxu1  ;;  %v15469_v51 = vpop.f32.mrb[198].mxu0 }
 0x314   : > { %v15551_v52 = vadd.f32 %v15396_v50, %v14946_v29  ;;  %v15552_v54 = vadd.f32 %v15469_v51, %v14947_v30  ;;  %v23543_v56 = vpop.f32.mrb[197].mxu1  ;;  %v23548_v53 = vpop.f32.mrb[199].mxu0 }
 0x318   : > { %v15542_v57 = vpop.f32.mrb[198].mxu1  ;;  %v15636_v58 = vpop.f32.mrb[200].mxu0 }
 0x319   : > { %v15553_v59 = vadd.f32 %v15542_v57, %v14948_v35  ;;  %v16151_v55 = vadd.f32 %v15636_v58, %v15546_v36  ;;  %v23553_v61 = vpop.f32.mrb[199].mxu1  ;;  %v23558_v62 = vpop.f32.mrb[201].mxu0 }
 0x31d   : > { %v15709_v63 = vpop.f32.mrb[200].mxu1  ;;  %v15782_v60 = vpop.f32.mrb[202].mxu0 }
 0x31e   : > { %v16152_v1 = vadd.f32 %v15709_v63, %v15547_v41  ;;  %v16153_v2 = vadd.f32 %v15782_v60, %v15548_v42  ;;  %v23563_v3 = vpop.f32.mrb[201].mxu1  ;;  %v23568_v4 = vpop.f32.mrb[203].mxu0 }
 0x322   : > { %v15855_v5 = vpop.f32.mrb[202].mxu1  ;;  %v15928_v6 = vpop.f32.mrb[204].mxu0 }
 0x323   : > { %v16154_v7 = vadd.f32 %v15855_v5, %v15549_v47  ;;  %v16155_v8 = vadd.f32 %v15928_v6, %v15550_v48  ;;  %v23573_v9 = vpop.f32.mrb[203].mxu1  ;;  %v23578_v10 = vpop.f32.mrb[205].mxu0 }
 0x327   : > { %v16001_v11 = vpop.f32.mrb[204].mxu1  ;;  %v16074_v12 = vpop.f32.mrb[206].mxu0 }
 0x328   : > { %v16156_v13 = vadd.f32 %v16001_v11, %v15551_v52  ;;  %v16157_v14 = vadd.f32 %v16074_v12, %v15552_v54  ;;  %v23583_v15 = vpop.f32.mrb[205].mxu1  ;;  %v23588_v16 = vpop.f32.mrb[207].mxu0 }
 0x32c   : > { %v16147_v17 = vpop.f32.mrb[206].mxu1  ;;  %v16243_v18 = vpop.f32.mrb[208].mxu0 }
 0x32d   : > { %v16158_v19 = vadd.f32 %v16147_v17, %v15553_v59  ;;  %v16772_v20 = vadd.f32 %v16243_v18, %v16151_v55  ;;  %v23593_v21 = vpop.f32.mrb[207].mxu1  ;;  %v23598_v22 = vpop.f32.mrb[209].mxu0 }
 0x331   : > { %v16318_v23 = vpop.f32.mrb[208].mxu1  ;;  %v16393_v24 = vpop.f32.mrb[210].mxu0 }
 0x332   : > { %v16773_v25 = vadd.f32 %v16318_v23, %v16152_v1  ;;  %v16774_v26 = vadd.f32 %v16393_v24, %v16153_v2  ;;  %v23603_v27 = vpop.f32.mrb[209].mxu1  ;;  %v23608_v28 = vpop.f32.mrb[211].mxu0 }
 0x336   : > { %v16468_v29 = vpop.f32.mrb[210].mxu1  ;;  %v16543_v30 = vpop.f32.mrb[212].mxu0 }
 0x337   : > { %v16775_v31 = vadd.f32 %v16468_v29, %v16154_v7  ;;  %v16776_v32 = vadd.f32 %v16543_v30, %v16155_v8  ;;  %v23613_v33 = vpop.f32.mrb[211].mxu1  ;;  %v23618_v34 = vpop.f32.mrb[213].mxu0 }
 0x33a   : > { %v16618_v35 = vpop.f32.mrb[212].mxu1 }
 0x33b   : > { %v16777_v36 = vadd.f32 %v16618_v35, %v16156_v13  ;;  %v16693_v37 = vpop.f32.mrb[214].mxu0  ;;  %v23623_v38 = vpop.f32.mrb[213].mxu1 }
 0x33c   : > { %v16778_v39 = vadd.f32 %v16693_v37, %v16157_v14  ;;  %v23628_v40 = vpop.f32.mrb[215].mxu0 }
 0x33e   : > { %v16768_v41 = vpop.f32.mrb[214].mxu1 }
 0x33f   : > { %v16779_v42 = vadd.f32 %v16768_v41, %v16158_v19  ;;  %v16864_v43 = vpop.f32.mrb[216].mxu0  ;;  %v23633_v44 = vpop.f32.mrb[215].mxu1 }
 0x340   : > { %v17393_v45 = vadd.f32 %v16864_v43, %v16772_v20  ;;  %v23638_v46 = vpop.f32.mrb[217].mxu0 }
 0x342   : > { %v16939_v47 = vpop.f32.mrb[216].mxu1 }
 0x343   : > { %v17394_v48 = vadd.f32 %v16939_v47, %v16773_v25  ;;  %v17014_v0 = vpop.f32.mrb[218].mxu0  ;;  %v23643_v49 = vpop.f32.mrb[217].mxu1 }
 0x344   : > { %v17395_v50 = vadd.f32 %v17014_v0, %v16774_v26  ;;  %v23648_v51 = vpop.f32.mrb[219].mxu0 }
 0x346   : > { %v17089_v52 = vpop.f32.mrb[218].mxu1 }
 0x347   : > { %v17396_v54 = vadd.f32 %v17089_v52, %v16775_v31  ;;  %v17164_v56 = vpop.f32.mrb[220].mxu0  ;;  %v23653_v53 = vpop.f32.mrb[219].mxu1 }
 0x348   : > { %v17397_v57 = vadd.f32 %v17164_v56, %v16776_v32  ;;  %v23658_v58 = vpop.f32.mrb[221].mxu0 }
 0x34a   : > { %v17239_v59 = vpop.f32.mrb[220].mxu1 }
 0x34b   : > { %v17398_v55 = vadd.f32 %v17239_v59, %v16777_v36  ;;  %v17314_v61 = vpop.f32.mrb[222].mxu0  ;;  %v23663_v62 = vpop.f32.mrb[221].mxu1 }
 0x34c   : > { %v17399_v63 = vadd.f32 %v17314_v61, %v16778_v39  ;;  %v23668_v60 = vpop.f32.mrb[223].mxu0 }
 0x34e   : > { %v17389_v1 = vpop.f32.mrb[222].mxu1 }
 0x34f   : > { %v17400_v2 = vadd.f32 %v17389_v1, %v16779_v42  ;;  %v17485_v3 = vpop.f32.mrb[224].mxu0  ;;  %v23673_v4 = vpop.f32.mrb[223].mxu1 }
 0x350   : > { %v18014_v5 = vadd.f32 %v17485_v3, %v17393_v45  ;;  %v23678_v6 = vpop.f32.mrb[225].mxu0 }
 0x352   : > { %v17560_v7 = vpop.f32.mrb[224].mxu1 }
 0x353   : > { %v18015_v8 = vadd.f32 %v17560_v7, %v17394_v48  ;;  %v17635_v9 = vpop.f32.mrb[226].mxu0  ;;  %v23683_v10 = vpop.f32.mrb[225].mxu1 }
 0x354   : > { %v18016_v11 = vadd.f32 %v17635_v9, %v17395_v50  ;;  %v23688_v12 = vpop.f32.mrb[227].mxu0 }
 0x356   : > { %v17710_v13 = vpop.f32.mrb[226].mxu1 }
 0x357   : > { %v18017_v14 = vadd.f32 %v17710_v13, %v17396_v54  ;;  %v17785_v15 = vpop.f32.mrb[228].mxu0  ;;  %v23693_v16 = vpop.f32.mrb[227].mxu1 }
 0x358   : > { %v18018_v17 = vadd.f32 %v17785_v15, %v17397_v57  ;;  %v23698_v18 = vpop.f32.mrb[229].mxu0 }
 0x35a   : > { %v17860_v19 = vpop.f32.mrb[228].mxu1 }
 0x35b   : > { %v18019_v20 = vadd.f32 %v17860_v19, %v17398_v55  ;;  %v17935_v21 = vpop.f32.mrb[230].mxu0  ;;  %v23703_v22 = vpop.f32.mrb[229].mxu1 }
 0x35c   : > { %v18020_v23 = vadd.f32 %v17935_v21, %v17399_v63  ;;  %v23708_v24 = vpop.f32.mrb[231].mxu0 }
 0x35e   : > { %v18010_v25 = vpop.f32.mrb[230].mxu1 }
 0x35f   : > { %v18021_v26 = vadd.f32 %v18010_v25, %v17400_v2  ;;  %v18105_v27 = vpop.f32.mrb[232].mxu0  ;;  %v23713_v28 = vpop.f32.mrb[231].mxu1 }
 0x360   : > { %v18620_v29 = vadd.f32 %v18105_v27, %v18014_v5  ;;  %v23718_v30 = vpop.f32.mrb[233].mxu0 }
 0x362   : > { %v18178_v31 = vpop.f32.mrb[232].mxu1 }
 0x363   : > { %v18621_v32 = vadd.f32 %v18178_v31, %v18015_v8  ;;  %v18251_v33 = vpop.f32.mrb[234].mxu0  ;;  %v23723_v34 = vpop.f32.mrb[233].mxu1 }
 0x364   : > { %v18622_v35 = vadd.f32 %v18251_v33, %v18016_v11  ;;  %v23728_v36 = vpop.f32.mrb[235].mxu0 }
 0x366   : > { %v18324_v37 = vpop.f32.mrb[234].mxu1 }
 0x367   : > { %v18623_v38 = vadd.f32 %v18324_v37, %v18017_v14  ;;  %v18397_v39 = vpop.f32.mrb[236].mxu0  ;;  %v23733_v40 = vpop.f32.mrb[235].mxu1 }
 0x368   : > { %v18624_v41 = vadd.f32 %v18397_v39, %v18018_v17  ;;  %v23738_v42 = vpop.f32.mrb[237].mxu0 }
 0x36a   : > { %v18470_v43 = vpop.f32.mrb[236].mxu1 }
 0x36b   : > { %v18625_v44 = vadd.f32 %v18470_v43, %v18019_v20  ;;  %v18543_v45 = vpop.f32.mrb[238].mxu0  ;;  %v23743_v46 = vpop.f32.mrb[237].mxu1 }
 0x36c   : > { %v18626_v47 = vadd.f32 %v18543_v45, %v18020_v23  ;;  %v23748_v48 = vpop.f32.mrb[239].mxu0 }
 0x36e   : > { %v18616_v0 = vpop.f32.mrb[238].mxu1 }
 0x36f   : > { %v18627_v49 = vadd.f32 %v18616_v0, %v18021_v26  ;;  %v18711_v50 = vpop.f32.mrb[240].mxu0  ;;  %v23753_v51 = vpop.f32.mrb[239].mxu1 }
 0x370   : > { %v19226_v52 = vadd.f32 %v18711_v50, %v18620_v29  ;;  %v23758_v54 = vpop.f32.mrb[241].mxu0 }
 0x372   : > { %v18784_v56 = vpop.f32.mrb[240].mxu1 }
 0x373   : > { %v19227_v53 = vadd.f32 %v18784_v56, %v18621_v32  ;;  %v18857_v57 = vpop.f32.mrb[242].mxu0  ;;  %v23763_v58 = vpop.f32.mrb[241].mxu1 }
 0x374   : > { %v19228_v59 = vadd.f32 %v18857_v57, %v18622_v35  ;;  %v23768_v55 = vpop.f32.mrb[243].mxu0  ;;  %v21101_v58 = vpop.permute.xlu0 %21100 }
 0x376   : > { %v18930_v61 = vpop.f32.mrb[242].mxu1 }
 0x377   : > { %v19229_v62 = vadd.f32 %v18930_v61, %v18623_v38  ;;  %v19003_v63 = vpop.f32.mrb[244].mxu0  ;;  %v23773_v60 = vpop.f32.mrb[243].mxu1 }
 0x378   : > { %v19230_v1 = vadd.f32 %v19003_v63, %v18624_v41  ;;  %v23778_v2 = vpop.f32.mrb[245].mxu0 }
 0x37a   : > { %v19076_v3 = vpop.f32.mrb[244].mxu1 }
 0x37b   : > { %v19231_v4 = vadd.f32 %v19076_v3, %v18625_v44  ;;  %v19149_v5 = vpop.f32.mrb[246].mxu0  ;;  %v23783_v6 = vpop.f32.mrb[245].mxu1 }
 0x37c   : > { %v19232_v7 = vadd.f32 %v19149_v5, %v18626_v47  ;;  %v23788_v8 = vpop.f32.mrb[247].mxu0 }
 0x37e   : > { %v19222_v9 = vpop.f32.mrb[246].mxu1 }
 0x37f   : > { %v19233_v10 = vadd.f32 %v19222_v9, %v18627_v49  ;;  %v19318_v11 = vpop.f32.mrb[248].mxu0  ;;  %v23793_v12 = vpop.f32.mrb[247].mxu1 }
 0x380   : > { %v19847_v13 = vadd.f32 %v19318_v11, %v19226_v52  ;;  %v23798_v14 = vpop.f32.mrb[249].mxu0 }
 0x382   : > { %v19393_v15 = vpop.f32.mrb[248].mxu1 }
 0x383   : > { %v19848_v16 = vadd.f32 %v19393_v15, %v19227_v53  ;;  %v19468_v17 = vpop.f32.mrb[250].mxu0  ;;  %v23803_v18 = vpop.f32.mrb[249].mxu1 }
 0x384   : > { %v19849_v19 = vadd.f32 %v19468_v17, %v19228_v59  ;;  %v23808_v20 = vpop.f32.mrb[251].mxu0 }
 0x386   : > { %v19543_v21 = vpop.f32.mrb[250].mxu1 }
 0x387   : > { %v19850_v22 = vadd.f32 %v19543_v21, %v19229_v62  ;;  %v19618_v23 = vpop.f32.mrb[252].mxu0  ;;  %v23813_v24 = vpop.f32.mrb[251].mxu1 }
 0x388   : > { %v19851_v25 = vadd.f32 %v19618_v23, %v19230_v1  ;;  %v23818_v26 = vpop.f32.mrb[253].mxu0 }
 0x38a   : > { %v19693_v27 = vpop.f32.mrb[252].mxu1 }
 0x38b   : > { %v19852_v28 = vadd.f32 %v19693_v27, %v19231_v4  ;;  %v19768_v29 = vpop.f32.mrb[254].mxu0  ;;  %v23823_v30 = vpop.f32.mrb[253].mxu1 }
 0x38c   : > { %v19853_v31 = vadd.f32 %v19768_v29, %v19232_v7  ;;  %v23828_v32 = vpop.f32.mrb[255].mxu0 }
 0x38e   : > { %v19843_v33 = vpop.f32.mrb[254].mxu1 }
 0x38f   : > { %v19854_v34 = vadd.f32 %v19843_v33, %v19233_v10  ;;  %v19939_v35 = vpop.f32.mrb[0].mxu0  ;;  %v23833_v36 = vpop.f32.mrb[255].mxu1 }
 0x390   : > { %v20468_v37 = vadd.f32 %v19939_v35, %v19847_v13  ;;  %v23838_v38 = vpop.f32.mrb[1].mxu0 }
 0x392   : > { %v20014_v39 = vpop.f32.mrb[0].mxu1 }
 0x393   : > { %v20469_v40 = vadd.f32 %v20014_v39, %v19848_v16  ;;  %v20089_v41 = vpop.f32.mrb[2].mxu0  ;;  %v23843_v42 = vpop.f32.mrb[1].mxu1 }
 0x394   : > { %v20470_v43 = vadd.f32 %v20089_v41, %v19849_v19  ;;  %v23848_v44 = vpop.f32.mrb[3].mxu0 }
 0x396   : > { %v20164_v45 = vpop.f32.mrb[2].mxu1 }
 0x397   : > { %v20471_v46 = vadd.f32 %v20164_v45, %v19850_v22  ;;  %v20239_v47 = vpop.f32.mrb[4].mxu0  ;;  %v23853_v48 = vpop.f32.mrb[3].mxu1 }
 0x398   : > { %v20472_v0 = vadd.f32 %v20239_v47, %v19851_v25  ;;  %v23858_v49 = vpop.f32.mrb[5].mxu0 }
 0x39a   : > { %v20314_v50 = vpop.f32.mrb[4].mxu1 }
 0x39b   : > { %v20473_v51 = vadd.f32 %v20314_v50, %v19852_v28  ;;  %v20389_v52 = vpop.f32.mrb[6].mxu0  ;;  %v23863_v54 = vpop.f32.mrb[5].mxu1 }
 0x39c   : > { %v20474_v56 = vadd.f32 %v20389_v52, %v19853_v31  ;;  %v23868_v53 = vpop.f32.mrb[7].mxu0 }
 0x39e   : > { %v20464_v57 = vpop.f32.mrb[6].mxu1 }
 0x39f   : > { %v20475_v59 = vadd.f32 %v20464_v57, %v19854_v34  ;;  %v20560_v55 = vpop.f32.mrb[8].mxu0  ;;  %v23873_v61 = vpop.f32.mrb[7].mxu1 }
 0x3a0   : > { %v21089_v62 = vadd.f32 %v20560_v55, %v20468_v37  ;;  %v23878_v63 = vpop.f32.mrb[9].mxu0 }
 0x3a2   : > { %v21103_v60 = vadd.f32 %v21101_v58, %v21089_v62  ;;  %v20635_v1 = vpop.f32.mrb[8].mxu1 }
 0x3a3   : > { %v21090_v2 = vadd.f32 %v20635_v1, %v20469_v40  ;;  %v20710_v3 = vpop.f32.mrb[10].mxu0  ;;  %v23883_v4 = vpop.f32.mrb[9].mxu1 }
 0x3a4   : > { %21112 = vst.msk [vmem:[%s26694_s29] sm:$0xf] %vm21111_vm3, %v21103_v60  ;;  %v21091_v5 = vadd.f32 %v20710_v3, %v20470_v43  ;;  %v23888_v6 = vpop.f32.mrb[11].mxu0 }
 0x3a5   : > { %v21104_v7 = vadd.f32 %v21101_v58, %v21090_v2 }
 0x3a6   : > { %v21105_v8 = vadd.f32 %v21101_v58, %v21091_v5  ;;  %v20785_v9 = vpop.f32.mrb[10].mxu1 }
 0x3a7   : > { %21113 = vst.msk [vmem:[%s26694_s29 + $0x4] sm:$0xf] %vm21111_vm3, %v21104_v7  ;;  %v21092_v10 = vadd.f32 %v20785_v9, %v20471_v46  ;;  %v20860_v11 = vpop.f32.mrb[12].mxu0  ;;  %v23893_v12 = vpop.f32.mrb[11].mxu1 }
 0x3a8   : > { %21114 = vst.msk [vmem:[%s26694_s29 + $0x8] sm:$0xf] %vm21111_vm3, %v21105_v8  ;;  %v21093_v13 = vadd.f32 %v20860_v11, %v20472_v0  ;;  %v23898_v14 = vpop.f32.mrb[13].mxu0 }
 0x3a9   : > { %v21106_v15 = vadd.f32 %v21101_v58, %v21092_v10 }
 0x3aa   : > { %v21107_v16 = vadd.f32 %v21101_v58, %v21093_v13  ;;  %v20935_v17 = vpop.f32.mrb[12].mxu1 }
 0x3ab   : > { %21115 = vst.msk [vmem:[%s26694_s29 + $0xc] sm:$0xf] %vm21111_vm3, %v21106_v15  ;;  %v21094_v18 = vadd.f32 %v20935_v17, %v20473_v51  ;;  %v21010_v19 = vpop.f32.mrb[14].mxu0  ;;  %v23903_v20 = vpop.f32.mrb[13].mxu1 }
 0x3ac   : > { %21116 = vst.msk [vmem:[%s26694_s29 + $0x10] sm:$0xf] %vm21111_vm3, %v21107_v16  ;;  %v21095_v21 = vadd.f32 %v21010_v19, %v20474_v56  ;;  %v23908_v22 = vpop.f32.mrb[15].mxu0 }
 0x3ad   : > { %v21108_v23 = vadd.f32 %v21101_v58, %v21094_v18 }
 0x3ae   : > { %v21109_v24 = vadd.f32 %v21101_v58, %v21095_v21  ;;  %v21085_v25 = vpop.f32.mrb[14].mxu1 }
 0x3af   : > { %21117 = vst.msk [vmem:[%s26694_s29 + $0x14] sm:$0xf] %vm21111_vm3, %v21108_v23  ;;  %v21096_v26 = vadd.f32 %v21085_v25, %v20475_v59  ;;  %v23913_v27 = vpop.f32.mrb[15].mxu1 }
 0x3b0   : > { %21118 = vst.msk [vmem:[%s26694_s29 + $0x18] sm:$0xf] %vm21111_vm3, %v21109_v24 }
 0x3b1   : > { %v21110_v28 = vadd.f32 %v21101_v58, %v21096_v26 }
 0x3b3   : > { %21119 = vst.msk [vmem:[%s26694_s29 + $0x1c] sm:$0xf] %vm21111_vm3, %v21110_v28 }
 0x3b4 PF: > { %s14_s15 = sadd.s32 1, %s23935_s15  }
 0x3b5   : > { %p11_p4 = scmp.ge.s32.totalorder %s14_s15, 4  }
 0x3b7   :  { %13 = sbr.rel (!%p11_p4) target bundleno = 1 (0x1), region = 107 }

</bundles_post_ra>
